<compile_context>
chip_gen: v7x
topology: tpu7x:2x2x1
jax: 0.10.0
libtpu: 0.0.40
codegen_flags: <defaults>
</compile_context>

<pallas_src>
import functools

import jax
import jax.numpy as jnp
from jax.experimental import pallas as pl
from jax.experimental.pallas import tpu as pltpu


# ----------------------------- Fused Pallas kernel ------------------------------


def _fused_lstm_fc_kernel(*refs, seq_len, batch, hidden_dim, num_layers, output_dim,
                          matmul_dtype):
    """All LSTM layers + FC head in one kernel, wavefront-interleaved over (t, layer).

    refs layout (positional, as passed by pallas_call):
      x_ref                      : (T*B, D)    time-major-flattened input (flattened on host)
      per layer l in [0, L):
        w_ih_g_ref               : (4, D_in, H)  per-gate input->hidden blocks, pre-transposed
        w_hh_g_ref               : (4, H, H)     per-gate hidden->hidden blocks, pre-transposed
        b_g_ref                  : (4, 1, H)     per-gate combined bias (b_ih + b_hh), f32
      w_fc_ref                   : (1, H) if output_dim == 1 else (H, O)
      b_fc_ref                   : (1, O)
      out_ref                    : (B, O)
    """
    T, B, H = seq_len, batch, hidden_dim

    idx = 0
    x_ref = refs[idx]; idx += 1
    layer_refs = []
    for _ in range(num_layers):
        layer_refs.append((refs[idx], refs[idx + 1], refs[idx + 2]))
        idx += 3
    w_fc_ref = refs[idx]; idx += 1
    b_fc_ref = refs[idx]; idx += 1
    out_ref = refs[idx]; idx += 1

    # Per-gate weight/bias blocks, loaded once (small, VMEM/vreg resident).
    # Gate order matches PyTorch: 0=i, 1=f, 2=g, 3=o.
    Wih = [[layer_refs[l][0][k] for k in range(4)] for l in range(num_layers)]
    Whh = [[layer_refs[l][1][k] for k in range(4)] for l in range(num_layers)]
    Bg = [[layer_refs[l][2][k] for k in range(4)] for l in range(num_layers)]

    # Hoisted layer-0 input projection: one (T*B, D) @ (D, H) MXU matmul per gate,
    # entirely off the serial recurrent chain; bias folded in here.
    x_all = x_ref[...].astype(matmul_dtype)
    xg0 = [
        jnp.dot(x_all, Wih[0][k], preferred_element_type=jnp.float32) + Bg[0][k]
        for k in range(4)
    ]  # each (T*B, H)

    # Recurrent state (kept in f32 regardless of matmul operand dtype).
    h = [jnp.zeros((B, H), jnp.float32) for _ in range(num_layers)]
    c = [jnp.zeros((B, H), jnp.float32) for _ in range(num_layers)]

    # Wavefront schedule: t-outer / layer-inner, fully unrolled (T and L are small & static).
    # Layer l's step t is emitted right after layer l-1's step t, so adjacent diagonal cells
    # expose independent MXU->EUP->VPU chains the scheduler can overlap.
    for t in range(T):
        for l in range(num_layers):
            if l == 0:
                # Static, sublane-aligned row slice (B is padded to a multiple of 8 on host).
                g_in = [xg0[k][t * B:(t + 1) * B, :] for k in range(4)]
            else:
                hp = h[l - 1].astype(matmul_dtype)
                g_in = [
                    jnp.dot(hp, Wih[l][k], preferred_element_type=jnp.float32) + Bg[l][k]
                    for k in range(4)
                ]
            hr = h[l].astype(matmul_dtype)
            pre = [
                g_in[k] + jnp.dot(hr, Whh[l][k], preferred_element_type=jnp.float32)
                for k in range(4)
            ]
            i_g = jax.nn.sigmoid(pre[0])
            f_g = jax.nn.sigmoid(pre[1])
            g_g = jnp.tanh(pre[2])
            o_g = jax.nn.sigmoid(pre[3])
            c[l] = f_g * c[l] + i_g * g_g
            h[l] = o_g * jnp.tanh(c[l])

    h_last = h[num_layers - 1]

    # FC head fused into the epilogue (f32).
    if output_dim == 1:
        # VPU multiply + lane reduction; avoids an N=1 MXU matmul.
        out_ref[...] = (
            jnp.sum(h_last * w_fc_ref[...], axis=-1, keepdims=True) + b_fc_ref[...]
        )
    else:
        out_ref[...] = (
            jnp.dot(h_last, w_fc_ref[...], preferred_element_type=jnp.float32)
            + b_fc_ref[...]
        )


# ------------------------------ Host wrappers -------------------------------

_VMEM_SPEC = pl.BlockSpec(memory_space=pltpu.MemorySpace.VMEM)


def _pick_matmul_dtype():
    """bf16 MXU operands on v6e/v7x; f32 elsewhere (v5e has no bf16 VPU/EUP and we keep the
    elementwise/state math f32 anyway, so f32 operands avoid extra conversions there)."""
    try:
        kind = jax.devices()[0].device_kind.lower()
    except Exception:
        return jnp.float32
    if ("v6" in kind) or ("v7" in kind) or ("trillium" in kind):
        return jnp.bfloat16
    return jnp.float32


def prepare_params(raw_params, num_layers, matmul_dtype=jnp.float32):
    """One-time weight prep:
       * split PyTorch [i; f; g; o] row blocks into per-gate (K, H) column blocks (pre-transposed),
       * fuse b_ih + b_hh,
       * cast matmul weights to the MXU operand dtype (biases stay f32)."""
    prepared = {}
    for l in range(num_layers):
        w_ih, w_hh, b_ih, b_hh = raw_params[f"lstm_l{l}"]
        H = w_hh.shape[1]
        b = (b_ih + b_hh).astype(jnp.float32)

        def gate_blocks(w):  # (4H, K) -> (4, K, H)
            return jnp.stack(
                [jnp.transpose(w[k * H:(k + 1) * H, :]) for k in range(4)], axis=0)

        prepared[f"lstm_l{l}"] = (
            gate_blocks(w_ih).astype(matmul_dtype),                               # (4, D_in, H)
            gate_blocks(w_hh).astype(matmul_dtype),                               # (4, H, H)
            jnp.stack([b[k * H:(k + 1) * H].reshape(1, H) for k in range(4)], 0), # (4, 1, H) f32
        )
    w_fc, b_fc = raw_params["fc"]
    out_dim = w_fc.shape[0]
    if out_dim == 1:
        w_fc_prep = w_fc.reshape(1, -1).astype(jnp.float32)      # (1, H) row for VPU reduce
    else:
        w_fc_prep = jnp.transpose(w_fc).astype(jnp.float32)      # (H, O)
    prepared["fc"] = (w_fc_prep, b_fc.reshape(1, -1).astype(jnp.float32))
    return prepared


def energy_price_lstm_forward(x_btd, prepared_params, hidden_dim, num_layers, output_dim,
                              matmul_dtype=jnp.float32):
    """x_btd: (batch, seq, input_dim) — matches PyTorch batch_first=True."""
    B_in, T, D = x_btd.shape
    H = hidden_dim

    # Pad batch to a multiple of 8 so per-step (B, H) ops fill the f32 sublanes;
    # padded rows (zeros) are computed and then discarded.
    B = ((B_in + 7) // 8) * 8
    x = x_btd.astype(jnp.float32)
    if B != B_in:
        x = jnp.pad(x, ((0, B - B_in), (0, 0), (0, 0)))

    # Host-side (XLA) time-major flatten: the kernel never reshapes across (8,128) tiles.
    x_flat = jnp.transpose(x, (1, 0, 2)).reshape(T * B, D)

    inputs = [x_flat]
    in_specs = [_VMEM_SPEC]
    flops = 0
    bytes_accessed = x_flat.size * x_flat.dtype.itemsize
    for l in range(num_layers):
        w_ih_g, w_hh_g, b_g = prepared_params[f"lstm_l{l}"]
        inputs += [w_ih_g, w_hh_g, b_g]
        in_specs += [_VMEM_SPEC] * 3
        d_in = w_ih_g.shape[1]
        flops += 2 * T * B * (d_in + H) * 4 * H
        bytes_accessed += sum(int(a.size) * a.dtype.itemsize for a in (w_ih_g, w_hh_g, b_g))
    w_fc, b_fc = prepared_params["fc"]
    inputs += [w_fc, b_fc]
    in_specs += [_VMEM_SPEC] * 2
    flops += 2 * B * H * output_dim
    bytes_accessed += (int(w_fc.size) + int(b_fc.size) + B * output_dim) * 4
    # 3 sigmoid + 2 tanh over (B, H) lanes per layer per step.
    transcendentals = num_layers * T * B * 5 * H

    # VMEM scaling guard: everything is whole-array resident; keep an explicit scoped limit
    # (v7x: 64 MiB physical; v5e: 16 MiB default scoped).
    vmem_limit = min(64 * 1024 * 1024,
                     max(32 * 1024 * 1024, 4 * int(bytes_accessed) + (1 << 20)))

    out = pl.pallas_call(
        functools.partial(
            _fused_lstm_fc_kernel,
            seq_len=T, batch=B, hidden_dim=H,
            num_layers=num_layers, output_dim=output_dim,
            matmul_dtype=matmul_dtype,
        ),
        out_shape=jax.ShapeDtypeStruct((B, output_dim), jnp.float32),
        in_specs=in_specs,
        out_specs=_VMEM_SPEC,
        compiler_params=pltpu.CompilerParams(vmem_limit_bytes=int(vmem_limit)),
        cost_estimate=pl.CostEstimate(
            flops=int(flops),
            transcendentals=int(transcendentals),
            bytes_accessed=int(bytes_accessed),
        ),
    )(*inputs)
    return out[:B_in]


# -------------------------- Reference (pure JAX, f32) ----------------------------


def _reference_forward(x_btd, raw_params, hidden_dim, num_layers):
    x = jnp.transpose(x_btd, (1, 0, 2)).astype(jnp.float32)
    T, B, _ = x.shape
    H = hidden_dim
    hfin = None
    for layer in range(num_layers):
        w_ih, w_hh, b_ih, b_hh = raw_params[f"lstm_l{layer}"]
        h = jnp.zeros((B, H), jnp.float32)
        c = jnp.zeros((B, H), jnp.float32)
        outs = []
        for t in range(T):
            gates = x[t] @ w_ih.T + h @ w_hh.T + b_ih + b_hh
            i = jax.nn.sigmoid(gates[:, 0 * H:1 * H])
            f = jax.nn.sigmoid(gates[:, 1 * H:2 * H])
            g = jnp.tanh(gates[:, 2 * H:3 * H])
            o = jax.nn.sigmoid(gates[:, 3 * H:4 * H])
            c = f * c + i * g
            h = o * jnp.tanh(c)
            outs.append(h)
        x = jnp.stack(outs, axis=0)
        hfin = h
    w_fc, b_fc = raw_params["fc"]
    return hfin @ w_fc.T + b_fc


# --------------------------------- Main --------------------------------------

if __name__ == "__main__":
    # Small shapes consistent with the module's forward.
    batch, seq = 2, 8
    input_dim, hidden_dim, num_layers, output_dim = 8, 32, 2, 1

    key = jax.random.PRNGKey(0)

    def uniform(key, shape, scale):
        return jax.random.uniform(key, shape, jnp.float32, -scale, scale)

    # Deterministic parameter init (PyTorch-style U(-1/sqrt(H), 1/sqrt(H))).
    stdv = 1.0 / (hidden_dim ** 0.5)
    raw_params = {}
    for layer in range(num_layers):
        in_dim = input_dim if layer == 0 else hidden_dim
        key, k1, k2, k3, k4 = jax.random.split(key, 5)
        raw_params[f"lstm_l{layer}"] = (
            uniform(k1, (4 * hidden_dim, in_dim), stdv),       # W_ih
            uniform(k2, (4 * hidden_dim, hidden_dim), stdv),   # W_hh
            uniform(k3, (4 * hidden_dim,), stdv),              # b_ih
            uniform(k4, (4 * hidden_dim,), stdv),              # b_hh
        )
    key, k1, k2 = jax.random.split(key, 3)
    raw_params["fc"] = (
        uniform(k1, (output_dim, hidden_dim), stdv),           # W_fc
        uniform(k2, (output_dim,), stdv),                      # b_fc
    )

    key, kx = jax.random.split(key)
    x = jax.random.normal(kx, (batch, seq, input_dim), jnp.float32)

    # MXU operand dtype: bf16 on v6e/v7x, f32 otherwise. State/gate math is always f32.
    matmul_dtype = _pick_matmul_dtype()

    # One-time weight prep (done at init, not per forward call).
    prepared = prepare_params(raw_params, num_layers, matmul_dtype=matmul_dtype)

    out = energy_price_lstm_forward(x, prepared, hidden_dim, num_layers, output_dim,
                                    matmul_dtype=matmul_dtype)
    out = jax.block_until_ready(out)

    ref = _reference_forward(x, raw_params, hidden_dim, num_layers)
    assert out.shape == (batch, output_dim), out.shape
    if matmul_dtype == jnp.float32:
        atol = rtol = 1e-5
    else:  # bf16 MXU operands: looser tolerance vs. the f32 reference.
        atol = rtol = 3e-2
    assert jnp.allclose(out, ref, atol=atol, rtol=rtol), (out, ref)

    print("KERNEL_OK")
</pallas_src>

<mosaic_0001>
module attributes {stable_mosaic.version = 11 : i64} {
  func.func @_fused_lstm_fc_kernel(%arg0: memref<64x8xf32, #tpu.memory_space<vmem>>, %arg1: memref<4x8x32xf32, #tpu.memory_space<vmem>>, %arg2: memref<4x32x32xf32, #tpu.memory_space<vmem>>, %arg3: memref<4x1x32xf32, #tpu.memory_space<vmem>>, %arg4: memref<4x32x32xf32, #tpu.memory_space<vmem>>, %arg5: memref<4x32x32xf32, #tpu.memory_space<vmem>>, %arg6: memref<4x1x32xf32, #tpu.memory_space<vmem>>, %arg7: memref<1x32xf32, #tpu.memory_space<vmem>>, %arg8: memref<1x1xf32, #tpu.memory_space<vmem>>, %arg9: memref<8x1xf32, #tpu.memory_space<vmem>>) attributes {dimension_semantics = [], scalar_prefetch = 0 : i64, scratch_operands = 0 : i64, tpu.core_type = #tpu.core_type<tc>} {
    %c0 = arith.constant 0 : index
    %c0_0 = arith.constant 0 : index
    %c0_1 = arith.constant 0 : index
    %0 = vector.load %arg1[%c0, %c0_0, %c0_1] : memref<4x8x32xf32, #tpu.memory_space<vmem>>, vector<1x8x32xf32>
    %1 = vector.shape_cast %0 : vector<1x8x32xf32> to vector<8x32xf32>
    %c1 = arith.constant 1 : index
    %c0_2 = arith.constant 0 : index
    %c0_3 = arith.constant 0 : index
    %2 = vector.load %arg1[%c1, %c0_2, %c0_3] : memref<4x8x32xf32, #tpu.memory_space<vmem>>, vector<1x8x32xf32>
    %3 = vector.shape_cast %2 : vector<1x8x32xf32> to vector<8x32xf32>
    %c2 = arith.constant 2 : index
    %c0_4 = arith.constant 0 : index
    %c0_5 = arith.constant 0 : index
    %4 = vector.load %arg1[%c2, %c0_4, %c0_5] : memref<4x8x32xf32, #tpu.memory_space<vmem>>, vector<1x8x32xf32>
    %5 = vector.shape_cast %4 : vector<1x8x32xf32> to vector<8x32xf32>
    %c3 = arith.constant 3 : index
    %c0_6 = arith.constant 0 : index
    %c0_7 = arith.constant 0 : index
    %6 = vector.load %arg1[%c3, %c0_6, %c0_7] : memref<4x8x32xf32, #tpu.memory_space<vmem>>, vector<1x8x32xf32>
    %7 = vector.shape_cast %6 : vector<1x8x32xf32> to vector<8x32xf32>
    %c0_8 = arith.constant 0 : index
    %c0_9 = arith.constant 0 : index
    %c0_10 = arith.constant 0 : index
    %8 = vector.load %arg4[%c0_8, %c0_9, %c0_10] : memref<4x32x32xf32, #tpu.memory_space<vmem>>, vector<1x32x32xf32>
    %9 = vector.shape_cast %8 : vector<1x32x32xf32> to vector<32x32xf32>
    %c1_11 = arith.constant 1 : index
    %c0_12 = arith.constant 0 : index
    %c0_13 = arith.constant 0 : index
    %10 = vector.load %arg4[%c1_11, %c0_12, %c0_13] : memref<4x32x32xf32, #tpu.memory_space<vmem>>, vector<1x32x32xf32>
    %11 = vector.shape_cast %10 : vector<1x32x32xf32> to vector<32x32xf32>
    %c2_14 = arith.constant 2 : index
    %c0_15 = arith.constant 0 : index
    %c0_16 = arith.constant 0 : index
    %12 = vector.load %arg4[%c2_14, %c0_15, %c0_16] : memref<4x32x32xf32, #tpu.memory_space<vmem>>, vector<1x32x32xf32>
    %13 = vector.shape_cast %12 : vector<1x32x32xf32> to vector<32x32xf32>
    %c3_17 = arith.constant 3 : index
    %c0_18 = arith.constant 0 : index
    %c0_19 = arith.constant 0 : index
    %14 = vector.load %arg4[%c3_17, %c0_18, %c0_19] : memref<4x32x32xf32, #tpu.memory_space<vmem>>, vector<1x32x32xf32>
    %15 = vector.shape_cast %14 : vector<1x32x32xf32> to vector<32x32xf32>
    %c0_20 = arith.constant 0 : index
    %c0_21 = arith.constant 0 : index
    %c0_22 = arith.constant 0 : index
    %16 = vector.load %arg2[%c0_20, %c0_21, %c0_22] : memref<4x32x32xf32, #tpu.memory_space<vmem>>, vector<1x32x32xf32>
    %17 = vector.shape_cast %16 : vector<1x32x32xf32> to vector<32x32xf32>
    %c1_23 = arith.constant 1 : index
    %c0_24 = arith.constant 0 : index
    %c0_25 = arith.constant 0 : index
    %18 = vector.load %arg2[%c1_23, %c0_24, %c0_25] : memref<4x32x32xf32, #tpu.memory_space<vmem>>, vector<1x32x32xf32>
    %19 = vector.shape_cast %18 : vector<1x32x32xf32> to vector<32x32xf32>
    %c2_26 = arith.constant 2 : index
    %c0_27 = arith.constant 0 : index
    %c0_28 = arith.constant 0 : index
    %20 = vector.load %arg2[%c2_26, %c0_27, %c0_28] : memref<4x32x32xf32, #tpu.memory_space<vmem>>, vector<1x32x32xf32>
    %21 = vector.shape_cast %20 : vector<1x32x32xf32> to vector<32x32xf32>
    %c3_29 = arith.constant 3 : index
    %c0_30 = arith.constant 0 : index
    %c0_31 = arith.constant 0 : index
    %22 = vector.load %arg2[%c3_29, %c0_30, %c0_31] : memref<4x32x32xf32, #tpu.memory_space<vmem>>, vector<1x32x32xf32>
    %23 = vector.shape_cast %22 : vector<1x32x32xf32> to vector<32x32xf32>
    %c0_32 = arith.constant 0 : index
    %c0_33 = arith.constant 0 : index
    %c0_34 = arith.constant 0 : index
    %24 = vector.load %arg5[%c0_32, %c0_33, %c0_34] : memref<4x32x32xf32, #tpu.memory_space<vmem>>, vector<1x32x32xf32>
    %25 = vector.shape_cast %24 : vector<1x32x32xf32> to vector<32x32xf32>
    %c1_35 = arith.constant 1 : index
    %c0_36 = arith.constant 0 : index
    %c0_37 = arith.constant 0 : index
    %26 = vector.load %arg5[%c1_35, %c0_36, %c0_37] : memref<4x32x32xf32, #tpu.memory_space<vmem>>, vector<1x32x32xf32>
    %27 = vector.shape_cast %26 : vector<1x32x32xf32> to vector<32x32xf32>
    %c2_38 = arith.constant 2 : index
    %c0_39 = arith.constant 0 : index
    %c0_40 = arith.constant 0 : index
    %28 = vector.load %arg5[%c2_38, %c0_39, %c0_40] : memref<4x32x32xf32, #tpu.memory_space<vmem>>, vector<1x32x32xf32>
    %29 = vector.shape_cast %28 : vector<1x32x32xf32> to vector<32x32xf32>
    %c3_41 = arith.constant 3 : index
    %c0_42 = arith.constant 0 : index
    %c0_43 = arith.constant 0 : index
    %30 = vector.load %arg5[%c3_41, %c0_42, %c0_43] : memref<4x32x32xf32, #tpu.memory_space<vmem>>, vector<1x32x32xf32>
    %31 = vector.shape_cast %30 : vector<1x32x32xf32> to vector<32x32xf32>
    %c0_44 = arith.constant 0 : index
    %c0_45 = arith.constant 0 : index
    %c0_46 = arith.constant 0 : index
    %32 = vector.load %arg3[%c0_44, %c0_45, %c0_46] : memref<4x1x32xf32, #tpu.memory_space<vmem>>, vector<1x1x32xf32>
    %33 = vector.shape_cast %32 : vector<1x1x32xf32> to vector<1x32xf32>
    %c1_47 = arith.constant 1 : index
    %c0_48 = arith.constant 0 : index
    %c0_49 = arith.constant 0 : index
    %34 = vector.load %arg3[%c1_47, %c0_48, %c0_49] : memref<4x1x32xf32, #tpu.memory_space<vmem>>, vector<1x1x32xf32>
    %35 = vector.shape_cast %34 : vector<1x1x32xf32> to vector<1x32xf32>
    %c2_50 = arith.constant 2 : index
    %c0_51 = arith.constant 0 : index
    %c0_52 = arith.constant 0 : index
    %36 = vector.load %arg3[%c2_50, %c0_51, %c0_52] : memref<4x1x32xf32, #tpu.memory_space<vmem>>, vector<1x1x32xf32>
    %37 = vector.shape_cast %36 : vector<1x1x32xf32> to vector<1x32xf32>
    %c3_53 = arith.constant 3 : index
    %c0_54 = arith.constant 0 : index
    %c0_55 = arith.constant 0 : index
    %38 = vector.load %arg3[%c3_53, %c0_54, %c0_55] : memref<4x1x32xf32, #tpu.memory_space<vmem>>, vector<1x1x32xf32>
    %39 = vector.shape_cast %38 : vector<1x1x32xf32> to vector<1x32xf32>
    %c0_56 = arith.constant 0 : index
    %c0_57 = arith.constant 0 : index
    %c0_58 = arith.constant 0 : index
    %40 = vector.load %arg6[%c0_56, %c0_57, %c0_58] : memref<4x1x32xf32, #tpu.memory_space<vmem>>, vector<1x1x32xf32>
    %41 = vector.shape_cast %40 : vector<1x1x32xf32> to vector<1x32xf32>
    %c1_59 = arith.constant 1 : index
    %c0_60 = arith.constant 0 : index
    %c0_61 = arith.constant 0 : index
    %42 = vector.load %arg6[%c1_59, %c0_60, %c0_61] : memref<4x1x32xf32, #tpu.memory_space<vmem>>, vector<1x1x32xf32>
    %43 = vector.shape_cast %42 : vector<1x1x32xf32> to vector<1x32xf32>
    %c2_62 = arith.constant 2 : index
    %c0_63 = arith.constant 0 : index
    %c0_64 = arith.constant 0 : index
    %44 = vector.load %arg6[%c2_62, %c0_63, %c0_64] : memref<4x1x32xf32, #tpu.memory_space<vmem>>, vector<1x1x32xf32>
    %45 = vector.shape_cast %44 : vector<1x1x32xf32> to vector<1x32xf32>
    %c3_65 = arith.constant 3 : index
    %c0_66 = arith.constant 0 : index
    %c0_67 = arith.constant 0 : index
    %46 = vector.load %arg6[%c3_65, %c0_66, %c0_67] : memref<4x1x32xf32, #tpu.memory_space<vmem>>, vector<1x1x32xf32>
    %47 = vector.shape_cast %46 : vector<1x1x32xf32> to vector<1x32xf32>
    %c0_68 = arith.constant 0 : index
    %c0_69 = arith.constant 0 : index
    %48 = vector.load %arg0[%c0_68, %c0_69] : memref<64x8xf32, #tpu.memory_space<vmem>>, vector<64x8xf32>
    %cst = arith.constant dense<0.000000e+00> : vector<64x32xf32>
    %49 = tpu.matmul %48, %1, %cst {dimension_numbers = #tpu.dot_dimension_numbers<[1], [0], [0], [1], [0, 0, 1, 1], [], []>} : vector<64x8xf32>, vector<8x32xf32>, vector<64x32xf32> -> vector<64x32xf32>
    %50 = vector.broadcast %33 : vector<1x32xf32> to vector<64x32xf32>
    %51 = arith.addf %49, %50 : vector<64x32xf32>
    %cst_70 = arith.constant dense<0.000000e+00> : vector<64x32xf32>
    %52 = tpu.matmul %48, %3, %cst_70 {dimension_numbers = #tpu.dot_dimension_numbers<[1], [0], [0], [1], [0, 0, 1, 1], [], []>} : vector<64x8xf32>, vector<8x32xf32>, vector<64x32xf32> -> vector<64x32xf32>
    %53 = vector.broadcast %35 : vector<1x32xf32> to vector<64x32xf32>
    %54 = arith.addf %52, %53 : vector<64x32xf32>
    %cst_71 = arith.constant dense<0.000000e+00> : vector<64x32xf32>
    %55 = tpu.matmul %48, %5, %cst_71 {dimension_numbers = #tpu.dot_dimension_numbers<[1], [0], [0], [1], [0, 0, 1, 1], [], []>} : vector<64x8xf32>, vector<8x32xf32>, vector<64x32xf32> -> vector<64x32xf32>
    %56 = vector.broadcast %37 : vector<1x32xf32> to vector<64x32xf32>
    %57 = arith.addf %55, %56 : vector<64x32xf32>
    %cst_72 = arith.constant dense<0.000000e+00> : vector<64x32xf32>
    %58 = tpu.matmul %48, %7, %cst_72 {dimension_numbers = #tpu.dot_dimension_numbers<[1], [0], [0], [1], [0, 0, 1, 1], [], []>} : vector<64x8xf32>, vector<8x32xf32>, vector<64x32xf32> -> vector<64x32xf32>
    %59 = vector.broadcast %39 : vector<1x32xf32> to vector<64x32xf32>
    %60 = arith.addf %58, %59 : vector<64x32xf32>
    %cst_73 = arith.constant 0.000000e+00 : f32
    %61 = vector.broadcast %cst_73 : f32 to vector<8x32xf32>
    %cst_74 = arith.constant 0.000000e+00 : f32
    %62 = vector.broadcast %cst_74 : f32 to vector<8x32xf32>
    %cst_75 = arith.constant 0.000000e+00 : f32
    %63 = vector.broadcast %cst_75 : f32 to vector<8x32xf32>
    %cst_76 = arith.constant 0.000000e+00 : f32
    %64 = vector.broadcast %cst_76 : f32 to vector<8x32xf32>
    %65 = vector.extract_strided_slice %51 {offsets = [0, 0], sizes = [8, 32], strides = [1, 1]} : vector<64x32xf32> to vector<8x32xf32>
    %66 = vector.extract_strided_slice %54 {offsets = [0, 0], sizes = [8, 32], strides = [1, 1]} : vector<64x32xf32> to vector<8x32xf32>
    %67 = vector.extract_strided_slice %57 {offsets = [0, 0], sizes = [8, 32], strides = [1, 1]} : vector<64x32xf32> to vector<8x32xf32>
    %68 = vector.extract_strided_slice %60 {offsets = [0, 0], sizes = [8, 32], strides = [1, 1]} : vector<64x32xf32> to vector<8x32xf32>
    %cst_77 = arith.constant dense<0.000000e+00> : vector<8x32xf32>
    %69 = tpu.matmul %61, %17, %cst_77 {dimension_numbers = #tpu.dot_dimension_numbers<[1], [0], [0], [1], [0, 0, 1, 1], [], []>} : vector<8x32xf32>, vector<32x32xf32>, vector<8x32xf32> -> vector<8x32xf32>
    %70 = arith.addf %65, %69 : vector<8x32xf32>
    %cst_78 = arith.constant dense<0.000000e+00> : vector<8x32xf32>
    %71 = tpu.matmul %61, %19, %cst_78 {dimension_numbers = #tpu.dot_dimension_numbers<[1], [0], [0], [1], [0, 0, 1, 1], [], []>} : vector<8x32xf32>, vector<32x32xf32>, vector<8x32xf32> -> vector<8x32xf32>
    %72 = arith.addf %66, %71 : vector<8x32xf32>
    %cst_79 = arith.constant dense<0.000000e+00> : vector<8x32xf32>
    %73 = tpu.matmul %61, %21, %cst_79 {dimension_numbers = #tpu.dot_dimension_numbers<[1], [0], [0], [1], [0, 0, 1, 1], [], []>} : vector<8x32xf32>, vector<32x32xf32>, vector<8x32xf32> -> vector<8x32xf32>
    %74 = arith.addf %67, %73 : vector<8x32xf32>
    %cst_80 = arith.constant dense<0.000000e+00> : vector<8x32xf32>
    %75 = tpu.matmul %61, %23, %cst_80 {dimension_numbers = #tpu.dot_dimension_numbers<[1], [0], [0], [1], [0, 0, 1, 1], [], []>} : vector<8x32xf32>, vector<32x32xf32>, vector<8x32xf32> -> vector<8x32xf32>
    %76 = arith.addf %68, %75 : vector<8x32xf32>
    %77 = arith.negf %70 : vector<8x32xf32>
    %78 = math.exp %77 : vector<8x32xf32>
    %cst_81 = arith.constant 1.000000e+00 : f32
    %79 = vector.broadcast %cst_81 : f32 to vector<8x32xf32>
    %80 = arith.addf %79, %78 : vector<8x32xf32>
    %81 = arith.divf %79, %80 : vector<8x32xf32>
    %82 = arith.negf %72 : vector<8x32xf32>
    %83 = math.exp %82 : vector<8x32xf32>
    %cst_82 = arith.constant 1.000000e+00 : f32
    %84 = vector.broadcast %cst_82 : f32 to vector<8x32xf32>
    %85 = arith.addf %84, %83 : vector<8x32xf32>
    %86 = arith.divf %84, %85 : vector<8x32xf32>
    %87 = math.tanh %74 : vector<8x32xf32>
    %88 = arith.negf %76 : vector<8x32xf32>
    %89 = math.exp %88 : vector<8x32xf32>
    %cst_83 = arith.constant 1.000000e+00 : f32
    %90 = vector.broadcast %cst_83 : f32 to vector<8x32xf32>
    %91 = arith.addf %90, %89 : vector<8x32xf32>
    %92 = arith.divf %90, %91 : vector<8x32xf32>
    %93 = arith.mulf %86, %63 : vector<8x32xf32>
    %94 = arith.mulf %81, %87 : vector<8x32xf32>
    %95 = arith.addf %93, %94 : vector<8x32xf32>
    %96 = math.tanh %95 : vector<8x32xf32>
    %97 = arith.mulf %92, %96 : vector<8x32xf32>
    %cst_84 = arith.constant dense<0.000000e+00> : vector<8x32xf32>
    %98 = tpu.matmul %97, %9, %cst_84 {dimension_numbers = #tpu.dot_dimension_numbers<[1], [0], [0], [1], [0, 0, 1, 1], [], []>} : vector<8x32xf32>, vector<32x32xf32>, vector<8x32xf32> -> vector<8x32xf32>
    %99 = vector.broadcast %41 : vector<1x32xf32> to vector<8x32xf32>
    %100 = arith.addf %98, %99 : vector<8x32xf32>
    %cst_85 = arith.constant dense<0.000000e+00> : vector<8x32xf32>
    %101 = tpu.matmul %97, %11, %cst_85 {dimension_numbers = #tpu.dot_dimension_numbers<[1], [0], [0], [1], [0, 0, 1, 1], [], []>} : vector<8x32xf32>, vector<32x32xf32>, vector<8x32xf32> -> vector<8x32xf32>
    %102 = vector.broadcast %43 : vector<1x32xf32> to vector<8x32xf32>
    %103 = arith.addf %101, %102 : vector<8x32xf32>
    %cst_86 = arith.constant dense<0.000000e+00> : vector<8x32xf32>
    %104 = tpu.matmul %97, %13, %cst_86 {dimension_numbers = #tpu.dot_dimension_numbers<[1], [0], [0], [1], [0, 0, 1, 1], [], []>} : vector<8x32xf32>, vector<32x32xf32>, vector<8x32xf32> -> vector<8x32xf32>
    %105 = vector.broadcast %45 : vector<1x32xf32> to vector<8x32xf32>
    %106 = arith.addf %104, %105 : vector<8x32xf32>
    %cst_87 = arith.constant dense<0.000000e+00> : vector<8x32xf32>
    %107 = tpu.matmul %97, %15, %cst_87 {dimension_numbers = #tpu.dot_dimension_numbers<[1], [0], [0], [1], [0, 0, 1, 1], [], []>} : vector<8x32xf32>, vector<32x32xf32>, vector<8x32xf32> -> vector<8x32xf32>
    %108 = vector.broadcast %47 : vector<1x32xf32> to vector<8x32xf32>
    %109 = arith.addf %107, %108 : vector<8x32xf32>
    %cst_88 = arith.constant dense<0.000000e+00> : vector<8x32xf32>
    %110 = tpu.matmul %62, %25, %cst_88 {dimension_numbers = #tpu.dot_dimension_numbers<[1], [0], [0], [1], [0, 0, 1, 1], [], []>} : vector<8x32xf32>, vector<32x32xf32>, vector<8x32xf32> -> vector<8x32xf32>
    %111 = arith.addf %100, %110 : vector<8x32xf32>
    %cst_89 = arith.constant dense<0.000000e+00> : vector<8x32xf32>
    %112 = tpu.matmul %62, %27, %cst_89 {dimension_numbers = #tpu.dot_dimension_numbers<[1], [0], [0], [1], [0, 0, 1, 1], [], []>} : vector<8x32xf32>, vector<32x32xf32>, vector<8x32xf32> -> vector<8x32xf32>
    %113 = arith.addf %103, %112 : vector<8x32xf32>
    %cst_90 = arith.constant dense<0.000000e+00> : vector<8x32xf32>
    %114 = tpu.matmul %62, %29, %cst_90 {dimension_numbers = #tpu.dot_dimension_numbers<[1], [0], [0], [1], [0, 0, 1, 1], [], []>} : vector<8x32xf32>, vector<32x32xf32>, vector<8x32xf32> -> vector<8x32xf32>
    %115 = arith.addf %106, %114 : vector<8x32xf32>
    %cst_91 = arith.constant dense<0.000000e+00> : vector<8x32xf32>
    %116 = tpu.matmul %62, %31, %cst_91 {dimension_numbers = #tpu.dot_dimension_numbers<[1], [0], [0], [1], [0, 0, 1, 1], [], []>} : vector<8x32xf32>, vector<32x32xf32>, vector<8x32xf32> -> vector<8x32xf32>
    %117 = arith.addf %109, %116 : vector<8x32xf32>
    %118 = arith.negf %111 : vector<8x32xf32>
    %119 = math.exp %118 : vector<8x32xf32>
    %cst_92 = arith.constant 1.000000e+00 : f32
    %120 = vector.broadcast %cst_92 : f32 to vector<8x32xf32>
    %121 = arith.addf %120, %119 : vector<8x32xf32>
    %122 = arith.divf %120, %121 : vector<8x32xf32>
    %123 = arith.negf %113 : vector<8x32xf32>
    %124 = math.exp %123 : vector<8x32xf32>
    %cst_93 = arith.constant 1.000000e+00 : f32
    %125 = vector.broadcast %cst_93 : f32 to vector<8x32xf32>
    %126 = arith.addf %125, %124 : vector<8x32xf32>
    %127 = arith.divf %125, %126 : vector<8x32xf32>
    %128 = math.tanh %115 : vector<8x32xf32>
    %129 = arith.negf %117 : vector<8x32xf32>
    %130 = math.exp %129 : vector<8x32xf32>
    %cst_94 = arith.constant 1.000000e+00 : f32
    %131 = vector.broadcast %cst_94 : f32 to vector<8x32xf32>
    %132 = arith.addf %131, %130 : vector<8x32xf32>
    %133 = arith.divf %131, %132 : vector<8x32xf32>
    %134 = arith.mulf %127, %64 : vector<8x32xf32>
    %135 = arith.mulf %122, %128 : vector<8x32xf32>
    %136 = arith.addf %134, %135 : vector<8x32xf32>
    %137 = math.tanh %136 : vector<8x32xf32>
    %138 = arith.mulf %133, %137 : vector<8x32xf32>
    %139 = vector.extract_strided_slice %51 {offsets = [8, 0], sizes = [8, 32], strides = [1, 1]} : vector<64x32xf32> to vector<8x32xf32>
    %140 = vector.extract_strided_slice %54 {offsets = [8, 0], sizes = [8, 32], strides = [1, 1]} : vector<64x32xf32> to vector<8x32xf32>
    %141 = vector.extract_strided_slice %57 {offsets = [8, 0], sizes = [8, 32], strides = [1, 1]} : vector<64x32xf32> to vector<8x32xf32>
    %142 = vector.extract_strided_slice %60 {offsets = [8, 0], sizes = [8, 32], strides = [1, 1]} : vector<64x32xf32> to vector<8x32xf32>
    %cst_95 = arith.constant dense<0.000000e+00> : vector<8x32xf32>
    %143 = tpu.matmul %97, %17, %cst_95 {dimension_numbers = #tpu.dot_dimension_numbers<[1], [0], [0], [1], [0, 0, 1, 1], [], []>} : vector<8x32xf32>, vector<32x32xf32>, vector<8x32xf32> -> vector<8x32xf32>
    %144 = arith.addf %139, %143 : vector<8x32xf32>
    %cst_96 = arith.constant dense<0.000000e+00> : vector<8x32xf32>
    %145 = tpu.matmul %97, %19, %cst_96 {dimension_numbers = #tpu.dot_dimension_numbers<[1], [0], [0], [1], [0, 0, 1, 1], [], []>} : vector<8x32xf32>, vector<32x32xf32>, vector<8x32xf32> -> vector<8x32xf32>
    %146 = arith.addf %140, %145 : vector<8x32xf32>
    %cst_97 = arith.constant dense<0.000000e+00> : vector<8x32xf32>
    %147 = tpu.matmul %97, %21, %cst_97 {dimension_numbers = #tpu.dot_dimension_numbers<[1], [0], [0], [1], [0, 0, 1, 1], [], []>} : vector<8x32xf32>, vector<32x32xf32>, vector<8x32xf32> -> vector<8x32xf32>
    %148 = arith.addf %141, %147 : vector<8x32xf32>
    %cst_98 = arith.constant dense<0.000000e+00> : vector<8x32xf32>
    %149 = tpu.matmul %97, %23, %cst_98 {dimension_numbers = #tpu.dot_dimension_numbers<[1], [0], [0], [1], [0, 0, 1, 1], [], []>} : vector<8x32xf32>, vector<32x32xf32>, vector<8x32xf32> -> vector<8x32xf32>
    %150 = arith.addf %142, %149 : vector<8x32xf32>
    %151 = arith.negf %144 : vector<8x32xf32>
    %152 = math.exp %151 : vector<8x32xf32>
    %cst_99 = arith.constant 1.000000e+00 : f32
    %153 = vector.broadcast %cst_99 : f32 to vector<8x32xf32>
    %154 = arith.addf %153, %152 : vector<8x32xf32>
    %155 = arith.divf %153, %154 : vector<8x32xf32>
    %156 = arith.negf %146 : vector<8x32xf32>
    %157 = math.exp %156 : vector<8x32xf32>
    %cst_100 = arith.constant 1.000000e+00 : f32
    %158 = vector.broadcast %cst_100 : f32 to vector<8x32xf32>
    %159 = arith.addf %158, %157 : vector<8x32xf32>
    %160 = arith.divf %158, %159 : vector<8x32xf32>
    %161 = math.tanh %148 : vector<8x32xf32>
    %162 = arith.negf %150 : vector<8x32xf32>
    %163 = math.exp %162 : vector<8x32xf32>
    %cst_101 = arith.constant 1.000000e+00 : f32
    %164 = vector.broadcast %cst_101 : f32 to vector<8x32xf32>
    %165 = arith.addf %164, %163 : vector<8x32xf32>
    %166 = arith.divf %164, %165 : vector<8x32xf32>
    %167 = arith.mulf %160, %95 : vector<8x32xf32>
    %168 = arith.mulf %155, %161 : vector<8x32xf32>
    %169 = arith.addf %167, %168 : vector<8x32xf32>
    %170 = math.tanh %169 : vector<8x32xf32>
    %171 = arith.mulf %166, %170 : vector<8x32xf32>
    %cst_102 = arith.constant dense<0.000000e+00> : vector<8x32xf32>
    %172 = tpu.matmul %171, %9, %cst_102 {dimension_numbers = #tpu.dot_dimension_numbers<[1], [0], [0], [1], [0, 0, 1, 1], [], []>} : vector<8x32xf32>, vector<32x32xf32>, vector<8x32xf32> -> vector<8x32xf32>
    %173 = vector.broadcast %41 : vector<1x32xf32> to vector<8x32xf32>
    %174 = arith.addf %172, %173 : vector<8x32xf32>
    %cst_103 = arith.constant dense<0.000000e+00> : vector<8x32xf32>
    %175 = tpu.matmul %171, %11, %cst_103 {dimension_numbers = #tpu.dot_dimension_numbers<[1], [0], [0], [1], [0, 0, 1, 1], [], []>} : vector<8x32xf32>, vector<32x32xf32>, vector<8x32xf32> -> vector<8x32xf32>
    %176 = vector.broadcast %43 : vector<1x32xf32> to vector<8x32xf32>
    %177 = arith.addf %175, %176 : vector<8x32xf32>
    %cst_104 = arith.constant dense<0.000000e+00> : vector<8x32xf32>
    %178 = tpu.matmul %171, %13, %cst_104 {dimension_numbers = #tpu.dot_dimension_numbers<[1], [0], [0], [1], [0, 0, 1, 1], [], []>} : vector<8x32xf32>, vector<32x32xf32>, vector<8x32xf32> -> vector<8x32xf32>
    %179 = vector.broadcast %45 : vector<1x32xf32> to vector<8x32xf32>
    %180 = arith.addf %178, %179 : vector<8x32xf32>
    %cst_105 = arith.constant dense<0.000000e+00> : vector<8x32xf32>
    %181 = tpu.matmul %171, %15, %cst_105 {dimension_numbers = #tpu.dot_dimension_numbers<[1], [0], [0], [1], [0, 0, 1, 1], [], []>} : vector<8x32xf32>, vector<32x32xf32>, vector<8x32xf32> -> vector<8x32xf32>
    %182 = vector.broadcast %47 : vector<1x32xf32> to vector<8x32xf32>
    %183 = arith.addf %181, %182 : vector<8x32xf32>
    %cst_106 = arith.constant dense<0.000000e+00> : vector<8x32xf32>
    %184 = tpu.matmul %138, %25, %cst_106 {dimension_numbers = #tpu.dot_dimension_numbers<[1], [0], [0], [1], [0, 0, 1, 1], [], []>} : vector<8x32xf32>, vector<32x32xf32>, vector<8x32xf32> -> vector<8x32xf32>
    %185 = arith.addf %174, %184 : vector<8x32xf32>
    %cst_107 = arith.constant dense<0.000000e+00> : vector<8x32xf32>
    %186 = tpu.matmul %138, %27, %cst_107 {dimension_numbers = #tpu.dot_dimension_numbers<[1], [0], [0], [1], [0, 0, 1, 1], [], []>} : vector<8x32xf32>, vector<32x32xf32>, vector<8x32xf32> -> vector<8x32xf32>
    %187 = arith.addf %177, %186 : vector<8x32xf32>
    %cst_108 = arith.constant dense<0.000000e+00> : vector<8x32xf32>
    %188 = tpu.matmul %138, %29, %cst_108 {dimension_numbers = #tpu.dot_dimension_numbers<[1], [0], [0], [1], [0, 0, 1, 1], [], []>} : vector<8x32xf32>, vector<32x32xf32>, vector<8x32xf32> -> vector<8x32xf32>
    %189 = arith.addf %180, %188 : vector<8x32xf32>
    %cst_109 = arith.constant dense<0.000000e+00> : vector<8x32xf32>
    %190 = tpu.matmul %138, %31, %cst_109 {dimension_numbers = #tpu.dot_dimension_numbers<[1], [0], [0], [1], [0, 0, 1, 1], [], []>} : vector<8x32xf32>, vector<32x32xf32>, vector<8x32xf32> -> vector<8x32xf32>
    %191 = arith.addf %183, %190 : vector<8x32xf32>
    %192 = arith.negf %185 : vector<8x32xf32>
    %193 = math.exp %192 : vector<8x32xf32>
    %cst_110 = arith.constant 1.000000e+00 : f32
    %194 = vector.broadcast %cst_110 : f32 to vector<8x32xf32>
    %195 = arith.addf %194, %193 : vector<8x32xf32>
    %196 = arith.divf %194, %195 : vector<8x32xf32>
    %197 = arith.negf %187 : vector<8x32xf32>
    %198 = math.exp %197 : vector<8x32xf32>
    %cst_111 = arith.constant 1.000000e+00 : f32
    %199 = vector.broadcast %cst_111 : f32 to vector<8x32xf32>
    %200 = arith.addf %199, %198 : vector<8x32xf32>
    %201 = arith.divf %199, %200 : vector<8x32xf32>
    %202 = math.tanh %189 : vector<8x32xf32>
    %203 = arith.negf %191 : vector<8x32xf32>
    %204 = math.exp %203 : vector<8x32xf32>
    %cst_112 = arith.constant 1.000000e+00 : f32
    %205 = vector.broadcast %cst_112 : f32 to vector<8x32xf32>
    %206 = arith.addf %205, %204 : vector<8x32xf32>
    %207 = arith.divf %205, %206 : vector<8x32xf32>
    %208 = arith.mulf %201, %136 : vector<8x32xf32>
    %209 = arith.mulf %196, %202 : vector<8x32xf32>
    %210 = arith.addf %208, %209 : vector<8x32xf32>
    %211 = math.tanh %210 : vector<8x32xf32>
    %212 = arith.mulf %207, %211 : vector<8x32xf32>
    %213 = vector.extract_strided_slice %51 {offsets = [16, 0], sizes = [8, 32], strides = [1, 1]} : vector<64x32xf32> to vector<8x32xf32>
    %214 = vector.extract_strided_slice %54 {offsets = [16, 0], sizes = [8, 32], strides = [1, 1]} : vector<64x32xf32> to vector<8x32xf32>
    %215 = vector.extract_strided_slice %57 {offsets = [16, 0], sizes = [8, 32], strides = [1, 1]} : vector<64x32xf32> to vector<8x32xf32>
    %216 = vector.extract_strided_slice %60 {offsets = [16, 0], sizes = [8, 32], strides = [1, 1]} : vector<64x32xf32> to vector<8x32xf32>
    %cst_113 = arith.constant dense<0.000000e+00> : vector<8x32xf32>
    %217 = tpu.matmul %171, %17, %cst_113 {dimension_numbers = #tpu.dot_dimension_numbers<[1], [0], [0], [1], [0, 0, 1, 1], [], []>} : vector<8x32xf32>, vector<32x32xf32>, vector<8x32xf32> -> vector<8x32xf32>
    %218 = arith.addf %213, %217 : vector<8x32xf32>
    %cst_114 = arith.constant dense<0.000000e+00> : vector<8x32xf32>
    %219 = tpu.matmul %171, %19, %cst_114 {dimension_numbers = #tpu.dot_dimension_numbers<[1], [0], [0], [1], [0, 0, 1, 1], [], []>} : vector<8x32xf32>, vector<32x32xf32>, vector<8x32xf32> -> vector<8x32xf32>
    %220 = arith.addf %214, %219 : vector<8x32xf32>
    %cst_115 = arith.constant dense<0.000000e+00> : vector<8x32xf32>
    %221 = tpu.matmul %171, %21, %cst_115 {dimension_numbers = #tpu.dot_dimension_numbers<[1], [0], [0], [1], [0, 0, 1, 1], [], []>} : vector<8x32xf32>, vector<32x32xf32>, vector<8x32xf32> -> vector<8x32xf32>
    %222 = arith.addf %215, %221 : vector<8x32xf32>
    %cst_116 = arith.constant dense<0.000000e+00> : vector<8x32xf32>
    %223 = tpu.matmul %171, %23, %cst_116 {dimension_numbers = #tpu.dot_dimension_numbers<[1], [0], [0], [1], [0, 0, 1, 1], [], []>} : vector<8x32xf32>, vector<32x32xf32>, vector<8x32xf32> -> vector<8x32xf32>
    %224 = arith.addf %216, %223 : vector<8x32xf32>
    %225 = arith.negf %218 : vector<8x32xf32>
    %226 = math.exp %225 : vector<8x32xf32>
    %cst_117 = arith.constant 1.000000e+00 : f32
    %227 = vector.broadcast %cst_117 : f32 to vector<8x32xf32>
    %228 = arith.addf %227, %226 : vector<8x32xf32>
    %229 = arith.divf %227, %228 : vector<8x32xf32>
    %230 = arith.negf %220 : vector<8x32xf32>
    %231 = math.exp %230 : vector<8x32xf32>
    %cst_118 = arith.constant 1.000000e+00 : f32
    %232 = vector.broadcast %cst_118 : f32 to vector<8x32xf32>
    %233 = arith.addf %232, %231 : vector<8x32xf32>
    %234 = arith.divf %232, %233 : vector<8x32xf32>
    %235 = math.tanh %222 : vector<8x32xf32>
    %236 = arith.negf %224 : vector<8x32xf32>
    %237 = math.exp %236 : vector<8x32xf32>
    %cst_119 = arith.constant 1.000000e+00 : f32
    %238 = vector.broadcast %cst_119 : f32 to vector<8x32xf32>
    %239 = arith.addf %238, %237 : vector<8x32xf32>
    %240 = arith.divf %238, %239 : vector<8x32xf32>
    %241 = arith.mulf %234, %169 : vector<8x32xf32>
    %242 = arith.mulf %229, %235 : vector<8x32xf32>
    %243 = arith.addf %241, %242 : vector<8x32xf32>
    %244 = math.tanh %243 : vector<8x32xf32>
    %245 = arith.mulf %240, %244 : vector<8x32xf32>
    %cst_120 = arith.constant dense<0.000000e+00> : vector<8x32xf32>
    %246 = tpu.matmul %245, %9, %cst_120 {dimension_numbers = #tpu.dot_dimension_numbers<[1], [0], [0], [1], [0, 0, 1, 1], [], []>} : vector<8x32xf32>, vector<32x32xf32>, vector<8x32xf32> -> vector<8x32xf32>
    %247 = vector.broadcast %41 : vector<1x32xf32> to vector<8x32xf32>
    %248 = arith.addf %246, %247 : vector<8x32xf32>
    %cst_121 = arith.constant dense<0.000000e+00> : vector<8x32xf32>
    %249 = tpu.matmul %245, %11, %cst_121 {dimension_numbers = #tpu.dot_dimension_numbers<[1], [0], [0], [1], [0, 0, 1, 1], [], []>} : vector<8x32xf32>, vector<32x32xf32>, vector<8x32xf32> -> vector<8x32xf32>
    %250 = vector.broadcast %43 : vector<1x32xf32> to vector<8x32xf32>
    %251 = arith.addf %249, %250 : vector<8x32xf32>
    %cst_122 = arith.constant dense<0.000000e+00> : vector<8x32xf32>
    %252 = tpu.matmul %245, %13, %cst_122 {dimension_numbers = #tpu.dot_dimension_numbers<[1], [0], [0], [1], [0, 0, 1, 1], [], []>} : vector<8x32xf32>, vector<32x32xf32>, vector<8x32xf32> -> vector<8x32xf32>
    %253 = vector.broadcast %45 : vector<1x32xf32> to vector<8x32xf32>
    %254 = arith.addf %252, %253 : vector<8x32xf32>
    %cst_123 = arith.constant dense<0.000000e+00> : vector<8x32xf32>
    %255 = tpu.matmul %245, %15, %cst_123 {dimension_numbers = #tpu.dot_dimension_numbers<[1], [0], [0], [1], [0, 0, 1, 1], [], []>} : vector<8x32xf32>, vector<32x32xf32>, vector<8x32xf32> -> vector<8x32xf32>
    %256 = vector.broadcast %47 : vector<1x32xf32> to vector<8x32xf32>
    %257 = arith.addf %255, %256 : vector<8x32xf32>
    %cst_124 = arith.constant dense<0.000000e+00> : vector<8x32xf32>
    %258 = tpu.matmul %212, %25, %cst_124 {dimension_numbers = #tpu.dot_dimension_numbers<[1], [0], [0], [1], [0, 0, 1, 1], [], []>} : vector<8x32xf32>, vector<32x32xf32>, vector<8x32xf32> -> vector<8x32xf32>
    %259 = arith.addf %248, %258 : vector<8x32xf32>
    %cst_125 = arith.constant dense<0.000000e+00> : vector<8x32xf32>
    %260 = tpu.matmul %212, %27, %cst_125 {dimension_numbers = #tpu.dot_dimension_numbers<[1], [0], [0], [1], [0, 0, 1, 1], [], []>} : vector<8x32xf32>, vector<32x32xf32>, vector<8x32xf32> -> vector<8x32xf32>
    %261 = arith.addf %251, %260 : vector<8x32xf32>
    %cst_126 = arith.constant dense<0.000000e+00> : vector<8x32xf32>
    %262 = tpu.matmul %212, %29, %cst_126 {dimension_numbers = #tpu.dot_dimension_numbers<[1], [0], [0], [1], [0, 0, 1, 1], [], []>} : vector<8x32xf32>, vector<32x32xf32>, vector<8x32xf32> -> vector<8x32xf32>
    %263 = arith.addf %254, %262 : vector<8x32xf32>
    %cst_127 = arith.constant dense<0.000000e+00> : vector<8x32xf32>
    %264 = tpu.matmul %212, %31, %cst_127 {dimension_numbers = #tpu.dot_dimension_numbers<[1], [0], [0], [1], [0, 0, 1, 1], [], []>} : vector<8x32xf32>, vector<32x32xf32>, vector<8x32xf32> -> vector<8x32xf32>
    %265 = arith.addf %257, %264 : vector<8x32xf32>
    %266 = arith.negf %259 : vector<8x32xf32>
    %267 = math.exp %266 : vector<8x32xf32>
    %cst_128 = arith.constant 1.000000e+00 : f32
    %268 = vector.broadcast %cst_128 : f32 to vector<8x32xf32>
    %269 = arith.addf %268, %267 : vector<8x32xf32>
    %270 = arith.divf %268, %269 : vector<8x32xf32>
    %271 = arith.negf %261 : vector<8x32xf32>
    %272 = math.exp %271 : vector<8x32xf32>
    %cst_129 = arith.constant 1.000000e+00 : f32
    %273 = vector.broadcast %cst_129 : f32 to vector<8x32xf32>
    %274 = arith.addf %273, %272 : vector<8x32xf32>
    %275 = arith.divf %273, %274 : vector<8x32xf32>
    %276 = math.tanh %263 : vector<8x32xf32>
    %277 = arith.negf %265 : vector<8x32xf32>
    %278 = math.exp %277 : vector<8x32xf32>
    %cst_130 = arith.constant 1.000000e+00 : f32
    %279 = vector.broadcast %cst_130 : f32 to vector<8x32xf32>
    %280 = arith.addf %279, %278 : vector<8x32xf32>
    %281 = arith.divf %279, %280 : vector<8x32xf32>
    %282 = arith.mulf %275, %210 : vector<8x32xf32>
    %283 = arith.mulf %270, %276 : vector<8x32xf32>
    %284 = arith.addf %282, %283 : vector<8x32xf32>
    %285 = math.tanh %284 : vector<8x32xf32>
    %286 = arith.mulf %281, %285 : vector<8x32xf32>
    %287 = vector.extract_strided_slice %51 {offsets = [24, 0], sizes = [8, 32], strides = [1, 1]} : vector<64x32xf32> to vector<8x32xf32>
    %288 = vector.extract_strided_slice %54 {offsets = [24, 0], sizes = [8, 32], strides = [1, 1]} : vector<64x32xf32> to vector<8x32xf32>
    %289 = vector.extract_strided_slice %57 {offsets = [24, 0], sizes = [8, 32], strides = [1, 1]} : vector<64x32xf32> to vector<8x32xf32>
    %290 = vector.extract_strided_slice %60 {offsets = [24, 0], sizes = [8, 32], strides = [1, 1]} : vector<64x32xf32> to vector<8x32xf32>
    %cst_131 = arith.constant dense<0.000000e+00> : vector<8x32xf32>
    %291 = tpu.matmul %245, %17, %cst_131 {dimension_numbers = #tpu.dot_dimension_numbers<[1], [0], [0], [1], [0, 0, 1, 1], [], []>} : vector<8x32xf32>, vector<32x32xf32>, vector<8x32xf32> -> vector<8x32xf32>
    %292 = arith.addf %287, %291 : vector<8x32xf32>
    %cst_132 = arith.constant dense<0.000000e+00> : vector<8x32xf32>
    %293 = tpu.matmul %245, %19, %cst_132 {dimension_numbers = #tpu.dot_dimension_numbers<[1], [0], [0], [1], [0, 0, 1, 1], [], []>} : vector<8x32xf32>, vector<32x32xf32>, vector<8x32xf32> -> vector<8x32xf32>
    %294 = arith.addf %288, %293 : vector<8x32xf32>
    %cst_133 = arith.constant dense<0.000000e+00> : vector<8x32xf32>
    %295 = tpu.matmul %245, %21, %cst_133 {dimension_numbers = #tpu.dot_dimension_numbers<[1], [0], [0], [1], [0, 0, 1, 1], [], []>} : vector<8x32xf32>, vector<32x32xf32>, vector<8x32xf32> -> vector<8x32xf32>
    %296 = arith.addf %289, %295 : vector<8x32xf32>
    %cst_134 = arith.constant dense<0.000000e+00> : vector<8x32xf32>
    %297 = tpu.matmul %245, %23, %cst_134 {dimension_numbers = #tpu.dot_dimension_numbers<[1], [0], [0], [1], [0, 0, 1, 1], [], []>} : vector<8x32xf32>, vector<32x32xf32>, vector<8x32xf32> -> vector<8x32xf32>
    %298 = arith.addf %290, %297 : vector<8x32xf32>
    %299 = arith.negf %292 : vector<8x32xf32>
    %300 = math.exp %299 : vector<8x32xf32>
    %cst_135 = arith.constant 1.000000e+00 : f32
    %301 = vector.broadcast %cst_135 : f32 to vector<8x32xf32>
    %302 = arith.addf %301, %300 : vector<8x32xf32>
    %303 = arith.divf %301, %302 : vector<8x32xf32>
    %304 = arith.negf %294 : vector<8x32xf32>
    %305 = math.exp %304 : vector<8x32xf32>
    %cst_136 = arith.constant 1.000000e+00 : f32
    %306 = vector.broadcast %cst_136 : f32 to vector<8x32xf32>
    %307 = arith.addf %306, %305 : vector<8x32xf32>
    %308 = arith.divf %306, %307 : vector<8x32xf32>
    %309 = math.tanh %296 : vector<8x32xf32>
    %310 = arith.negf %298 : vector<8x32xf32>
    %311 = math.exp %310 : vector<8x32xf32>
    %cst_137 = arith.constant 1.000000e+00 : f32
    %312 = vector.broadcast %cst_137 : f32 to vector<8x32xf32>
    %313 = arith.addf %312, %311 : vector<8x32xf32>
    %314 = arith.divf %312, %313 : vector<8x32xf32>
    %315 = arith.mulf %308, %243 : vector<8x32xf32>
    %316 = arith.mulf %303, %309 : vector<8x32xf32>
    %317 = arith.addf %315, %316 : vector<8x32xf32>
    %318 = math.tanh %317 : vector<8x32xf32>
    %319 = arith.mulf %314, %318 : vector<8x32xf32>
    %cst_138 = arith.constant dense<0.000000e+00> : vector<8x32xf32>
    %320 = tpu.matmul %319, %9, %cst_138 {dimension_numbers = #tpu.dot_dimension_numbers<[1], [0], [0], [1], [0, 0, 1, 1], [], []>} : vector<8x32xf32>, vector<32x32xf32>, vector<8x32xf32> -> vector<8x32xf32>
    %321 = vector.broadcast %41 : vector<1x32xf32> to vector<8x32xf32>
    %322 = arith.addf %320, %321 : vector<8x32xf32>
    %cst_139 = arith.constant dense<0.000000e+00> : vector<8x32xf32>
    %323 = tpu.matmul %319, %11, %cst_139 {dimension_numbers = #tpu.dot_dimension_numbers<[1], [0], [0], [1], [0, 0, 1, 1], [], []>} : vector<8x32xf32>, vector<32x32xf32>, vector<8x32xf32> -> vector<8x32xf32>
    %324 = vector.broadcast %43 : vector<1x32xf32> to vector<8x32xf32>
    %325 = arith.addf %323, %324 : vector<8x32xf32>
    %cst_140 = arith.constant dense<0.000000e+00> : vector<8x32xf32>
    %326 = tpu.matmul %319, %13, %cst_140 {dimension_numbers = #tpu.dot_dimension_numbers<[1], [0], [0], [1], [0, 0, 1, 1], [], []>} : vector<8x32xf32>, vector<32x32xf32>, vector<8x32xf32> -> vector<8x32xf32>
    %327 = vector.broadcast %45 : vector<1x32xf32> to vector<8x32xf32>
    %328 = arith.addf %326, %327 : vector<8x32xf32>
    %cst_141 = arith.constant dense<0.000000e+00> : vector<8x32xf32>
    %329 = tpu.matmul %319, %15, %cst_141 {dimension_numbers = #tpu.dot_dimension_numbers<[1], [0], [0], [1], [0, 0, 1, 1], [], []>} : vector<8x32xf32>, vector<32x32xf32>, vector<8x32xf32> -> vector<8x32xf32>
    %330 = vector.broadcast %47 : vector<1x32xf32> to vector<8x32xf32>
    %331 = arith.addf %329, %330 : vector<8x32xf32>
    %cst_142 = arith.constant dense<0.000000e+00> : vector<8x32xf32>
    %332 = tpu.matmul %286, %25, %cst_142 {dimension_numbers = #tpu.dot_dimension_numbers<[1], [0], [0], [1], [0, 0, 1, 1], [], []>} : vector<8x32xf32>, vector<32x32xf32>, vector<8x32xf32> -> vector<8x32xf32>
    %333 = arith.addf %322, %332 : vector<8x32xf32>
    %cst_143 = arith.constant dense<0.000000e+00> : vector<8x32xf32>
    %334 = tpu.matmul %286, %27, %cst_143 {dimension_numbers = #tpu.dot_dimension_numbers<[1], [0], [0], [1], [0, 0, 1, 1], [], []>} : vector<8x32xf32>, vector<32x32xf32>, vector<8x32xf32> -> vector<8x32xf32>
    %335 = arith.addf %325, %334 : vector<8x32xf32>
    %cst_144 = arith.constant dense<0.000000e+00> : vector<8x32xf32>
    %336 = tpu.matmul %286, %29, %cst_144 {dimension_numbers = #tpu.dot_dimension_numbers<[1], [0], [0], [1], [0, 0, 1, 1], [], []>} : vector<8x32xf32>, vector<32x32xf32>, vector<8x32xf32> -> vector<8x32xf32>
    %337 = arith.addf %328, %336 : vector<8x32xf32>
    %cst_145 = arith.constant dense<0.000000e+00> : vector<8x32xf32>
    %338 = tpu.matmul %286, %31, %cst_145 {dimension_numbers = #tpu.dot_dimension_numbers<[1], [0], [0], [1], [0, 0, 1, 1], [], []>} : vector<8x32xf32>, vector<32x32xf32>, vector<8x32xf32> -> vector<8x32xf32>
    %339 = arith.addf %331, %338 : vector<8x32xf32>
    %340 = arith.negf %333 : vector<8x32xf32>
    %341 = math.exp %340 : vector<8x32xf32>
    %cst_146 = arith.constant 1.000000e+00 : f32
    %342 = vector.broadcast %cst_146 : f32 to vector<8x32xf32>
    %343 = arith.addf %342, %341 : vector<8x32xf32>
    %344 = arith.divf %342, %343 : vector<8x32xf32>
    %345 = arith.negf %335 : vector<8x32xf32>
    %346 = math.exp %345 : vector<8x32xf32>
    %cst_147 = arith.constant 1.000000e+00 : f32
    %347 = vector.broadcast %cst_147 : f32 to vector<8x32xf32>
    %348 = arith.addf %347, %346 : vector<8x32xf32>
    %349 = arith.divf %347, %348 : vector<8x32xf32>
    %350 = math.tanh %337 : vector<8x32xf32>
    %351 = arith.negf %339 : vector<8x32xf32>
    %352 = math.exp %351 : vector<8x32xf32>
    %cst_148 = arith.constant 1.000000e+00 : f32
    %353 = vector.broadcast %cst_148 : f32 to vector<8x32xf32>
    %354 = arith.addf %353, %352 : vector<8x32xf32>
    %355 = arith.divf %353, %354 : vector<8x32xf32>
    %356 = arith.mulf %349, %284 : vector<8x32xf32>
    %357 = arith.mulf %344, %350 : vector<8x32xf32>
    %358 = arith.addf %356, %357 : vector<8x32xf32>
    %359 = math.tanh %358 : vector<8x32xf32>
    %360 = arith.mulf %355, %359 : vector<8x32xf32>
    %361 = vector.extract_strided_slice %51 {offsets = [32, 0], sizes = [8, 32], strides = [1, 1]} : vector<64x32xf32> to vector<8x32xf32>
    %362 = vector.extract_strided_slice %54 {offsets = [32, 0], sizes = [8, 32], strides = [1, 1]} : vector<64x32xf32> to vector<8x32xf32>
    %363 = vector.extract_strided_slice %57 {offsets = [32, 0], sizes = [8, 32], strides = [1, 1]} : vector<64x32xf32> to vector<8x32xf32>
    %364 = vector.extract_strided_slice %60 {offsets = [32, 0], sizes = [8, 32], strides = [1, 1]} : vector<64x32xf32> to vector<8x32xf32>
    %cst_149 = arith.constant dense<0.000000e+00> : vector<8x32xf32>
    %365 = tpu.matmul %319, %17, %cst_149 {dimension_numbers = #tpu.dot_dimension_numbers<[1], [0], [0], [1], [0, 0, 1, 1], [], []>} : vector<8x32xf32>, vector<32x32xf32>, vector<8x32xf32> -> vector<8x32xf32>
    %366 = arith.addf %361, %365 : vector<8x32xf32>
    %cst_150 = arith.constant dense<0.000000e+00> : vector<8x32xf32>
    %367 = tpu.matmul %319, %19, %cst_150 {dimension_numbers = #tpu.dot_dimension_numbers<[1], [0], [0], [1], [0, 0, 1, 1], [], []>} : vector<8x32xf32>, vector<32x32xf32>, vector<8x32xf32> -> vector<8x32xf32>
    %368 = arith.addf %362, %367 : vector<8x32xf32>
    %cst_151 = arith.constant dense<0.000000e+00> : vector<8x32xf32>
    %369 = tpu.matmul %319, %21, %cst_151 {dimension_numbers = #tpu.dot_dimension_numbers<[1], [0], [0], [1], [0, 0, 1, 1], [], []>} : vector<8x32xf32>, vector<32x32xf32>, vector<8x32xf32> -> vector<8x32xf32>
    %370 = arith.addf %363, %369 : vector<8x32xf32>
    %cst_152 = arith.constant dense<0.000000e+00> : vector<8x32xf32>
    %371 = tpu.matmul %319, %23, %cst_152 {dimension_numbers = #tpu.dot_dimension_numbers<[1], [0], [0], [1], [0, 0, 1, 1], [], []>} : vector<8x32xf32>, vector<32x32xf32>, vector<8x32xf32> -> vector<8x32xf32>
    %372 = arith.addf %364, %371 : vector<8x32xf32>
    %373 = arith.negf %366 : vector<8x32xf32>
    %374 = math.exp %373 : vector<8x32xf32>
    %cst_153 = arith.constant 1.000000e+00 : f32
    %375 = vector.broadcast %cst_153 : f32 to vector<8x32xf32>
    %376 = arith.addf %375, %374 : vector<8x32xf32>
    %377 = arith.divf %375, %376 : vector<8x32xf32>
    %378 = arith.negf %368 : vector<8x32xf32>
    %379 = math.exp %378 : vector<8x32xf32>
    %cst_154 = arith.constant 1.000000e+00 : f32
    %380 = vector.broadcast %cst_154 : f32 to vector<8x32xf32>
    %381 = arith.addf %380, %379 : vector<8x32xf32>
    %382 = arith.divf %380, %381 : vector<8x32xf32>
    %383 = math.tanh %370 : vector<8x32xf32>
    %384 = arith.negf %372 : vector<8x32xf32>
    %385 = math.exp %384 : vector<8x32xf32>
    %cst_155 = arith.constant 1.000000e+00 : f32
    %386 = vector.broadcast %cst_155 : f32 to vector<8x32xf32>
    %387 = arith.addf %386, %385 : vector<8x32xf32>
    %388 = arith.divf %386, %387 : vector<8x32xf32>
    %389 = arith.mulf %382, %317 : vector<8x32xf32>
    %390 = arith.mulf %377, %383 : vector<8x32xf32>
    %391 = arith.addf %389, %390 : vector<8x32xf32>
    %392 = math.tanh %391 : vector<8x32xf32>
    %393 = arith.mulf %388, %392 : vector<8x32xf32>
    %cst_156 = arith.constant dense<0.000000e+00> : vector<8x32xf32>
    %394 = tpu.matmul %393, %9, %cst_156 {dimension_numbers = #tpu.dot_dimension_numbers<[1], [0], [0], [1], [0, 0, 1, 1], [], []>} : vector<8x32xf32>, vector<32x32xf32>, vector<8x32xf32> -> vector<8x32xf32>
    %395 = vector.broadcast %41 : vector<1x32xf32> to vector<8x32xf32>
    %396 = arith.addf %394, %395 : vector<8x32xf32>
    %cst_157 = arith.constant dense<0.000000e+00> : vector<8x32xf32>
    %397 = tpu.matmul %393, %11, %cst_157 {dimension_numbers = #tpu.dot_dimension_numbers<[1], [0], [0], [1], [0, 0, 1, 1], [], []>} : vector<8x32xf32>, vector<32x32xf32>, vector<8x32xf32> -> vector<8x32xf32>
    %398 = vector.broadcast %43 : vector<1x32xf32> to vector<8x32xf32>
    %399 = arith.addf %397, %398 : vector<8x32xf32>
    %cst_158 = arith.constant dense<0.000000e+00> : vector<8x32xf32>
    %400 = tpu.matmul %393, %13, %cst_158 {dimension_numbers = #tpu.dot_dimension_numbers<[1], [0], [0], [1], [0, 0, 1, 1], [], []>} : vector<8x32xf32>, vector<32x32xf32>, vector<8x32xf32> -> vector<8x32xf32>
    %401 = vector.broadcast %45 : vector<1x32xf32> to vector<8x32xf32>
    %402 = arith.addf %400, %401 : vector<8x32xf32>
    %cst_159 = arith.constant dense<0.000000e+00> : vector<8x32xf32>
    %403 = tpu.matmul %393, %15, %cst_159 {dimension_numbers = #tpu.dot_dimension_numbers<[1], [0], [0], [1], [0, 0, 1, 1], [], []>} : vector<8x32xf32>, vector<32x32xf32>, vector<8x32xf32> -> vector<8x32xf32>
    %404 = vector.broadcast %47 : vector<1x32xf32> to vector<8x32xf32>
    %405 = arith.addf %403, %404 : vector<8x32xf32>
    %cst_160 = arith.constant dense<0.000000e+00> : vector<8x32xf32>
    %406 = tpu.matmul %360, %25, %cst_160 {dimension_numbers = #tpu.dot_dimension_numbers<[1], [0], [0], [1], [0, 0, 1, 1], [], []>} : vector<8x32xf32>, vector<32x32xf32>, vector<8x32xf32> -> vector<8x32xf32>
    %407 = arith.addf %396, %406 : vector<8x32xf32>
    %cst_161 = arith.constant dense<0.000000e+00> : vector<8x32xf32>
    %408 = tpu.matmul %360, %27, %cst_161 {dimension_numbers = #tpu.dot_dimension_numbers<[1], [0], [0], [1], [0, 0, 1, 1], [], []>} : vector<8x32xf32>, vector<32x32xf32>, vector<8x32xf32> -> vector<8x32xf32>
    %409 = arith.addf %399, %408 : vector<8x32xf32>
    %cst_162 = arith.constant dense<0.000000e+00> : vector<8x32xf32>
    %410 = tpu.matmul %360, %29, %cst_162 {dimension_numbers = #tpu.dot_dimension_numbers<[1], [0], [0], [1], [0, 0, 1, 1], [], []>} : vector<8x32xf32>, vector<32x32xf32>, vector<8x32xf32> -> vector<8x32xf32>
    %411 = arith.addf %402, %410 : vector<8x32xf32>
    %cst_163 = arith.constant dense<0.000000e+00> : vector<8x32xf32>
    %412 = tpu.matmul %360, %31, %cst_163 {dimension_numbers = #tpu.dot_dimension_numbers<[1], [0], [0], [1], [0, 0, 1, 1], [], []>} : vector<8x32xf32>, vector<32x32xf32>, vector<8x32xf32> -> vector<8x32xf32>
    %413 = arith.addf %405, %412 : vector<8x32xf32>
    %414 = arith.negf %407 : vector<8x32xf32>
    %415 = math.exp %414 : vector<8x32xf32>
    %cst_164 = arith.constant 1.000000e+00 : f32
    %416 = vector.broadcast %cst_164 : f32 to vector<8x32xf32>
    %417 = arith.addf %416, %415 : vector<8x32xf32>
    %418 = arith.divf %416, %417 : vector<8x32xf32>
    %419 = arith.negf %409 : vector<8x32xf32>
    %420 = math.exp %419 : vector<8x32xf32>
    %cst_165 = arith.constant 1.000000e+00 : f32
    %421 = vector.broadcast %cst_165 : f32 to vector<8x32xf32>
    %422 = arith.addf %421, %420 : vector<8x32xf32>
    %423 = arith.divf %421, %422 : vector<8x32xf32>
    %424 = math.tanh %411 : vector<8x32xf32>
    %425 = arith.negf %413 : vector<8x32xf32>
    %426 = math.exp %425 : vector<8x32xf32>
    %cst_166 = arith.constant 1.000000e+00 : f32
    %427 = vector.broadcast %cst_166 : f32 to vector<8x32xf32>
    %428 = arith.addf %427, %426 : vector<8x32xf32>
    %429 = arith.divf %427, %428 : vector<8x32xf32>
    %430 = arith.mulf %423, %358 : vector<8x32xf32>
    %431 = arith.mulf %418, %424 : vector<8x32xf32>
    %432 = arith.addf %430, %431 : vector<8x32xf32>
    %433 = math.tanh %432 : vector<8x32xf32>
    %434 = arith.mulf %429, %433 : vector<8x32xf32>
    %435 = vector.extract_strided_slice %51 {offsets = [40, 0], sizes = [8, 32], strides = [1, 1]} : vector<64x32xf32> to vector<8x32xf32>
    %436 = vector.extract_strided_slice %54 {offsets = [40, 0], sizes = [8, 32], strides = [1, 1]} : vector<64x32xf32> to vector<8x32xf32>
    %437 = vector.extract_strided_slice %57 {offsets = [40, 0], sizes = [8, 32], strides = [1, 1]} : vector<64x32xf32> to vector<8x32xf32>
    %438 = vector.extract_strided_slice %60 {offsets = [40, 0], sizes = [8, 32], strides = [1, 1]} : vector<64x32xf32> to vector<8x32xf32>
    %cst_167 = arith.constant dense<0.000000e+00> : vector<8x32xf32>
    %439 = tpu.matmul %393, %17, %cst_167 {dimension_numbers = #tpu.dot_dimension_numbers<[1], [0], [0], [1], [0, 0, 1, 1], [], []>} : vector<8x32xf32>, vector<32x32xf32>, vector<8x32xf32> -> vector<8x32xf32>
    %440 = arith.addf %435, %439 : vector<8x32xf32>
    %cst_168 = arith.constant dense<0.000000e+00> : vector<8x32xf32>
    %441 = tpu.matmul %393, %19, %cst_168 {dimension_numbers = #tpu.dot_dimension_numbers<[1], [0], [0], [1], [0, 0, 1, 1], [], []>} : vector<8x32xf32>, vector<32x32xf32>, vector<8x32xf32> -> vector<8x32xf32>
    %442 = arith.addf %436, %441 : vector<8x32xf32>
    %cst_169 = arith.constant dense<0.000000e+00> : vector<8x32xf32>
    %443 = tpu.matmul %393, %21, %cst_169 {dimension_numbers = #tpu.dot_dimension_numbers<[1], [0], [0], [1], [0, 0, 1, 1], [], []>} : vector<8x32xf32>, vector<32x32xf32>, vector<8x32xf32> -> vector<8x32xf32>
    %444 = arith.addf %437, %443 : vector<8x32xf32>
    %cst_170 = arith.constant dense<0.000000e+00> : vector<8x32xf32>
    %445 = tpu.matmul %393, %23, %cst_170 {dimension_numbers = #tpu.dot_dimension_numbers<[1], [0], [0], [1], [0, 0, 1, 1], [], []>} : vector<8x32xf32>, vector<32x32xf32>, vector<8x32xf32> -> vector<8x32xf32>
    %446 = arith.addf %438, %445 : vector<8x32xf32>
    %447 = arith.negf %440 : vector<8x32xf32>
    %448 = math.exp %447 : vector<8x32xf32>
    %cst_171 = arith.constant 1.000000e+00 : f32
    %449 = vector.broadcast %cst_171 : f32 to vector<8x32xf32>
    %450 = arith.addf %449, %448 : vector<8x32xf32>
    %451 = arith.divf %449, %450 : vector<8x32xf32>
    %452 = arith.negf %442 : vector<8x32xf32>
    %453 = math.exp %452 : vector<8x32xf32>
    %cst_172 = arith.constant 1.000000e+00 : f32
    %454 = vector.broadcast %cst_172 : f32 to vector<8x32xf32>
    %455 = arith.addf %454, %453 : vector<8x32xf32>
    %456 = arith.divf %454, %455 : vector<8x32xf32>
    %457 = math.tanh %444 : vector<8x32xf32>
    %458 = arith.negf %446 : vector<8x32xf32>
    %459 = math.exp %458 : vector<8x32xf32>
    %cst_173 = arith.constant 1.000000e+00 : f32
    %460 = vector.broadcast %cst_173 : f32 to vector<8x32xf32>
    %461 = arith.addf %460, %459 : vector<8x32xf32>
    %462 = arith.divf %460, %461 : vector<8x32xf32>
    %463 = arith.mulf %456, %391 : vector<8x32xf32>
    %464 = arith.mulf %451, %457 : vector<8x32xf32>
    %465 = arith.addf %463, %464 : vector<8x32xf32>
    %466 = math.tanh %465 : vector<8x32xf32>
    %467 = arith.mulf %462, %466 : vector<8x32xf32>
    %cst_174 = arith.constant dense<0.000000e+00> : vector<8x32xf32>
    %468 = tpu.matmul %467, %9, %cst_174 {dimension_numbers = #tpu.dot_dimension_numbers<[1], [0], [0], [1], [0, 0, 1, 1], [], []>} : vector<8x32xf32>, vector<32x32xf32>, vector<8x32xf32> -> vector<8x32xf32>
    %469 = vector.broadcast %41 : vector<1x32xf32> to vector<8x32xf32>
    %470 = arith.addf %468, %469 : vector<8x32xf32>
    %cst_175 = arith.constant dense<0.000000e+00> : vector<8x32xf32>
    %471 = tpu.matmul %467, %11, %cst_175 {dimension_numbers = #tpu.dot_dimension_numbers<[1], [0], [0], [1], [0, 0, 1, 1], [], []>} : vector<8x32xf32>, vector<32x32xf32>, vector<8x32xf32> -> vector<8x32xf32>
    %472 = vector.broadcast %43 : vector<1x32xf32> to vector<8x32xf32>
    %473 = arith.addf %471, %472 : vector<8x32xf32>
    %cst_176 = arith.constant dense<0.000000e+00> : vector<8x32xf32>
    %474 = tpu.matmul %467, %13, %cst_176 {dimension_numbers = #tpu.dot_dimension_numbers<[1], [0], [0], [1], [0, 0, 1, 1], [], []>} : vector<8x32xf32>, vector<32x32xf32>, vector<8x32xf32> -> vector<8x32xf32>
    %475 = vector.broadcast %45 : vector<1x32xf32> to vector<8x32xf32>
    %476 = arith.addf %474, %475 : vector<8x32xf32>
    %cst_177 = arith.constant dense<0.000000e+00> : vector<8x32xf32>
    %477 = tpu.matmul %467, %15, %cst_177 {dimension_numbers = #tpu.dot_dimension_numbers<[1], [0], [0], [1], [0, 0, 1, 1], [], []>} : vector<8x32xf32>, vector<32x32xf32>, vector<8x32xf32> -> vector<8x32xf32>
    %478 = vector.broadcast %47 : vector<1x32xf32> to vector<8x32xf32>
    %479 = arith.addf %477, %478 : vector<8x32xf32>
    %cst_178 = arith.constant dense<0.000000e+00> : vector<8x32xf32>
    %480 = tpu.matmul %434, %25, %cst_178 {dimension_numbers = #tpu.dot_dimension_numbers<[1], [0], [0], [1], [0, 0, 1, 1], [], []>} : vector<8x32xf32>, vector<32x32xf32>, vector<8x32xf32> -> vector<8x32xf32>
    %481 = arith.addf %470, %480 : vector<8x32xf32>
    %cst_179 = arith.constant dense<0.000000e+00> : vector<8x32xf32>
    %482 = tpu.matmul %434, %27, %cst_179 {dimension_numbers = #tpu.dot_dimension_numbers<[1], [0], [0], [1], [0, 0, 1, 1], [], []>} : vector<8x32xf32>, vector<32x32xf32>, vector<8x32xf32> -> vector<8x32xf32>
    %483 = arith.addf %473, %482 : vector<8x32xf32>
    %cst_180 = arith.constant dense<0.000000e+00> : vector<8x32xf32>
    %484 = tpu.matmul %434, %29, %cst_180 {dimension_numbers = #tpu.dot_dimension_numbers<[1], [0], [0], [1], [0, 0, 1, 1], [], []>} : vector<8x32xf32>, vector<32x32xf32>, vector<8x32xf32> -> vector<8x32xf32>
    %485 = arith.addf %476, %484 : vector<8x32xf32>
    %cst_181 = arith.constant dense<0.000000e+00> : vector<8x32xf32>
    %486 = tpu.matmul %434, %31, %cst_181 {dimension_numbers = #tpu.dot_dimension_numbers<[1], [0], [0], [1], [0, 0, 1, 1], [], []>} : vector<8x32xf32>, vector<32x32xf32>, vector<8x32xf32> -> vector<8x32xf32>
    %487 = arith.addf %479, %486 : vector<8x32xf32>
    %488 = arith.negf %481 : vector<8x32xf32>
    %489 = math.exp %488 : vector<8x32xf32>
    %cst_182 = arith.constant 1.000000e+00 : f32
    %490 = vector.broadcast %cst_182 : f32 to vector<8x32xf32>
    %491 = arith.addf %490, %489 : vector<8x32xf32>
    %492 = arith.divf %490, %491 : vector<8x32xf32>
    %493 = arith.negf %483 : vector<8x32xf32>
    %494 = math.exp %493 : vector<8x32xf32>
    %cst_183 = arith.constant 1.000000e+00 : f32
    %495 = vector.broadcast %cst_183 : f32 to vector<8x32xf32>
    %496 = arith.addf %495, %494 : vector<8x32xf32>
    %497 = arith.divf %495, %496 : vector<8x32xf32>
    %498 = math.tanh %485 : vector<8x32xf32>
    %499 = arith.negf %487 : vector<8x32xf32>
    %500 = math.exp %499 : vector<8x32xf32>
    %cst_184 = arith.constant 1.000000e+00 : f32
    %501 = vector.broadcast %cst_184 : f32 to vector<8x32xf32>
    %502 = arith.addf %501, %500 : vector<8x32xf32>
    %503 = arith.divf %501, %502 : vector<8x32xf32>
    %504 = arith.mulf %497, %432 : vector<8x32xf32>
    %505 = arith.mulf %492, %498 : vector<8x32xf32>
    %506 = arith.addf %504, %505 : vector<8x32xf32>
    %507 = math.tanh %506 : vector<8x32xf32>
    %508 = arith.mulf %503, %507 : vector<8x32xf32>
    %509 = vector.extract_strided_slice %51 {offsets = [48, 0], sizes = [8, 32], strides = [1, 1]} : vector<64x32xf32> to vector<8x32xf32>
    %510 = vector.extract_strided_slice %54 {offsets = [48, 0], sizes = [8, 32], strides = [1, 1]} : vector<64x32xf32> to vector<8x32xf32>
    %511 = vector.extract_strided_slice %57 {offsets = [48, 0], sizes = [8, 32], strides = [1, 1]} : vector<64x32xf32> to vector<8x32xf32>
    %512 = vector.extract_strided_slice %60 {offsets = [48, 0], sizes = [8, 32], strides = [1, 1]} : vector<64x32xf32> to vector<8x32xf32>
    %cst_185 = arith.constant dense<0.000000e+00> : vector<8x32xf32>
    %513 = tpu.matmul %467, %17, %cst_185 {dimension_numbers = #tpu.dot_dimension_numbers<[1], [0], [0], [1], [0, 0, 1, 1], [], []>} : vector<8x32xf32>, vector<32x32xf32>, vector<8x32xf32> -> vector<8x32xf32>
    %514 = arith.addf %509, %513 : vector<8x32xf32>
    %cst_186 = arith.constant dense<0.000000e+00> : vector<8x32xf32>
    %515 = tpu.matmul %467, %19, %cst_186 {dimension_numbers = #tpu.dot_dimension_numbers<[1], [0], [0], [1], [0, 0, 1, 1], [], []>} : vector<8x32xf32>, vector<32x32xf32>, vector<8x32xf32> -> vector<8x32xf32>
    %516 = arith.addf %510, %515 : vector<8x32xf32>
    %cst_187 = arith.constant dense<0.000000e+00> : vector<8x32xf32>
    %517 = tpu.matmul %467, %21, %cst_187 {dimension_numbers = #tpu.dot_dimension_numbers<[1], [0], [0], [1], [0, 0, 1, 1], [], []>} : vector<8x32xf32>, vector<32x32xf32>, vector<8x32xf32> -> vector<8x32xf32>
    %518 = arith.addf %511, %517 : vector<8x32xf32>
    %cst_188 = arith.constant dense<0.000000e+00> : vector<8x32xf32>
    %519 = tpu.matmul %467, %23, %cst_188 {dimension_numbers = #tpu.dot_dimension_numbers<[1], [0], [0], [1], [0, 0, 1, 1], [], []>} : vector<8x32xf32>, vector<32x32xf32>, vector<8x32xf32> -> vector<8x32xf32>
    %520 = arith.addf %512, %519 : vector<8x32xf32>
    %521 = arith.negf %514 : vector<8x32xf32>
    %522 = math.exp %521 : vector<8x32xf32>
    %cst_189 = arith.constant 1.000000e+00 : f32
    %523 = vector.broadcast %cst_189 : f32 to vector<8x32xf32>
    %524 = arith.addf %523, %522 : vector<8x32xf32>
    %525 = arith.divf %523, %524 : vector<8x32xf32>
    %526 = arith.negf %516 : vector<8x32xf32>
    %527 = math.exp %526 : vector<8x32xf32>
    %cst_190 = arith.constant 1.000000e+00 : f32
    %528 = vector.broadcast %cst_190 : f32 to vector<8x32xf32>
    %529 = arith.addf %528, %527 : vector<8x32xf32>
    %530 = arith.divf %528, %529 : vector<8x32xf32>
    %531 = math.tanh %518 : vector<8x32xf32>
    %532 = arith.negf %520 : vector<8x32xf32>
    %533 = math.exp %532 : vector<8x32xf32>
    %cst_191 = arith.constant 1.000000e+00 : f32
    %534 = vector.broadcast %cst_191 : f32 to vector<8x32xf32>
    %535 = arith.addf %534, %533 : vector<8x32xf32>
    %536 = arith.divf %534, %535 : vector<8x32xf32>
    %537 = arith.mulf %530, %465 : vector<8x32xf32>
    %538 = arith.mulf %525, %531 : vector<8x32xf32>
    %539 = arith.addf %537, %538 : vector<8x32xf32>
    %540 = math.tanh %539 : vector<8x32xf32>
    %541 = arith.mulf %536, %540 : vector<8x32xf32>
    %cst_192 = arith.constant dense<0.000000e+00> : vector<8x32xf32>
    %542 = tpu.matmul %541, %9, %cst_192 {dimension_numbers = #tpu.dot_dimension_numbers<[1], [0], [0], [1], [0, 0, 1, 1], [], []>} : vector<8x32xf32>, vector<32x32xf32>, vector<8x32xf32> -> vector<8x32xf32>
    %543 = vector.broadcast %41 : vector<1x32xf32> to vector<8x32xf32>
    %544 = arith.addf %542, %543 : vector<8x32xf32>
    %cst_193 = arith.constant dense<0.000000e+00> : vector<8x32xf32>
    %545 = tpu.matmul %541, %11, %cst_193 {dimension_numbers = #tpu.dot_dimension_numbers<[1], [0], [0], [1], [0, 0, 1, 1], [], []>} : vector<8x32xf32>, vector<32x32xf32>, vector<8x32xf32> -> vector<8x32xf32>
    %546 = vector.broadcast %43 : vector<1x32xf32> to vector<8x32xf32>
    %547 = arith.addf %545, %546 : vector<8x32xf32>
    %cst_194 = arith.constant dense<0.000000e+00> : vector<8x32xf32>
    %548 = tpu.matmul %541, %13, %cst_194 {dimension_numbers = #tpu.dot_dimension_numbers<[1], [0], [0], [1], [0, 0, 1, 1], [], []>} : vector<8x32xf32>, vector<32x32xf32>, vector<8x32xf32> -> vector<8x32xf32>
    %549 = vector.broadcast %45 : vector<1x32xf32> to vector<8x32xf32>
    %550 = arith.addf %548, %549 : vector<8x32xf32>
    %cst_195 = arith.constant dense<0.000000e+00> : vector<8x32xf32>
    %551 = tpu.matmul %541, %15, %cst_195 {dimension_numbers = #tpu.dot_dimension_numbers<[1], [0], [0], [1], [0, 0, 1, 1], [], []>} : vector<8x32xf32>, vector<32x32xf32>, vector<8x32xf32> -> vector<8x32xf32>
    %552 = vector.broadcast %47 : vector<1x32xf32> to vector<8x32xf32>
    %553 = arith.addf %551, %552 : vector<8x32xf32>
    %cst_196 = arith.constant dense<0.000000e+00> : vector<8x32xf32>
    %554 = tpu.matmul %508, %25, %cst_196 {dimension_numbers = #tpu.dot_dimension_numbers<[1], [0], [0], [1], [0, 0, 1, 1], [], []>} : vector<8x32xf32>, vector<32x32xf32>, vector<8x32xf32> -> vector<8x32xf32>
    %555 = arith.addf %544, %554 : vector<8x32xf32>
    %cst_197 = arith.constant dense<0.000000e+00> : vector<8x32xf32>
    %556 = tpu.matmul %508, %27, %cst_197 {dimension_numbers = #tpu.dot_dimension_numbers<[1], [0], [0], [1], [0, 0, 1, 1], [], []>} : vector<8x32xf32>, vector<32x32xf32>, vector<8x32xf32> -> vector<8x32xf32>
    %557 = arith.addf %547, %556 : vector<8x32xf32>
    %cst_198 = arith.constant dense<0.000000e+00> : vector<8x32xf32>
    %558 = tpu.matmul %508, %29, %cst_198 {dimension_numbers = #tpu.dot_dimension_numbers<[1], [0], [0], [1], [0, 0, 1, 1], [], []>} : vector<8x32xf32>, vector<32x32xf32>, vector<8x32xf32> -> vector<8x32xf32>
    %559 = arith.addf %550, %558 : vector<8x32xf32>
    %cst_199 = arith.constant dense<0.000000e+00> : vector<8x32xf32>
    %560 = tpu.matmul %508, %31, %cst_199 {dimension_numbers = #tpu.dot_dimension_numbers<[1], [0], [0], [1], [0, 0, 1, 1], [], []>} : vector<8x32xf32>, vector<32x32xf32>, vector<8x32xf32> -> vector<8x32xf32>
    %561 = arith.addf %553, %560 : vector<8x32xf32>
    %562 = arith.negf %555 : vector<8x32xf32>
    %563 = math.exp %562 : vector<8x32xf32>
    %cst_200 = arith.constant 1.000000e+00 : f32
    %564 = vector.broadcast %cst_200 : f32 to vector<8x32xf32>
    %565 = arith.addf %564, %563 : vector<8x32xf32>
    %566 = arith.divf %564, %565 : vector<8x32xf32>
    %567 = arith.negf %557 : vector<8x32xf32>
    %568 = math.exp %567 : vector<8x32xf32>
    %cst_201 = arith.constant 1.000000e+00 : f32
    %569 = vector.broadcast %cst_201 : f32 to vector<8x32xf32>
    %570 = arith.addf %569, %568 : vector<8x32xf32>
    %571 = arith.divf %569, %570 : vector<8x32xf32>
    %572 = math.tanh %559 : vector<8x32xf32>
    %573 = arith.negf %561 : vector<8x32xf32>
    %574 = math.exp %573 : vector<8x32xf32>
    %cst_202 = arith.constant 1.000000e+00 : f32
    %575 = vector.broadcast %cst_202 : f32 to vector<8x32xf32>
    %576 = arith.addf %575, %574 : vector<8x32xf32>
    %577 = arith.divf %575, %576 : vector<8x32xf32>
    %578 = arith.mulf %571, %506 : vector<8x32xf32>
    %579 = arith.mulf %566, %572 : vector<8x32xf32>
    %580 = arith.addf %578, %579 : vector<8x32xf32>
    %581 = math.tanh %580 : vector<8x32xf32>
    %582 = arith.mulf %577, %581 : vector<8x32xf32>
    %583 = vector.extract_strided_slice %51 {offsets = [56, 0], sizes = [8, 32], strides = [1, 1]} : vector<64x32xf32> to vector<8x32xf32>
    %584 = vector.extract_strided_slice %54 {offsets = [56, 0], sizes = [8, 32], strides = [1, 1]} : vector<64x32xf32> to vector<8x32xf32>
    %585 = vector.extract_strided_slice %57 {offsets = [56, 0], sizes = [8, 32], strides = [1, 1]} : vector<64x32xf32> to vector<8x32xf32>
    %586 = vector.extract_strided_slice %60 {offsets = [56, 0], sizes = [8, 32], strides = [1, 1]} : vector<64x32xf32> to vector<8x32xf32>
    %cst_203 = arith.constant dense<0.000000e+00> : vector<8x32xf32>
    %587 = tpu.matmul %541, %17, %cst_203 {dimension_numbers = #tpu.dot_dimension_numbers<[1], [0], [0], [1], [0, 0, 1, 1], [], []>} : vector<8x32xf32>, vector<32x32xf32>, vector<8x32xf32> -> vector<8x32xf32>
    %588 = arith.addf %583, %587 : vector<8x32xf32>
    %cst_204 = arith.constant dense<0.000000e+00> : vector<8x32xf32>
    %589 = tpu.matmul %541, %19, %cst_204 {dimension_numbers = #tpu.dot_dimension_numbers<[1], [0], [0], [1], [0, 0, 1, 1], [], []>} : vector<8x32xf32>, vector<32x32xf32>, vector<8x32xf32> -> vector<8x32xf32>
    %590 = arith.addf %584, %589 : vector<8x32xf32>
    %cst_205 = arith.constant dense<0.000000e+00> : vector<8x32xf32>
    %591 = tpu.matmul %541, %21, %cst_205 {dimension_numbers = #tpu.dot_dimension_numbers<[1], [0], [0], [1], [0, 0, 1, 1], [], []>} : vector<8x32xf32>, vector<32x32xf32>, vector<8x32xf32> -> vector<8x32xf32>
    %592 = arith.addf %585, %591 : vector<8x32xf32>
    %cst_206 = arith.constant dense<0.000000e+00> : vector<8x32xf32>
    %593 = tpu.matmul %541, %23, %cst_206 {dimension_numbers = #tpu.dot_dimension_numbers<[1], [0], [0], [1], [0, 0, 1, 1], [], []>} : vector<8x32xf32>, vector<32x32xf32>, vector<8x32xf32> -> vector<8x32xf32>
    %594 = arith.addf %586, %593 : vector<8x32xf32>
    %595 = arith.negf %588 : vector<8x32xf32>
    %596 = math.exp %595 : vector<8x32xf32>
    %cst_207 = arith.constant 1.000000e+00 : f32
    %597 = vector.broadcast %cst_207 : f32 to vector<8x32xf32>
    %598 = arith.addf %597, %596 : vector<8x32xf32>
    %599 = arith.divf %597, %598 : vector<8x32xf32>
    %600 = arith.negf %590 : vector<8x32xf32>
    %601 = math.exp %600 : vector<8x32xf32>
    %cst_208 = arith.constant 1.000000e+00 : f32
    %602 = vector.broadcast %cst_208 : f32 to vector<8x32xf32>
    %603 = arith.addf %602, %601 : vector<8x32xf32>
    %604 = arith.divf %602, %603 : vector<8x32xf32>
    %605 = math.tanh %592 : vector<8x32xf32>
    %606 = arith.negf %594 : vector<8x32xf32>
    %607 = math.exp %606 : vector<8x32xf32>
    %cst_209 = arith.constant 1.000000e+00 : f32
    %608 = vector.broadcast %cst_209 : f32 to vector<8x32xf32>
    %609 = arith.addf %608, %607 : vector<8x32xf32>
    %610 = arith.divf %608, %609 : vector<8x32xf32>
    %611 = arith.mulf %604, %539 : vector<8x32xf32>
    %612 = arith.mulf %599, %605 : vector<8x32xf32>
    %613 = arith.addf %611, %612 : vector<8x32xf32>
    %614 = math.tanh %613 : vector<8x32xf32>
    %615 = arith.mulf %610, %614 : vector<8x32xf32>
    %cst_210 = arith.constant dense<0.000000e+00> : vector<8x32xf32>
    %616 = tpu.matmul %615, %9, %cst_210 {dimension_numbers = #tpu.dot_dimension_numbers<[1], [0], [0], [1], [0, 0, 1, 1], [], []>} : vector<8x32xf32>, vector<32x32xf32>, vector<8x32xf32> -> vector<8x32xf32>
    %617 = vector.broadcast %41 : vector<1x32xf32> to vector<8x32xf32>
    %618 = arith.addf %616, %617 : vector<8x32xf32>
    %cst_211 = arith.constant dense<0.000000e+00> : vector<8x32xf32>
    %619 = tpu.matmul %615, %11, %cst_211 {dimension_numbers = #tpu.dot_dimension_numbers<[1], [0], [0], [1], [0, 0, 1, 1], [], []>} : vector<8x32xf32>, vector<32x32xf32>, vector<8x32xf32> -> vector<8x32xf32>
    %620 = vector.broadcast %43 : vector<1x32xf32> to vector<8x32xf32>
    %621 = arith.addf %619, %620 : vector<8x32xf32>
    %cst_212 = arith.constant dense<0.000000e+00> : vector<8x32xf32>
    %622 = tpu.matmul %615, %13, %cst_212 {dimension_numbers = #tpu.dot_dimension_numbers<[1], [0], [0], [1], [0, 0, 1, 1], [], []>} : vector<8x32xf32>, vector<32x32xf32>, vector<8x32xf32> -> vector<8x32xf32>
    %623 = vector.broadcast %45 : vector<1x32xf32> to vector<8x32xf32>
    %624 = arith.addf %622, %623 : vector<8x32xf32>
    %cst_213 = arith.constant dense<0.000000e+00> : vector<8x32xf32>
    %625 = tpu.matmul %615, %15, %cst_213 {dimension_numbers = #tpu.dot_dimension_numbers<[1], [0], [0], [1], [0, 0, 1, 1], [], []>} : vector<8x32xf32>, vector<32x32xf32>, vector<8x32xf32> -> vector<8x32xf32>
    %626 = vector.broadcast %47 : vector<1x32xf32> to vector<8x32xf32>
    %627 = arith.addf %625, %626 : vector<8x32xf32>
    %cst_214 = arith.constant dense<0.000000e+00> : vector<8x32xf32>
    %628 = tpu.matmul %582, %25, %cst_214 {dimension_numbers = #tpu.dot_dimension_numbers<[1], [0], [0], [1], [0, 0, 1, 1], [], []>} : vector<8x32xf32>, vector<32x32xf32>, vector<8x32xf32> -> vector<8x32xf32>
    %629 = arith.addf %618, %628 : vector<8x32xf32>
    %cst_215 = arith.constant dense<0.000000e+00> : vector<8x32xf32>
    %630 = tpu.matmul %582, %27, %cst_215 {dimension_numbers = #tpu.dot_dimension_numbers<[1], [0], [0], [1], [0, 0, 1, 1], [], []>} : vector<8x32xf32>, vector<32x32xf32>, vector<8x32xf32> -> vector<8x32xf32>
    %631 = arith.addf %621, %630 : vector<8x32xf32>
    %cst_216 = arith.constant dense<0.000000e+00> : vector<8x32xf32>
    %632 = tpu.matmul %582, %29, %cst_216 {dimension_numbers = #tpu.dot_dimension_numbers<[1], [0], [0], [1], [0, 0, 1, 1], [], []>} : vector<8x32xf32>, vector<32x32xf32>, vector<8x32xf32> -> vector<8x32xf32>
    %633 = arith.addf %624, %632 : vector<8x32xf32>
    %cst_217 = arith.constant dense<0.000000e+00> : vector<8x32xf32>
    %634 = tpu.matmul %582, %31, %cst_217 {dimension_numbers = #tpu.dot_dimension_numbers<[1], [0], [0], [1], [0, 0, 1, 1], [], []>} : vector<8x32xf32>, vector<32x32xf32>, vector<8x32xf32> -> vector<8x32xf32>
    %635 = arith.addf %627, %634 : vector<8x32xf32>
    %636 = arith.negf %629 : vector<8x32xf32>
    %637 = math.exp %636 : vector<8x32xf32>
    %cst_218 = arith.constant 1.000000e+00 : f32
    %638 = vector.broadcast %cst_218 : f32 to vector<8x32xf32>
    %639 = arith.addf %638, %637 : vector<8x32xf32>
    %640 = arith.divf %638, %639 : vector<8x32xf32>
    %641 = arith.negf %631 : vector<8x32xf32>
    %642 = math.exp %641 : vector<8x32xf32>
    %cst_219 = arith.constant 1.000000e+00 : f32
    %643 = vector.broadcast %cst_219 : f32 to vector<8x32xf32>
    %644 = arith.addf %643, %642 : vector<8x32xf32>
    %645 = arith.divf %643, %644 : vector<8x32xf32>
    %646 = math.tanh %633 : vector<8x32xf32>
    %647 = arith.negf %635 : vector<8x32xf32>
    %648 = math.exp %647 : vector<8x32xf32>
    %cst_220 = arith.constant 1.000000e+00 : f32
    %649 = vector.broadcast %cst_220 : f32 to vector<8x32xf32>
    %650 = arith.addf %649, %648 : vector<8x32xf32>
    %651 = arith.divf %649, %650 : vector<8x32xf32>
    %652 = arith.mulf %645, %580 : vector<8x32xf32>
    %653 = arith.mulf %640, %646 : vector<8x32xf32>
    %654 = arith.addf %652, %653 : vector<8x32xf32>
    %655 = math.tanh %654 : vector<8x32xf32>
    %656 = arith.mulf %651, %655 : vector<8x32xf32>
    %c0_221 = arith.constant 0 : index
    %c0_222 = arith.constant 0 : index
    %657 = vector.load %arg7[%c0_221, %c0_222] : memref<1x32xf32, #tpu.memory_space<vmem>>, vector<1x32xf32>
    %658 = vector.broadcast %657 : vector<1x32xf32> to vector<8x32xf32>
    %659 = arith.mulf %656, %658 : vector<8x32xf32>
    %cst_223 = arith.constant dense<0.000000e+00> : vector<8xf32>
    %660 = vector.multi_reduction <add>, %659, %cst_223 [1] : vector<8x32xf32> to vector<8xf32>
    %661 = vector.shape_cast %660 : vector<8xf32> to vector<8x1xf32>
    %c0_224 = arith.constant 0 : index
    %c0_225 = arith.constant 0 : index
    %662 = vector.load %arg8[%c0_224, %c0_225] : memref<1x1xf32, #tpu.memory_space<vmem>>, vector<1x1xf32>
    %663 = vector.broadcast %662 : vector<1x1xf32> to vector<8x1xf32>
    %664 = arith.addf %661, %663 : vector<8x1xf32>
    %c0_226 = arith.constant 0 : index
    %c0_227 = arith.constant 0 : index
    %665 = vector.load %arg9[%c0_226, %c0_227] : memref<8x1xf32, #tpu.memory_space<vmem>>, vector<8x1xf32>
    tpu.vector_store %arg9[%c0_226, %c0_227], %664 {strides = array<i32>} : memref<8x1xf32, #tpu.memory_space<vmem>>, vector<8x1xf32>,
    return
  }
}

</mosaic_0001>

<bundles_post_ra>
// kernel: tpu_custom_call.1
= control target key start
LH: loop header
LB: loop body
LE: loop exit
PB: predicated region body
PF: predicated region fallthrough
CT: control target
= control target key end

     0   :  { %s11945_s0 = inlined_call_operand.vmem [shape: f32[64,8], index: 0, kind: input, shape index: {}]   ;;  %s11946_s1 = inlined_call_operand.vmem [shape: f32[4,8,32], index: 1, kind: input, shape index: {}]   ;;  %s11947_s2 = inlined_call_operand.hbm [shape: f32[4,32,32], index: 2, kind: input, shape index: {}]   ;;  %s11948_s3 = inlined_call_operand.vmem [shape: f32[4,1,32], index: 3, kind: input, shape index: {}]   ;;  %s11949_s4 = inlined_call_operand.hbm [shape: f32[4,32,32], index: 4, kind: input, shape index: {}]   ;;  %s11950_s5 = inlined_call_operand.hbm [shape: f32[4,32,32], index: 5, kind: input, shape index: {}]   ;;  %s11951_s6 = inlined_call_operand.vmem [shape: f32[4,1,32], index: 6, kind: input, shape index: {}]   ;;  %s11952_s7 = inlined_call_operand.vmem [shape: f32[1,32], index: 7, kind: input, shape index: {}]   ;;  %s11953_s8 = inlined_call_operand.<no memory space> [shape: f32[1,1], index: 8, kind: input, shape index: {}]   ;;  %s11954_s9 = inlined_call_operand.vmem [shape: f32[8,1], index: 9, kind: output, shape index: {}]  }
   0x1   :  { %v14_v0 = vstv %s11953_s8 }
   0x2   :  { %15 = vst [vmem:[#allocation2] sm:$0x1] %v14_v0 }
   0x3   :  { %16 = vsyncpa [#allocation4], 0 }
   0x4   :  { %17 = vsyncpa [#allocation6], 0  ;;  %s10723_s11 = smov [#allocation5]   ;;  %s10724_s13 = smov [#allocation3]  }
   0x5   :  { %s41_s12 = sshll.u32 %s10723_s11, 4  ;;  %s27_s14 = sshll.u32 %s10724_s13, 4  ;;  %s42_s12 = int_to_ptr.vmem [resolvable:$true] %s41_s12  ;;  %s10784_s14 = int_to_ptr.vmem [resolvable:$true] %s27_s14 }
   0x6   :  { %s10653_s17 = scalar_lea.hbm %s11949_s4, 2048 }
   0x7   :  { %p10654_p0 = scmp.ne.s32.totalorder %s11949_s4, %s10653_s17  ;;  %p10657_p1 = scmp.lt.u32.totalorder %s10653_s17, %s11949_s4 }
   0x9   :  { %p10659_p2 = pnand %p10657_p1, %p10654_p0 }
   0xb   :  { %10662 = shalt.err (!%p10659_p2)
}
   0xc   :  { %s10663_s21 = scalar_lea.vmem %s42_s12, 2048  ;;  %p10668_p4 = scmp.lt.s32.totalorder %s42_s12, %s42_s12 }
   0xd   :  { %p10664_p3 = scmp.ne.s32.totalorder %s42_s12, %s10663_s21  ;;  %p10669_p5 = scmp.lt.s32.totalorder %s10663_s21, %s10663_s21 }
   0xf   :  { %p10670_p6 = por %p10669_p5, %p10668_p4 }
  0x11   :  { %p10671_p7 = pnand %p10670_p6, %p10664_p3 }
  0x13   :  { %10674 = shalt.err (!%p10671_p7)
}
  0x14   :  { %s10725_s22 = smov 128   ;;  %s10726_s23 = smov 8  }
  0x15   :  { %47 = dma.hbm_to_vmem [thread:$0]  %s11949_s4, 2048, %s42_s12, [#allocation6], %s10725_s22, %s10725_s22, %s10726_s23  }
  0x16   :  { %s10675_s28 = scalar_lea.hbm %s11947_s2, 2048 }
  0x17   :  { %p10676_p8 = scmp.ne.s32.totalorder %s11947_s2, %s10675_s28  ;;  %p10679_p9 = scmp.lt.u32.totalorder %s10675_s28, %s11947_s2 }
  0x19   :  { %p10681_p10 = pnand %p10679_p9, %p10676_p8 }
  0x1b   :  { %10684 = shalt.err (!%p10681_p10)
}
  0x1c   :  { %s10685_s13 = scalar_lea.vmem %s10784_s14, 2048  ;;  %p10690_p12 = scmp.lt.s32.totalorder %s10784_s14, %s10784_s14 }
  0x1d   :  { %p10686_p11 = scmp.ne.s32.totalorder %s10784_s14, %s10685_s13  ;;  %p10691_p13 = scmp.lt.s32.totalorder %s10685_s13, %s10685_s13 }
  0x1f   :  { %p10692_p0 = por %p10691_p13, %p10690_p12 }
  0x21   :  { %p10693_p1 = pnand %p10692_p0, %p10686_p11 }
  0x23   :  { %10696 = shalt.err (!%p10693_p1)
}
  0x24   :  { %33 = dma.hbm_to_vmem [thread:$0]  %s11947_s2, 2048, %s10784_s14, [#allocation4], %s10725_s22, %s10725_s22, %s10726_s23  }
  0x25   :  { %s10727_s15 = smov [#allocation7]   ;;  %s10697_s19 = scalar_lea.hbm %s11950_s5, 2048 }
  0x26   :  { %s53_s16 = sshll.u32 %s10727_s15, 4  ;;  %p10698_p2 = scmp.ne.s32.totalorder %s11950_s5, %s10697_s19  ;;  %s54_s16 = int_to_ptr.vmem [resolvable:$true] %s53_s16 }
  0x27   :  { %p10701_p3 = scmp.lt.u32.totalorder %s10697_s19, %s11950_s5 }
  0x29   :  { %p10703_p4 = pnand %p10701_p3, %p10698_p2 }
  0x2b   :  { %10706 = shalt.err (!%p10703_p4)
}
  0x2c   :  { %s10707_s25 = scalar_lea.vmem %s54_s16, 2048  ;;  %p10712_p6 = scmp.lt.s32.totalorder %s54_s16, %s54_s16 }
  0x2d   :  { %p10708_p5 = scmp.ne.s32.totalorder %s54_s16, %s10707_s25  ;;  %p10713_p7 = scmp.lt.s32.totalorder %s10707_s25, %s10707_s25 }
  0x2f   :  { %p10714_p8 = por %p10713_p7, %p10712_p6 }
  0x31   :  { %p10715_p9 = pnand %p10714_p8, %p10708_p5 }
  0x33   :  { %10718 = shalt.err (!%p10715_p9)
}
  0x34   :  { %59 = dma.hbm_to_vmem [thread:$0]  %s11950_s5, 2048, %s54_s16, [#allocation6], %s10725_s22, %s10725_s22, %s10726_s23  }
  0x35   :  { %10719 = dma.done.wait [#allocation4], 2048  }
  0x36   :  { %10720 = vsyncadd [#allocation4], 4294965248 }
  0x37   :  { %10721 = dma.done.wait [#allocation6], 4096  }
  0x38   :  { %10722 = vsyncadd [#allocation6], 4294963200  ;;  %vm167_vm0 = vcmask 64512   ;;  %v75_v1 = vld [vmem:[%s11946_s1] sm:$0xff]  ;;  %v7898_v2 = vld [vmem:[%s11946_s1 + $0x8] sm:$0xff]  ;;  %v11957_v12 = vmov 0.0|0.0  }
  0x39   :  { %v153_v3 = vld [vmem:[%s11945_s0] sm:$0xff]  ;;  %8601 = vmatprep.subr.mxu0 %v75_v1  ;;  %8615 = vmatprep.subr.mxu1 %v7898_v2  ;;  %v154_v4 = vld [vmem:[%s11945_s0 + $0x8] sm:$0xff]  ;;  %v7899_v5 = vld [vmem:[%s11946_s1 + $0x10] sm:$0xff]  ;;  %vm10729_vm1 = vmmov 0   ;;  %v11955_v30 = vmov 0.0   ;;  %vm630_vm2 = vcmask 261120  }
  0x3a   :  { %8602 = vmatpush3.msra.mxu0 %v75_v1  ;;  %8603 = vmatprep.mubr.msk.f32.mxu0 %vm167_vm0, %v153_v3  ;;  %v7900_v6 = vld [vmem:[%s11946_s1 + $0x18] sm:$0xff]  ;;  %v155_v7 = vld [vmem:[%s11945_s0 + $0x10] sm:$0xff]  ;;  %v157_v9 = vld [vmem:[%s11945_s0 + $0x20] sm:$0xff]  ;;  %vm7890_vm3 = vcmask 7168  }
  0x3b   :  { %8616 = vmatpush3.msra.mxu1 %v7898_v2  ;;  %8617 = vmatprep.mubr.msk.f32.mxu1 %vm167_vm0, %v153_v3  ;;  %v156_v8 = vld [vmem:[%s11945_s0 + $0x18] sm:$0xff]  ;;  %v158_v10 = vld [vmem:[%s11945_s0 + $0x28] sm:$0xff]  ;;  %v159_v11 = vld [vmem:[%s11945_s0 + $0x30] sm:$0xff] }
  0x3c   :  { %8604 = vmatmul.mubr.msk.f32.vlgmr.msra.gmra.mrb[0].mxu0 %vm167_vm0, %v154_v4  ;;  %8618 = vmatmul.mubr.msk.f32.vlgmr.msra.gmra.mrb[0].mxu1 %vm167_vm0, %v154_v4  ;;  %v160_v13 = vld [vmem:[%s11945_s0 + $0x38] sm:$0xff]  ;;  %v101_v14 = vld [vmem:[#allocation3] sm:$0xff]  ;;  %v102_v15 = vld [vmem:[#allocation3 + $0x8] sm:$0xff] }
  0x3d   :  { %8629 = vmatprep.subr.mxu0 %v7899_v5  ;;  %8643 = vmatprep.subr.mxu1 %v7900_v6  ;;  %v106_v16 = vld [vmem:[#allocation3 + $0x20] sm:$0xff]  ;;  %v107_v17 = vld [vmem:[#allocation3 + $0x28] sm:$0xff]  ;;  %v10892_v18 = vpack.c.bf16 %v102_v15, %v101_v14  ;;  %v103_v20 = vld [vmem:[#allocation3 + $0x10] sm:$0xff] }
  0x3e   :  { %8630 = vmatpush3.msra.mxu0 %v7899_v5  ;;  %8644 = vmatpush3.msra.mxu1 %v7900_v6  ;;  %v10894_v19 = vpack.c.bf16 %v107_v17, %v106_v16  ;;  %v104_v21 = vld [vmem:[#allocation3 + $0x18] sm:$0xff]  ;;  %v108_v22 = vld [vmem:[#allocation3 + $0x30] sm:$0xff]  ;;  %v111_v26 = vld [vmem:[#allocation3 + $0x40] sm:$0xff] }
  0x3f   :  { %8606 = vmatprep.mubr.msk.f32.mxu0 %vm167_vm0, %v155_v7  ;;  %8620 = vmatprep.mubr.msk.f32.mxu1 %vm167_vm0, %v155_v7  ;;  %v109_v23 = vld [vmem:[#allocation3 + $0x38] sm:$0xff]  ;;  %v10902_v24 = vpack.c.bf16 %v104_v21, %v103_v20  ;;  %v112_v27 = vld [vmem:[#allocation3 + $0x48] sm:$0xff]  ;;  %v116_v28 = vld [vmem:[#allocation3 + $0x60] sm:$0xff] }
  0x40   :  { %8607 = vmatmul.mubr.msk.f32.gmra.mrb[2].mxu0 %vm167_vm0, %v156_v8  ;;  %8621 = vmatmul.mubr.msk.f32.gmra.mrb[2].mxu1 %vm167_vm0, %v156_v8  ;;  %v10904_v25 = vpack.c.bf16 %v109_v23, %v108_v22  ;;  %v117_v29 = vld [vmem:[#allocation3 + $0x68] sm:$0xff]  ;;  %v10926_v31 = vpack.c.bf16 %v112_v27, %v111_v26  ;;  %v113_v33 = vld [vmem:[#allocation3 + $0x50] sm:$0xff]  ;;  %v114_v34 = vld [vmem:[#allocation3 + $0x58] sm:$0xff] }
  0x41   :  { %8609 = vmatprep.mubr.msk.f32.mxu0 %vm167_vm0, %v157_v9  ;;  %8623 = vmatprep.mubr.msk.f32.mxu1 %vm167_vm0, %v157_v9  ;;  %v10928_v32 = vpack.c.bf16 %v117_v29, %v116_v28  ;;  %v118_v35 = vld [vmem:[#allocation3 + $0x70] sm:$0xff]  ;;  %v119_v36 = vld [vmem:[#allocation3 + $0x78] sm:$0xff]  ;;  %v10934_v37 = vpack.c.bf16 %v114_v34, %v113_v33  ;;  %v82_v39 = vld [vmem:[#allocation5] sm:$0xff] }
  0x42   :  { %9713 = vmatprep.subr.bf16.mxu0 %v11957_v12  ;;  %9719 = vmatprep.subr.bf16.mxu1 %v11957_v12  ;;  %v10936_v38 = vpack.c.bf16 %v119_v36, %v118_v35  ;;  %v83_v40 = vld [vmem:[#allocation5 + $0x8] sm:$0xff]  ;;  %v87_v41 = vld [vmem:[#allocation5 + $0x20] sm:$0xff]  ;;  %v84_v45 = vld [vmem:[#allocation5 + $0x10] sm:$0xff] }
  0x43   :  { %v10954_v42 = vpack.c.bf16 %v83_v40, %v82_v39  ;;  %v88_v43 = vld [vmem:[#allocation5 + $0x28] sm:$0xff]  ;;  %v85_v46 = vld [vmem:[#allocation5 + $0x18] sm:$0xff]  ;;  %v89_v47 = vld [vmem:[#allocation5 + $0x30] sm:$0xff] }
  0x44   :  { %8610 = vmatmul.mubr.msk.f32.gmra.mrb[4].mxu0 %vm167_vm0, %v158_v10  ;;  %8624 = vmatmul.mubr.msk.f32.gmra.mrb[4].mxu1 %vm167_vm0, %v158_v10  ;;  %v10956_v44 = vpack.c.bf16 %v88_v43, %v87_v41  ;;  %v10962_v48 = vpack.c.bf16 %v85_v46, %v84_v45  ;;  %v90_v49 = vld [vmem:[#allocation5 + $0x38] sm:$0xff]  ;;  %v10978_v52 = vld [vmem:[%s11948_s3 + $0x1] ss:$0 sm:$0xff]  ;;  %v7925_v22 = vld [vmem:[%s11948_s3 + $0x2] ss:$0 sm:$0xff] }
  0x45   :  { %8612 = vmatprep.mubr.msk.f32.mxu0 %vm167_vm0, %v159_v11  ;;  %8626 = vmatprep.mubr.msk.f32.mxu1 %vm167_vm0, %v159_v11  ;;  %v10964_v50 = vpack.c.bf16 %v90_v49, %v89_v47  ;;  %v10973_v51 = vld [vmem:[%s11948_s3] ss:$0 sm:$0xff]  ;;  %v7934_v23 = vld [vmem:[%s11948_s3 + $0x3] ss:$0 sm:$0xff] }
  0x48   :  { %8613 = vmatmul.mubr.msk.f32.gmra.mrb[6].mxu0 %vm167_vm0, %v160_v13  ;;  %8627 = vmatmul.mubr.msk.f32.gmra.mrb[6].mxu1 %vm167_vm0, %v160_v13 }
  0x49   :  { %8631 = vmatprep.mubr.msk.f32.mxu0 %vm167_vm0, %v153_v3  ;;  %8645 = vmatprep.mubr.msk.f32.mxu1 %vm167_vm0, %v153_v3 }
  0x4c   :  { %8632 = vmatmul.mubr.msk.f32.vlgmr.msra.gmra.mrb[8].mxu0 %vm167_vm0, %v154_v4  ;;  %8646 = vmatmul.mubr.msk.f32.vlgmr.msra.gmra.mrb[8].mxu1 %vm167_vm0, %v154_v4 }
  0x4d   :  { %9715 = vmatpush3.bf16.msra.mxu0 %v10892_v18  ;;  %9721 = vmatpush3.bf16.msra.mxu1 %v10894_v19 }
  0x4e   :  { %8634 = vmatprep.mubr.msk.f32.mxu0 %vm167_vm0, %v155_v7  ;;  %8648 = vmatprep.mubr.msk.f32.mxu1 %vm167_vm0, %v155_v7 }
  0x4f   :  { %9716 = vmatprep.subr.bf16.mxu0 %v11957_v12  ;;  %9722 = vmatprep.subr.bf16.mxu1 %v11957_v12 }
  0x50   :  { %8635 = vmatmul.mubr.msk.f32.gmra.mrb[10].mxu0 %vm167_vm0, %v156_v8  ;;  %8649 = vmatmul.mubr.msk.f32.gmra.mrb[10].mxu1 %vm167_vm0, %v156_v8 }
  0x51   :  { %8637 = vmatprep.mubr.msk.f32.mxu0 %vm167_vm0, %v157_v9  ;;  %8651 = vmatprep.mubr.msk.f32.mxu1 %vm167_vm0, %v157_v9 }
  0x52   :  { %9718 = vmatpush3.bf16.msra.mxu0 %v10902_v24  ;;  %9724 = vmatpush3.bf16.msra.mxu1 %v10904_v25 }
  0x53   :  { %9725 = vmatprep.subr.bf16.mxu0 %v11957_v12  ;;  %9731 = vmatprep.subr.bf16.mxu1 %v11957_v12 }
  0x54   :  { %8638 = vmatmul.mubr.msk.f32.gmra.mrb[12].mxu0 %vm167_vm0, %v158_v10  ;;  %8652 = vmatmul.mubr.msk.f32.gmra.mrb[12].mxu1 %vm167_vm0, %v158_v10 }
  0x55   :  { %8640 = vmatprep.mubr.msk.f32.mxu0 %vm167_vm0, %v159_v11  ;;  %8654 = vmatprep.mubr.msk.f32.mxu1 %vm167_vm0, %v159_v11 }
  0x58   :  { %8641 = vmatmul.mubr.msk.f32.gmra.mrb[14].mxu0 %vm167_vm0, %v160_v13  ;;  %8655 = vmatmul.mubr.msk.f32.gmra.mrb[14].mxu1 %vm167_vm0, %v160_v13 }
  0x59   :  { %8665 = vmatprep.mubr.msk.f32.mxu0 %vm10729_vm1, %v11955_v30  ;;  %8676 = vmatprep.mubr.msk.f32.mxu1 %vm10729_vm1, %v11955_v30 }
  0x5c   :  { %8666 = vmatmul.mubr.f32.vlgmr.msra.gmra.mrb[16].mxu0 %v11955_v30  ;;  %8677 = vmatmul.mubr.f32.vlgmr.msra.gmra.mrb[16].mxu1 %v11955_v30 }
  0x5d   :  { %9727 = vmatpush3.bf16.msra.mxu0 %v10926_v31  ;;  %9733 = vmatpush3.bf16.msra.mxu1 %v10928_v32 }
  0x5e   :  { %9728 = vmatprep.subr.bf16.mxu0 %v11957_v12  ;;  %9734 = vmatprep.subr.bf16.mxu1 %v11957_v12 }
  0x5f   :  { %8687 = vmatprep.mubr.msk.f32.mxu0 %vm10729_vm1, %v11955_v30  ;;  %8698 = vmatprep.mubr.msk.f32.mxu1 %vm10729_vm1, %v11955_v30 }
  0x61   :  { %9730 = vmatpush3.bf16.msra.mxu0 %v10934_v37  ;;  %9736 = vmatpush3.bf16.msra.mxu1 %v10936_v38 }
  0x62   :  { %9737 = vmatprep.subr.bf16.mxu0 %v11957_v12  ;;  %9743 = vmatprep.subr.bf16.mxu1 %v11957_v12 }
  0x64   :  { %8688 = vmatmul.mubr.f32.vlgmr.msra.gmra.mrb[18].mxu0 %v11955_v30  ;;  %8699 = vmatmul.mubr.f32.vlgmr.msra.gmra.mrb[18].mxu1 %v11955_v30 }
  0x65   :  { %8709 = vmatprep.mubr.msk.f32.mxu0 %vm10729_vm1, %v11955_v30  ;;  %8720 = vmatprep.mubr.msk.f32.mxu1 %vm10729_vm1, %v11955_v30 }
  0x66   :  { %9739 = vmatpush3.bf16.msra.mxu0 %v10954_v42  ;;  %9745 = vmatpush3.bf16.msra.mxu1 %v10956_v44 }
  0x67   :  { %9740 = vmatprep.subr.bf16.mxu0 %v11957_v12  ;;  %9746 = vmatprep.subr.bf16.mxu1 %v11957_v12 }
  0x6a   :  { %9742 = vmatpush3.bf16.msra.mxu0 %v10962_v48  ;;  %9748 = vmatpush3.bf16.msra.mxu1 %v10964_v50 }
  0x6b   :  { %9749 = vmatprep.subr.bf16.mxu0 %v11957_v12  ;;  %9755 = vmatprep.subr.bf16.mxu1 %v11957_v12 }
 0x10f   :  { %v8605_v53 = vpop.f32.mrb[0].mxu0  ;;  %v8619_v54 = vpop.f32.mrb[0].mxu1 }
 0x110   :  { %v10981_v55 = vadd.f32 %v8605_v53, %v10973_v51  ;;  %v10984_v56 = vadd.f32 %v8619_v54, %v10978_v52  ;;  %v258_v57 = vpop.f32.mrb[1].mxu0  ;;  %v369_v58 = vpop.f32.mrb[1].mxu1 }
 0x113   :  { %v8608_v59 = vpop.f32.mrb[2].mxu0  ;;  %v8622_v60 = vpop.f32.mrb[2].mxu1 }
 0x114   :  { %v10987_v61 = vadd.f32 %v8608_v59, %v10973_v51  ;;  %v10990_v62 = vadd.f32 %v8622_v60, %v10978_v52  ;;  %v268_v63 = vpop.f32.mrb[3].mxu0  ;;  %v379_v0 = vpop.f32.mrb[3].mxu1 }
 0x115   :  { %v10993_v1 = vadd.f32 %v10973_v51, %v268_v63  ;;  %v10996_v2 = vadd.f32 %v10978_v52, %v379_v0 }
 0x117   :  { %v8611_v3 = vpop.f32.mrb[4].mxu0  ;;  %v8625_v4 = vpop.f32.mrb[4].mxu1 }
 0x118   :  { %v10999_v5 = vadd.f32 %v8611_v3, %v10973_v51  ;;  %v11002_v6 = vadd.f32 %v8625_v4, %v10978_v52  ;;  %v278_v7 = vpop.f32.mrb[5].mxu0  ;;  %v389_v8 = vpop.f32.mrb[5].mxu1 }
 0x119   :  { %v11005_v9 = vadd.f32 %v10973_v51, %v278_v7  ;;  %v11008_v10 = vadd.f32 %v10978_v52, %v389_v8 }
 0x11a   :  { %11959 = vst [vmem:[#allocation10_spill] sm:$0xff] %v10999_v5  ;;  %11960 = vst [vmem:[#allocation11_spill] sm:$0xff] %v11002_v6 }
 0x11b   :  { %v8614_v11 = vpop.f32.mrb[6].mxu0  ;;  %v8628_v13 = vpop.f32.mrb[6].mxu1 }
 0x11c   :  { %v11011_v14 = vadd.f32 %v8614_v11, %v10973_v51  ;;  %v11014_v15 = vadd.f32 %v8628_v13, %v10978_v52  ;;  %v288_v16 = vpop.f32.mrb[7].mxu0  ;;  %v399_v17 = vpop.f32.mrb[7].mxu1 }
 0x11d   :  { %v11017_v20 = vadd.f32 %v10973_v51, %v288_v16  ;;  %v11020_v21 = vadd.f32 %v10978_v52, %v399_v17 }
 0x11e   :  { %11961 = vst [vmem:[#allocation12_spill] sm:$0xff] %v11011_v14  ;;  %11962 = vst [vmem:[#allocation13_spill] sm:$0xff] %v11014_v15 }
 0x11f   :  { %11963 = vst [vmem:[#allocation14_spill] sm:$0xff] %v11017_v20  ;;  %11964 = vst [vmem:[#allocation15_spill] sm:$0xff] %v11020_v21  ;;  %v8633_v26 = vpop.f32.mrb[8].mxu0  ;;  %v8647_v27 = vpop.f32.mrb[8].mxu1 }
 0x120   :  { %v11028_v28 = vadd.f32 %v8633_v26, %v7925_v22  ;;  %v11030_v29 = vadd.f32 %v8647_v27, %v7934_v23  ;;  %v480_v33 = vpop.f32.mrb[9].mxu0  ;;  %v591_v34 = vpop.f32.mrb[9].mxu1  ;;  %v259_v26 = vadd.f32 %v10973_v51, %v258_v57  ;;  %v370_v27 = vadd.f32 %v10978_v52, %v369_v58 }
 0x123   :  { %v8636_v35 = vpop.f32.mrb[10].mxu0  ;;  %v8650_v36 = vpop.f32.mrb[10].mxu1 }
 0x124   :  { %v11032_v39 = vadd.f32 %v8636_v35, %v7925_v22  ;;  %v11034_v40 = vadd.f32 %v8650_v36, %v7934_v23  ;;  %v490_v41 = vpop.f32.mrb[11].mxu0  ;;  %v601_v43 = vpop.f32.mrb[11].mxu1 }
 0x125   :  { %v11036_v45 = vadd.f32 %v7925_v22, %v490_v41  ;;  %v11038_v46 = vadd.f32 %v7934_v23, %v601_v43 }
 0x127   :  { %v8639_v47 = vpop.f32.mrb[12].mxu0  ;;  %v8653_v49 = vpop.f32.mrb[12].mxu1 }
 0x128   :  { %v11040_v53 = vadd.f32 %v8639_v47, %v7925_v22  ;;  %v11042_v54 = vadd.f32 %v8653_v49, %v7934_v23  ;;  %v500_v59 = vpop.f32.mrb[13].mxu0  ;;  %v611_v60 = vpop.f32.mrb[13].mxu1 }
 0x129   :  { %v11044_v63 = vadd.f32 %v7925_v22, %v500_v59  ;;  %v11046_v0 = vadd.f32 %v7934_v23, %v611_v60 }
 0x12a   :  { %11965 = vst [vmem:[#allocation16_spill] sm:$0xff] %v11040_v53  ;;  %11966 = vst [vmem:[#allocation17_spill] sm:$0xff] %v11042_v54 }
 0x12b   :  { %v8642_v3 = vpop.f32.mrb[14].mxu0  ;;  %v8656_v4 = vpop.f32.mrb[14].mxu1 }
 0x12c   :  { %v11048_v7 = vadd.f32 %v8642_v3, %v7925_v22  ;;  %v11050_v8 = vadd.f32 %v8656_v4, %v7934_v23  ;;  %v510_v11 = vpop.f32.mrb[15].mxu0  ;;  %v621_v13 = vpop.f32.mrb[15].mxu1  ;;  %v481_v3 = vadd.f32 %v7925_v22, %v480_v33  ;;  %v592_v4 = vadd.f32 %v7934_v23, %v591_v34 }
 0x12d   :  { %v11052_v16 = vadd.f32 %v7925_v22, %v510_v11  ;;  %v11054_v17 = vadd.f32 %v7934_v23, %v621_v13 }
 0x12e   :  { %11967 = vst [vmem:[#allocation18_spill] sm:$0xff] %v11048_v7  ;;  %11968 = vst [vmem:[#allocation19_spill] sm:$0xff] %v11050_v8 }
 0x12f   :  { %11969 = vst [vmem:[#allocation20_spill] sm:$0xff] %v11052_v16  ;;  %11970 = vst [vmem:[#allocation21_spill] sm:$0xff] %v11054_v17  ;;  %v700_v35 = vpop.f32.mrb[16].mxu0  ;;  %v771_v36 = vpop.f32.mrb[16].mxu1  ;;  %v11194_v16 = vld [vmem:[%s11951_s6 + $0x2] ss:$0 sm:$0xff] }
 0x130   :  { %v704_v41 = vadd.f32 %v700_v35, %v259_v26  ;;  %v775_v43 = vadd.f32 %v771_v36, %v370_v27  ;;  %v8667_v47 = vpop.f32.mrb[17].mxu0  ;;  %v8678_v49 = vpop.f32.mrb[17].mxu1 }
 0x132   :  { %v7943_v59 = vmul.f32 -1.442695, %v704_v41  ;;  %v7944_v60 = vmul.f32 -1.442695, %v775_v43  ;;  %v98_v43 = vld [vmem:[#allocation5 + $0x68] sm:$0xff] }
 0x134   :  { %10393 = vpow2.f32 %v7943_v59 }
 0x135   :  { %10395 = vpow2.f32 %v7944_v60  ;;  %v94_v60 = vld [vmem:[#allocation5 + $0x50] sm:$0xff] }
 0x137   :  { %v842_v11 = vpop.f32.mrb[18].mxu0  ;;  %v913_v30 = vpop.f32.mrb[18].mxu1 }
 0x138   :  { %v846_v13 = vadd.f32 %v842_v11, %v481_v3  ;;  %v917_v12 = vadd.f32 %v913_v30, %v592_v4  ;;  %v8689_v8 = vpop.f32.mrb[19].mxu0  ;;  %v8700_v51 = vpop.f32.mrb[19].mxu1  ;;  %v93_v30 = vld [vmem:[#allocation5 + $0x48] sm:$0xff]  ;;  %v95_v4 = vld [vmem:[#allocation5 + $0x58] sm:$0xff]  ;;  %v99_v11 = vld [vmem:[#allocation5 + $0x70] sm:$0xff] }
 0x139   :  { %v97_v8 = vld [vmem:[#allocation5 + $0x60] sm:$0xff]  ;;  %v11073_v51 = vpack.c.bf16 %v95_v4, %v94_v60  ;;  %v136_v4 = vld [vmem:[#allocation7 + $0x68] sm:$0xff] }
 0x13a   :  { %v7945_v57 = vmul.f32 -1.442695, %v917_v12  ;;  %v92_v12 = vld [vmem:[#allocation5 + $0x40] sm:$0xff]  ;;  %v11063_v59 = vpack.c.bf16 %v98_v43, %v97_v8 }
 0x13b   :  { %v135_v60 = vld [vmem:[#allocation7 + $0x60] sm:$0xff] }
 0x13c   :  { %10397 = vpow2.f32 %v7945_v57 }
 0x13d   :  { %10399 = vtanh.f32 %v846_v13  ;;  %v100_v13 = vld [vmem:[#allocation5 + $0x78] sm:$0xff] }
 0x13e   :  { %v10394_v52 = vpop.eup %10393  ;;  %v11075_v57 = vpack.c.bf16 %v100_v13, %v99_v11  ;;  %v11111_v13 = vpack.c.bf16 %v136_v4, %v135_v60 }
 0x13f   :  { %v10396_v58 = vpop.eup %10395  ;;  %v921_v7 = vadd.f32 1.0, %v10394_v52  ;;  %v120_v52 = vld [vmem:[#allocation7] sm:$0xff] }
 0x140   :  { %v927_v26 = vadd.f32 1.0, %v10396_v58  ;;  %v11971_v58 = vmov 0.0|0.0  }
 0x141   :  { %10401 = vrcp.f32 %v921_v7  ;;  %v11061_v7 = vpack.c.bf16 %v93_v30, %v92_v12  ;;  %v127_v12 = vld [vmem:[#allocation7 + $0x30] sm:$0xff]  ;;  %v128_v30 = vld [vmem:[#allocation7 + $0x38] sm:$0xff] }
 0x142   :  { %10403 = vrcp.f32 %v927_v26  ;;  %v121_v26 = vld [vmem:[#allocation7 + $0x8] sm:$0xff]  ;;  %v11099_v43 = vpack.c.bf16 %v128_v30, %v127_v12  ;;  %v11187_v12 = vld [vmem:[%s11951_s6 + $0x1] ss:$0 sm:$0xff] }
 0x146   :  { %v10398_v27 = vpop.eup %10397 }
 0x147   :  { %v10400_v35 = vpop.eup %10399  ;;  %v934_v33 = vadd.f32 1.0, %v10398_v27  ;;  %v125_v27 = vld [vmem:[#allocation7 + $0x20] sm:$0xff] }
 0x149   :  { %10405 = vrcp.f32 %v934_v33  ;;  %v122_v33 = vld [vmem:[#allocation7 + $0x10] sm:$0xff] }
 0x14b   :  { %v10402_v36 = vpop.eup %10401 }
 0x14c   :  { %v10404_v22 = vpop.eup %10403  ;;  %v938_v23 = vmul.f32 %v10402_v36, %v10400_v35  ;;  %v126_v35 = vld [vmem:[#allocation7 + $0x28] sm:$0xff]  ;;  %v11972_v36 = vmov 0.0  }
 0x14d   :  { %v937_v34 = vmul.f32 0.0, %v10404_v22  ;;  %v11085_v22 = vpack.c.bf16 %v121_v26, %v120_v52  ;;  %v132_v52 = vld [vmem:[#allocation7 + $0x50] sm:$0xff]  ;;  %v133_v26 = vld [vmem:[#allocation7 + $0x58] sm:$0xff] }
 0x14f   :  { %v11058_v41 = vadd.f32 %v938_v23, %v937_v34  ;;  %v11087_v23 = vpack.c.bf16 %v126_v35, %v125_v27  ;;  %v123_v34 = vld [vmem:[#allocation7 + $0x18] sm:$0xff]  ;;  %v137_v27 = vld [vmem:[#allocation7 + $0x70] sm:$0xff] }
 0x150   :  { %v11097_v8 = vpack.c.bf16 %v123_v34, %v122_v33  ;;  %v138_v35 = vld [vmem:[#allocation7 + $0x78] sm:$0xff]  ;;  %v11119_v33 = vpack.c.bf16 %v133_v26, %v132_v52 }
 0x151   :  { %10407 = vtanh.f32 %v11058_v41  ;;  %v11121_v34 = vpack.c.bf16 %v138_v35, %v137_v27 }
 0x153   :  { %v10406_v47 = vpop.eup %10405 }
 0x15b   :  { %v10408_v49 = vpop.eup %10407 }
 0x15c   :  { %v11065_v3 = vmul.f32 %v10408_v49, %v10406_v47  ;;  %v130_v47 = vld [vmem:[#allocation7 + $0x40] sm:$0xff]  ;;  %v131_v49 = vld [vmem:[#allocation7 + $0x48] sm:$0xff] }
 0x15d   :  { %v11109_v11 = vpack.c.bf16 %v131_v49, %v130_v47 }
 0x15e   :  { %8710 = vmatmul.mubr.msk.f32.vlgmr.msra.gmra.mrb[20].mxu0 %vm630_vm2, %v11065_v3  ;;  %8721 = vmatmul.mubr.msk.f32.vlgmr.msra.gmra.mrb[20].mxu1 %vm630_vm2, %v11065_v3 }
 0x15f   :  { %9751 = vmatpush3.bf16.msra.mxu0 %v11061_v7  ;;  %9757 = vmatpush3.bf16.msra.mxu1 %v11063_v59 }
 0x160   :  { %9752 = vmatprep.subr.bf16.mxu0 %v11971_v58  ;;  %9758 = vmatprep.subr.bf16.mxu1 %v11971_v58 }
 0x161   :  { %8731 = vmatprep.mubr.msk.f32.mxu0 %vm10729_vm1, %v11972_v36  ;;  %8742 = vmatprep.mubr.msk.f32.mxu1 %vm10729_vm1, %v11972_v36 }
 0x163   :  { %9754 = vmatpush3.bf16.msra.mxu0 %v11073_v51  ;;  %9760 = vmatpush3.bf16.msra.mxu1 %v11075_v57 }
 0x164   :  { %9761 = vmatprep.subr.bf16.mxu0 %v11971_v58  ;;  %9767 = vmatprep.subr.bf16.mxu1 %v11971_v58 }
 0x166   :  { %8732 = vmatmul.mubr.msk.f32.vlgmr.msra.gmra.mrb[22].mxu0 %vm630_vm2, %v11065_v3  ;;  %8743 = vmatmul.mubr.msk.f32.vlgmr.msra.gmra.mrb[22].mxu1 %vm630_vm2, %v11065_v3 }
 0x167   :  { %9763 = vmatpush3.bf16.msra.mxu0 %v11085_v22  ;;  %9769 = vmatpush3.bf16.msra.mxu1 %v11087_v23 }
 0x168   :  { %9764 = vmatprep.subr.bf16.mxu0 %v11971_v58  ;;  %9770 = vmatprep.subr.bf16.mxu1 %v11971_v58 }
 0x169   :  { %8753 = vmatprep.mubr.msk.f32.mxu0 %vm10729_vm1, %v11972_v36  ;;  %8764 = vmatprep.mubr.msk.f32.mxu1 %vm10729_vm1, %v11972_v36 }
 0x16b   :  { %9766 = vmatpush3.bf16.msra.mxu0 %v11097_v8  ;;  %9772 = vmatpush3.bf16.msra.mxu1 %v11099_v43 }
 0x16c   :  { %9773 = vmatprep.subr.bf16.mxu0 %v11971_v58  ;;  %9779 = vmatprep.subr.bf16.mxu1 %v11971_v58 }
 0x16e   :  { %8754 = vmatmul.mubr.f32.vlgmr.msra.gmra.mrb[20].mxu0 %v11972_v36  ;;  %8765 = vmatmul.mubr.f32.vlgmr.msra.gmra.mrb[20].mxu1 %v11972_v36 }
 0x16f   :  { %9775 = vmatpush3.bf16.msra.mxu0 %v11109_v11  ;;  %9781 = vmatpush3.bf16.msra.mxu1 %v11111_v13 }
 0x170   :  { %9776 = vmatprep.subr.bf16.mxu0 %v11971_v58  ;;  %9782 = vmatprep.subr.bf16.mxu1 %v11971_v58 }
 0x171   :  { %8775 = vmatprep.mubr.msk.f32.mxu0 %vm10729_vm1, %v11972_v36  ;;  %8786 = vmatprep.mubr.msk.f32.mxu1 %vm10729_vm1, %v11972_v36 }
 0x173   :  { %9778 = vmatpush3.bf16.msra.mxu0 %v11119_v33  ;;  %9784 = vmatpush3.bf16.msra.mxu1 %v11121_v34 }
 0x174   :  { %9785 = vmatprep.subr.bf16.mxu0 %v11971_v58  ;;  %9791 = vmatprep.subr.bf16.mxu1 %v11971_v58 }
 0x176   :  { %8776 = vmatmul.mubr.f32.vlgmr.msra.gmra.mrb[22].mxu0 %v11972_v36  ;;  %8787 = vmatmul.mubr.f32.vlgmr.msra.gmra.mrb[22].mxu1 %v11972_v36 }
 0x177   :  { %9787 = vmatpush3.bf16.msra.mxu0 %v10892_v18  ;;  %9793 = vmatpush3.bf16.msra.mxu1 %v10894_v19 }
 0x178   :  { %9788 = vmatprep.subr.bf16.mxu0 %v11971_v58  ;;  %9794 = vmatprep.subr.bf16.mxu1 %v11971_v58 }
 0x179   :  { %8797 = vmatprep.mubr.msk.f32.mxu0 %vm10729_vm1, %v11972_v36  ;;  %8808 = vmatprep.mubr.msk.f32.mxu1 %vm10729_vm1, %v11972_v36 }
 0x17b   :  { %9790 = vmatpush3.bf16.msra.mxu0 %v10902_v24  ;;  %9796 = vmatpush3.bf16.msra.mxu1 %v10904_v25 }
 0x17c   :  { %9797 = vmatprep.subr.bf16.mxu0 %v11971_v58  ;;  %9803 = vmatprep.subr.bf16.mxu1 %v11971_v58 }
 0x17e   :  { %8798 = vmatmul.mubr.msk.f32.vlgmr.msra.gmra.mrb[24].mxu0 %vm630_vm2, %v11065_v3  ;;  %8809 = vmatmul.mubr.msk.f32.vlgmr.msra.gmra.mrb[24].mxu1 %vm630_vm2, %v11065_v3 }
 0x17f   :  { %9799 = vmatpush3.bf16.msra.mxu0 %v10926_v31  ;;  %9805 = vmatpush3.bf16.msra.mxu1 %v10928_v32 }
 0x180   :  { %9800 = vmatprep.subr.bf16.mxu0 %v11971_v58  ;;  %9806 = vmatprep.subr.bf16.mxu1 %v11971_v58 }
 0x181   :  { %8819 = vmatprep.mubr.msk.f32.mxu0 %vm10729_vm1, %v11972_v36  ;;  %8830 = vmatprep.mubr.msk.f32.mxu1 %vm10729_vm1, %v11972_v36 }
 0x183   :  { %9802 = vmatpush3.bf16.msra.mxu0 %v10934_v37  ;;  %9808 = vmatpush3.bf16.msra.mxu1 %v10936_v38 }
 0x184   :  { %9809 = vmatprep.subr.bf16.mxu0 %v11971_v58  ;;  %9815 = vmatprep.subr.bf16.mxu1 %v11971_v58 }
 0x186   :  { %8820 = vmatmul.mubr.msk.f32.vlgmr.msra.gmra.mrb[26].mxu0 %vm630_vm2, %v11065_v3  ;;  %8831 = vmatmul.mubr.msk.f32.vlgmr.msra.gmra.mrb[26].mxu1 %vm630_vm2, %v11065_v3  ;;  %v11182_v3 = vld [vmem:[%s11951_s6] ss:$0 sm:$0xff] }
 0x187   :  { %9811 = vmatpush3.bf16.msra.mxu0 %v10954_v42  ;;  %9817 = vmatpush3.bf16.msra.mxu1 %v10956_v44 }
 0x188   :  { %9812 = vmatprep.subr.bf16.mxu0 %v11971_v58  ;;  %9818 = vmatprep.subr.bf16.mxu1 %v11971_v58 }
 0x189   :  { %8841 = vmatprep.mubr.msk.f32.mxu0 %vm10729_vm1, %v11972_v36  ;;  %8852 = vmatprep.mubr.msk.f32.mxu1 %vm10729_vm1, %v11972_v36 }
 0x18b   :  { %9814 = vmatpush3.bf16.msra.mxu0 %v10962_v48  ;;  %9820 = vmatpush3.bf16.msra.mxu1 %v10964_v50 }
 0x18c   :  { %9821 = vmatprep.subr.bf16.mxu0 %v11971_v58  ;;  %9827 = vmatprep.subr.bf16.mxu1 %v11971_v58 }
 0x241   :  { %v1315_v30 = vpop.f32.mrb[20].mxu0  ;;  %v1386_v47 = vpop.f32.mrb[20].mxu1 }
 0x242   :  { %v10289_v49 = vadd.f32 %v11182_v3, %v1315_v30  ;;  %v10290_v60 = vadd.f32 %v11187_v12, %v1386_v47  ;;  %v8755_v4 = vpop.f32.mrb[21].mxu0  ;;  %v8766_v52 = vpop.f32.mrb[21].mxu1 }
 0x244   :  { %v7954_v26 = vmul.f32 -1.442695, %v10289_v49  ;;  %v7955_v27 = vmul.f32 -1.442695, %v10290_v60 }
 0x246   :  { %10409 = vpow2.f32 %v7954_v26 }
 0x247   :  { %10411 = vpow2.f32 %v7955_v27 }
 0x249   :  { %v1457_v35 = vpop.f32.mrb[22].mxu0  ;;  %v1528_v15 = vpop.f32.mrb[22].mxu1 }
 0x24a   :  { %v8777_v14 = vpop.f32.mrb[23].mxu0  ;;  %v8788_v17 = vpop.f32.mrb[23].mxu1  ;;  %v10291_v21 = vadd.f32 %v11194_v16, %v1457_v35 }
 0x24c   :  { %10413 = vtanh.f32 %v10291_v21 }
 0x250   :  { %v10410_v30 = vpop.eup %10409 }
 0x251   :  { %v10412_v20 = vpop.eup %10411  ;;  %v1536_v47 = vadd.f32 1.0, %v10410_v30  ;;  %v1623_v4 = vpop.f32.mrb[24].mxu0 }
 0x252   :  { %v1694_v52 = vpop.f32.mrb[24].mxu1  ;;  %v1542_v49 = vadd.f32 1.0, %v10412_v20  ;;  %v1627_v60 = vadd.f32 %v1623_v4, %v10981_v55  ;;  %v8799_v14 = vpop.f32.mrb[25].mxu0 }
 0x253   :  { %v1698_v26 = vadd.f32 %v1694_v52, %v10984_v56  ;;  %v8810_v17 = vpop.f32.mrb[25].mxu1  ;;  %10415 = vrcp.f32 %v1536_v47 }
 0x254   :  { %10417 = vrcp.f32 %v1542_v49  ;;  %v7961_v27 = vmul.f32 -1.442695, %v1627_v60 }
 0x255   :  { %v7962_v54 = vmul.f32 -1.442695, %v1698_v26 }
 0x256   :  { %10419 = vpow2.f32 %v7961_v27  ;;  %v10414_v5 = vpop.eup %10413 }
 0x257   :  { %10421 = vpow2.f32 %v7962_v54 }
 0x259   :  { %v1765_v35 = vpop.f32.mrb[26].mxu0  ;;  %v1836_v53 = vpop.f32.mrb[26].mxu1 }
 0x25a   :  { %v1769_v30 = vadd.f32 %v1765_v35, %v11028_v28  ;;  %v1840_v6 = vadd.f32 %v1836_v53, %v11030_v29  ;;  %v8821_v20 = vpop.f32.mrb[27].mxu0  ;;  %v8832_v21 = vpop.f32.mrb[27].mxu1  ;;  %v11206_v28 = vld [vmem:[%s11951_s6 + $0x3] ss:$0 sm:$0xff] }
 0x25b   :  { %v10292_v29 = vadd.f32 %v11206_v28, %v1528_v15 }
 0x25c   :  { %v7963_v52 = vmul.f32 -1.442695, %v1840_v6 }
 0x25d   :  { %v10416_v55 = vpop.eup %10415  ;;  %v7956_v17 = vmul.f32 -1.442695, %v10292_v29 }
 0x25e   :  { %v10418_v4 = vpop.eup %10417  ;;  %v1553_v56 = vmul.f32 %v10416_v55, %v10414_v5  ;;  %10423 = vpow2.f32 %v7963_v52 }
 0x25f   :  { %v1552_v14 = vmul.f32 0.0, %v10418_v4  ;;  %10425 = vtanh.f32 %v1769_v30 }
 0x260   :  { %v10420_v47 = vpop.eup %10419 }
 0x261   :  { %v10422_v49 = vpop.eup %10421  ;;  %v11201_v60 = vadd.f32 %v1553_v56, %v1552_v14  ;;  %v1844_v26 = vadd.f32 1.0, %v10420_v47 }
 0x262   :  { %v1850_v54 = vadd.f32 1.0, %v10422_v49 }
 0x263   :  { %10427 = vrcp.f32 %v1844_v26 }
 0x264   :  { %10429 = vrcp.f32 %v1850_v54 }
 0x265   :  { %10431 = vpow2.f32 %v7956_v17 }
 0x268   :  { %v10424_v5 = vpop.eup %10423 }
 0x269   :  { %v10426_v6 = vpop.eup %10425  ;;  %v1857_v20 = vadd.f32 1.0, %v10424_v5 }
 0x26b   :  { %10433 = vrcp.f32 %v1857_v20 }
 0x26d   :  { %v10428_v53 = vpop.eup %10427 }
 0x26e   :  { %v10430_v27 = vpop.eup %10429  ;;  %v1861_v35 = vmul.f32 %v10428_v53, %v10426_v6 }
 0x26f   :  { %v1860_v21 = vmul.f32 %v10430_v27, %v11058_v41  ;;  %v10432_v55 = vpop.eup %10431 }
 0x270   :  { %v1549_v15 = vadd.f32 1.0, %v10432_v55 }
 0x271   :  { %v11210_v30 = vadd.f32 %v1861_v35, %v1860_v21 }
 0x273   :  { %10435 = vtanh.f32 %v11210_v30 }
 0x274   :  { %10437 = vtanh.f32 %v11201_v60 }
 0x275   :  { %v10434_v4 = vpop.eup %10433  ;;  %10439 = vrcp.f32 %v1549_v15 }
 0x27d   :  { %v10436_v56 = vpop.eup %10435 }
 0x27e   :  { %v11213_v52 = vmul.f32 %v10436_v56, %v10434_v4  ;;  %v10438_v41 = vpop.eup %10437 }
 0x27f   :  { %v10440_v14 = vpop.eup %10439 }
 0x280   :  { %8842 = vmatmul.mubr.msk.f32.vlgmr.msra.gmra.mrb[28].mxu0 %vm630_vm2, %v11213_v52  ;;  %8853 = vmatmul.mubr.msk.f32.vlgmr.msra.gmra.mrb[28].mxu1 %vm630_vm2, %v11213_v52  ;;  %v1556_v47 = vmul.f32 %v10440_v14, %v10438_v41 }
 0x281   :  { %9823 = vmatpush3.bf16.msra.mxu0 %v11061_v7  ;;  %9829 = vmatpush3.bf16.msra.mxu1 %v11063_v59 }
 0x282   :  { %9824 = vmatprep.subr.bf16.mxu0 %v11971_v58  ;;  %9830 = vmatprep.subr.bf16.mxu1 %v11971_v58 }
 0x283   :  { %8863 = vmatprep.mubr.msk.f32.mxu0 %vm10729_vm1, %v11972_v36  ;;  %8874 = vmatprep.mubr.msk.f32.mxu1 %vm10729_vm1, %v11972_v36 }
 0x285   :  { %9826 = vmatpush3.bf16.msra.mxu0 %v11073_v51  ;;  %9832 = vmatpush3.bf16.msra.mxu1 %v11075_v57 }
 0x286   :  { %9833 = vmatprep.subr.bf16.mxu0 %v11971_v58  ;;  %9839 = vmatprep.subr.bf16.mxu1 %v11971_v58 }
 0x288   :  { %8864 = vmatmul.mubr.msk.f32.vlgmr.msra.gmra.mrb[30].mxu0 %vm630_vm2, %v11213_v52  ;;  %8875 = vmatmul.mubr.msk.f32.vlgmr.msra.gmra.mrb[30].mxu1 %vm630_vm2, %v11213_v52 }
 0x289   :  { %9835 = vmatpush3.bf16.msra.mxu0 %v11085_v22  ;;  %9841 = vmatpush3.bf16.msra.mxu1 %v11087_v23 }
 0x28a   :  { %9836 = vmatprep.subr.bf16.mxu0 %v11971_v58  ;;  %9842 = vmatprep.subr.bf16.mxu1 %v11971_v58 }
 0x28b   :  { %8885 = vmatprep.mubr.msk.f32.mxu0 %vm10729_vm1, %v11972_v36  ;;  %8896 = vmatprep.mubr.msk.f32.mxu1 %vm10729_vm1, %v11972_v36 }
 0x28d   :  { %9838 = vmatpush3.bf16.msra.mxu0 %v11097_v8  ;;  %9844 = vmatpush3.bf16.msra.mxu1 %v11099_v43 }
 0x28e   :  { %9845 = vmatprep.subr.bf16.mxu0 %v11971_v58  ;;  %9851 = vmatprep.subr.bf16.mxu1 %v11971_v58 }
 0x290   :  { %8886 = vmatmul.mubr.msk.f32.vlgmr.msra.gmra.mrb[28].mxu0 %vm630_vm2, %v1556_v47  ;;  %8897 = vmatmul.mubr.msk.f32.vlgmr.msra.gmra.mrb[28].mxu1 %vm630_vm2, %v1556_v47 }
 0x291   :  { %9847 = vmatpush3.bf16.msra.mxu0 %v11109_v11  ;;  %9853 = vmatpush3.bf16.msra.mxu1 %v11111_v13 }
 0x292   :  { %9848 = vmatprep.subr.bf16.mxu0 %v11971_v58  ;;  %9854 = vmatprep.subr.bf16.mxu1 %v11971_v58 }
 0x293   :  { %8907 = vmatprep.mubr.msk.f32.mxu0 %vm10729_vm1, %v11972_v36  ;;  %8918 = vmatprep.mubr.msk.f32.mxu1 %vm10729_vm1, %v11972_v36 }
 0x295   :  { %9850 = vmatpush3.bf16.msra.mxu0 %v11119_v33  ;;  %9856 = vmatpush3.bf16.msra.mxu1 %v11121_v34 }
 0x296   :  { %9857 = vmatprep.subr.bf16.mxu0 %v11971_v58  ;;  %9863 = vmatprep.subr.bf16.mxu1 %v11971_v58 }
 0x298   :  { %8908 = vmatmul.mubr.msk.f32.vlgmr.msra.gmra.mrb[30].mxu0 %vm630_vm2, %v1556_v47  ;;  %8919 = vmatmul.mubr.msk.f32.vlgmr.msra.gmra.mrb[30].mxu1 %vm630_vm2, %v1556_v47 }
 0x299   :  { %9859 = vmatpush3.bf16.msra.mxu0 %v10892_v18  ;;  %9865 = vmatpush3.bf16.msra.mxu1 %v10894_v19 }
 0x29a   :  { %9860 = vmatprep.subr.bf16.mxu0 %v11971_v58  ;;  %9866 = vmatprep.subr.bf16.mxu1 %v11971_v58 }
 0x29b   :  { %8929 = vmatprep.mubr.msk.f32.mxu0 %vm10729_vm1, %v11972_v36  ;;  %8940 = vmatprep.mubr.msk.f32.mxu1 %vm10729_vm1, %v11972_v36 }
 0x29d   :  { %9862 = vmatpush3.bf16.msra.mxu0 %v10902_v24  ;;  %9868 = vmatpush3.bf16.msra.mxu1 %v10904_v25 }
 0x29e   :  { %9869 = vmatprep.subr.bf16.mxu0 %v11971_v58  ;;  %9875 = vmatprep.subr.bf16.mxu1 %v11971_v58 }
 0x2a0   :  { %8930 = vmatmul.mubr.msk.f32.vlgmr.msra.gmra.mrb[32].mxu0 %vm630_vm2, %v11213_v52  ;;  %8941 = vmatmul.mubr.msk.f32.vlgmr.msra.gmra.mrb[32].mxu1 %vm630_vm2, %v11213_v52 }
 0x2a1   :  { %9871 = vmatpush3.bf16.msra.mxu0 %v10926_v31  ;;  %9877 = vmatpush3.bf16.msra.mxu1 %v10928_v32 }
 0x2a2   :  { %9872 = vmatprep.subr.bf16.mxu0 %v11971_v58  ;;  %9878 = vmatprep.subr.bf16.mxu1 %v11971_v58 }
 0x2a3   :  { %8951 = vmatprep.mubr.msk.f32.mxu0 %vm10729_vm1, %v11972_v36  ;;  %8962 = vmatprep.mubr.msk.f32.mxu1 %vm10729_vm1, %v11972_v36 }
 0x2a5   :  { %9874 = vmatpush3.bf16.msra.mxu0 %v10934_v37  ;;  %9880 = vmatpush3.bf16.msra.mxu1 %v10936_v38 }
 0x2a6   :  { %9881 = vmatprep.subr.bf16.mxu0 %v11971_v58  ;;  %9887 = vmatprep.subr.bf16.mxu1 %v11971_v58 }
 0x2a8   :  { %8952 = vmatmul.mubr.msk.f32.vlgmr.msra.gmra.mrb[34].mxu0 %vm630_vm2, %v11213_v52  ;;  %8963 = vmatmul.mubr.msk.f32.vlgmr.msra.gmra.mrb[34].mxu1 %vm630_vm2, %v11213_v52 }
 0x2a9   :  { %9883 = vmatpush3.bf16.msra.mxu0 %v10954_v42  ;;  %9889 = vmatpush3.bf16.msra.mxu1 %v10956_v44 }
 0x2aa   :  { %9884 = vmatprep.subr.bf16.mxu0 %v11971_v58  ;;  %9890 = vmatprep.subr.bf16.mxu1 %v11971_v58 }
 0x2ab   :  { %8973 = vmatprep.mubr.msk.f32.mxu0 %vm10729_vm1, %v11972_v36  ;;  %8984 = vmatprep.mubr.msk.f32.mxu1 %vm10729_vm1, %v11972_v36 }
 0x2ad   :  { %9886 = vmatpush3.bf16.msra.mxu0 %v10962_v48  ;;  %9892 = vmatpush3.bf16.msra.mxu1 %v10964_v50 }
 0x2ae   :  { %9893 = vmatprep.subr.bf16.mxu0 %v11971_v58  ;;  %9899 = vmatprep.subr.bf16.mxu1 %v11971_v58 }
 0x363   :  { %v2217_v49 = vpop.f32.mrb[28].mxu0  ;;  %v2288_v26 = vpop.f32.mrb[28].mxu1 }
 0x364   :  { %v10293_v54 = vadd.f32 %v11182_v3, %v2217_v49  ;;  %v10294_v29 = vadd.f32 %v11187_v12, %v2288_v26  ;;  %v8887_v5 = vpop.f32.mrb[29].mxu0  ;;  %v8898_v6 = vpop.f32.mrb[29].mxu1 }
 0x366   :  { %v7972_v53 = vmul.f32 -1.442695, %v10293_v54  ;;  %v7973_v17 = vmul.f32 -1.442695, %v10294_v29 }
 0x368   :  { %10441 = vpow2.f32 %v7972_v53 }
 0x369   :  { %10443 = vpow2.f32 %v7973_v17 }
 0x36b   :  { %v2359_v27 = vpop.f32.mrb[30].mxu0  ;;  %v2430_v35 = vpop.f32.mrb[30].mxu1 }
 0x36c   :  { %v8909_v20 = vpop.f32.mrb[31].mxu0  ;;  %v8920_v21 = vpop.f32.mrb[31].mxu1  ;;  %v10295_v55 = vadd.f32 %v11194_v16, %v2359_v27 }
 0x36e   :  { %10445 = vtanh.f32 %v10295_v55 }
 0x372   :  { %v10442_v4 = vpop.eup %10441 }
 0x373   :  { %v10444_v56 = vpop.eup %10443  ;;  %v2438_v52 = vadd.f32 1.0, %v10442_v4  ;;  %v2525_v15 = vpop.f32.mrb[32].mxu0 }
 0x374   :  { %v2596_v41 = vpop.f32.mrb[32].mxu1  ;;  %v2444_v14 = vadd.f32 1.0, %v10444_v56  ;;  %v2529_v47 = vadd.f32 %v2525_v15, %v10993_v1  ;;  %v8931_v26 = vpop.f32.mrb[33].mxu0 }
 0x375   :  { %v2600_v49 = vadd.f32 %v2596_v41, %v10996_v2  ;;  %v8942_v54 = vpop.f32.mrb[33].mxu1  ;;  %10447 = vrcp.f32 %v2438_v52 }
 0x376   :  { %10449 = vrcp.f32 %v2444_v14  ;;  %v7979_v29 = vmul.f32 -1.442695, %v2529_v47 }
 0x377   :  { %v7980_v5 = vmul.f32 -1.442695, %v2600_v49 }
 0x378   :  { %10451 = vpow2.f32 %v7979_v29  ;;  %v10446_v55 = vpop.eup %10445 }
 0x379   :  { %10453 = vpow2.f32 %v7980_v5 }
 0x37b   :  { %v2667_v6 = vpop.f32.mrb[34].mxu0  ;;  %v2738_v53 = vpop.f32.mrb[34].mxu1 }
 0x37c   :  { %v2671_v17 = vadd.f32 %v2667_v6, %v11036_v45  ;;  %v2742_v27 = vadd.f32 %v2738_v53, %v11038_v46  ;;  %v8953_v20 = vpop.f32.mrb[35].mxu0  ;;  %v8964_v21 = vpop.f32.mrb[35].mxu1  ;;  %v10296_v45 = vadd.f32 %v11206_v28, %v2430_v35 }
 0x37e   :  { %v7981_v56 = vmul.f32 -1.442695, %v2742_v27  ;;  %v7974_v29 = vmul.f32 -1.442695, %v10296_v45 }
 0x37f   :  { %v10448_v1 = vpop.eup %10447 }
 0x380   :  { %v10450_v4 = vpop.eup %10449  ;;  %v2455_v2 = vmul.f32 %v10448_v1, %v10446_v55  ;;  %10455 = vpow2.f32 %v7981_v56 }
 0x381   :  { %v2454_v52 = vmul.f32 %v10450_v4, %v11201_v60  ;;  %10457 = vtanh.f32 %v2671_v17 }
 0x382   :  { %v10452_v15 = vpop.eup %10451 }
 0x383   :  { %v10454_v41 = vpop.eup %10453  ;;  %v11316_v14 = vadd.f32 %v2455_v2, %v2454_v52  ;;  %v2746_v47 = vadd.f32 1.0, %v10452_v15 }
 0x384   :  { %v2752_v49 = vadd.f32 1.0, %v10454_v41 }
 0x385   :  { %10459 = vrcp.f32 %v2746_v47 }
 0x386   :  { %10461 = vrcp.f32 %v2752_v49 }
 0x387   :  { %10463 = vpow2.f32 %v7974_v29 }
 0x38a   :  { %v10456_v46 = vpop.eup %10455 }
 0x38b   :  { %v10458_v26 = vpop.eup %10457  ;;  %v2759_v53 = vadd.f32 1.0, %v10456_v46 }
 0x38d   :  { %10465 = vrcp.f32 %v2759_v53 }
 0x38f   :  { %v10460_v54 = vpop.eup %10459 }
 0x390   :  { %v10462_v5 = vpop.eup %10461  ;;  %v2763_v6 = vmul.f32 %v10460_v54, %v10458_v26 }
 0x391   :  { %v2762_v60 = vmul.f32 %v10462_v5, %v11210_v30  ;;  %v10464_v17 = vpop.eup %10463 }
 0x392   :  { %v2451_v35 = vadd.f32 1.0, %v10464_v17 }
 0x393   :  { %v11320_v27 = vadd.f32 %v2763_v6, %v2762_v60 }
 0x395   :  { %10467 = vtanh.f32 %v11320_v27 }
 0x396   :  { %10469 = vtanh.f32 %v11316_v14 }
 0x397   :  { %v10466_v20 = vpop.eup %10465  ;;  %10471 = vrcp.f32 %v2451_v35 }
 0x39f   :  { %v10468_v21 = vpop.eup %10467 }
 0x3a0   :  { %v11323_v55 = vmul.f32 %v10468_v21, %v10466_v20  ;;  %v10470_v30 = vpop.eup %10469 }
 0x3a1   :  { %v10472_v1 = vpop.eup %10471 }
 0x3a2   :  { %8974 = vmatmul.mubr.msk.f32.vlgmr.msra.gmra.mrb[36].mxu0 %vm630_vm2, %v11323_v55  ;;  %8985 = vmatmul.mubr.msk.f32.vlgmr.msra.gmra.mrb[36].mxu1 %vm630_vm2, %v11323_v55  ;;  %v2458_v4 = vmul.f32 %v10472_v1, %v10470_v30 }
 0x3a3   :  { %9895 = vmatpush3.bf16.msra.mxu0 %v11061_v7  ;;  %9901 = vmatpush3.bf16.msra.mxu1 %v11063_v59 }
 0x3a4   :  { %9896 = vmatprep.subr.bf16.mxu0 %v11971_v58  ;;  %9902 = vmatprep.subr.bf16.mxu1 %v11971_v58 }
 0x3a5   :  { %8995 = vmatprep.mubr.msk.f32.mxu0 %vm10729_vm1, %v11972_v36  ;;  %9006 = vmatprep.mubr.msk.f32.mxu1 %vm10729_vm1, %v11972_v36 }
 0x3a7   :  { %9898 = vmatpush3.bf16.msra.mxu0 %v11073_v51  ;;  %9904 = vmatpush3.bf16.msra.mxu1 %v11075_v57 }
 0x3a8   :  { %9905 = vmatprep.subr.bf16.mxu0 %v11971_v58  ;;  %9911 = vmatprep.subr.bf16.mxu1 %v11971_v58 }
 0x3aa   :  { %8996 = vmatmul.mubr.msk.f32.vlgmr.msra.gmra.mrb[38].mxu0 %vm630_vm2, %v11323_v55  ;;  %9007 = vmatmul.mubr.msk.f32.vlgmr.msra.gmra.mrb[38].mxu1 %vm630_vm2, %v11323_v55 }
 0x3ab   :  { %9907 = vmatpush3.bf16.msra.mxu0 %v11085_v22  ;;  %9913 = vmatpush3.bf16.msra.mxu1 %v11087_v23 }
 0x3ac   :  { %9908 = vmatprep.subr.bf16.mxu0 %v11971_v58  ;;  %9914 = vmatprep.subr.bf16.mxu1 %v11971_v58 }
 0x3ad   :  { %9017 = vmatprep.mubr.msk.f32.mxu0 %vm10729_vm1, %v11972_v36  ;;  %9028 = vmatprep.mubr.msk.f32.mxu1 %vm10729_vm1, %v11972_v36 }
 0x3af   :  { %9910 = vmatpush3.bf16.msra.mxu0 %v11097_v8  ;;  %9916 = vmatpush3.bf16.msra.mxu1 %v11099_v43 }
 0x3b0   :  { %9917 = vmatprep.subr.bf16.mxu0 %v11971_v58  ;;  %9923 = vmatprep.subr.bf16.mxu1 %v11971_v58 }
 0x3b2   :  { %9018 = vmatmul.mubr.msk.f32.vlgmr.msra.gmra.mrb[36].mxu0 %vm630_vm2, %v2458_v4  ;;  %9029 = vmatmul.mubr.msk.f32.vlgmr.msra.gmra.mrb[36].mxu1 %vm630_vm2, %v2458_v4 }
 0x3b3   :  { %9919 = vmatpush3.bf16.msra.mxu0 %v11109_v11  ;;  %9925 = vmatpush3.bf16.msra.mxu1 %v11111_v13 }
 0x3b4   :  { %9920 = vmatprep.subr.bf16.mxu0 %v11971_v58  ;;  %9926 = vmatprep.subr.bf16.mxu1 %v11971_v58 }
 0x3b5   :  { %9039 = vmatprep.mubr.msk.f32.mxu0 %vm10729_vm1, %v11972_v36  ;;  %9050 = vmatprep.mubr.msk.f32.mxu1 %vm10729_vm1, %v11972_v36 }
 0x3b7   :  { %9922 = vmatpush3.bf16.msra.mxu0 %v11119_v33  ;;  %9928 = vmatpush3.bf16.msra.mxu1 %v11121_v34 }
 0x3b8   :  { %9929 = vmatprep.subr.bf16.mxu0 %v11971_v58  ;;  %9935 = vmatprep.subr.bf16.mxu1 %v11971_v58 }
 0x3ba   :  { %9040 = vmatmul.mubr.msk.f32.vlgmr.msra.gmra.mrb[38].mxu0 %vm630_vm2, %v2458_v4  ;;  %9051 = vmatmul.mubr.msk.f32.vlgmr.msra.gmra.mrb[38].mxu1 %vm630_vm2, %v2458_v4 }
 0x3bb   :  { %9931 = vmatpush3.bf16.msra.mxu0 %v10892_v18  ;;  %9937 = vmatpush3.bf16.msra.mxu1 %v10894_v19 }
 0x3bc   :  { %9932 = vmatprep.subr.bf16.mxu0 %v11971_v58  ;;  %9938 = vmatprep.subr.bf16.mxu1 %v11971_v58 }
 0x3bd   :  { %9061 = vmatprep.mubr.msk.f32.mxu0 %vm10729_vm1, %v11972_v36  ;;  %9072 = vmatprep.mubr.msk.f32.mxu1 %vm10729_vm1, %v11972_v36 }
 0x3bf   :  { %9934 = vmatpush3.bf16.msra.mxu0 %v10902_v24  ;;  %9940 = vmatpush3.bf16.msra.mxu1 %v10904_v25 }
 0x3c0   :  { %9941 = vmatprep.subr.bf16.mxu0 %v11971_v58  ;;  %9947 = vmatprep.subr.bf16.mxu1 %v11971_v58 }
 0x3c2   :  { %9062 = vmatmul.mubr.msk.f32.vlgmr.msra.gmra.mrb[40].mxu0 %vm630_vm2, %v11323_v55  ;;  %9073 = vmatmul.mubr.msk.f32.vlgmr.msra.gmra.mrb[40].mxu1 %vm630_vm2, %v11323_v55 }
 0x3c3   :  { %9943 = vmatpush3.bf16.msra.mxu0 %v10926_v31  ;;  %9949 = vmatpush3.bf16.msra.mxu1 %v10928_v32 }
 0x3c4   :  { %9944 = vmatprep.subr.bf16.mxu0 %v11971_v58  ;;  %9950 = vmatprep.subr.bf16.mxu1 %v11971_v58 }
 0x3c5   :  { %9083 = vmatprep.mubr.msk.f32.mxu0 %vm10729_vm1, %v11972_v36  ;;  %9094 = vmatprep.mubr.msk.f32.mxu1 %vm10729_vm1, %v11972_v36 }
 0x3c7   :  { %9946 = vmatpush3.bf16.msra.mxu0 %v10934_v37  ;;  %9952 = vmatpush3.bf16.msra.mxu1 %v10936_v38 }
 0x3c8   :  { %9953 = vmatprep.subr.bf16.mxu0 %v11971_v58  ;;  %9959 = vmatprep.subr.bf16.mxu1 %v11971_v58 }
 0x3ca   :  { %9084 = vmatmul.mubr.msk.f32.vlgmr.msra.gmra.mrb[42].mxu0 %vm630_vm2, %v11323_v55  ;;  %9095 = vmatmul.mubr.msk.f32.vlgmr.msra.gmra.mrb[42].mxu1 %vm630_vm2, %v11323_v55 }
 0x3cb   :  { %9955 = vmatpush3.bf16.msra.mxu0 %v10954_v42  ;;  %9961 = vmatpush3.bf16.msra.mxu1 %v10956_v44 }
 0x3cc   :  { %9956 = vmatprep.subr.bf16.mxu0 %v11971_v58  ;;  %9962 = vmatprep.subr.bf16.mxu1 %v11971_v58 }
 0x3cd   :  { %9105 = vmatprep.mubr.msk.f32.mxu0 %vm10729_vm1, %v11972_v36  ;;  %9116 = vmatprep.mubr.msk.f32.mxu1 %vm10729_vm1, %v11972_v36 }
 0x3cf   :  { %9958 = vmatpush3.bf16.msra.mxu0 %v10962_v48  ;;  %9964 = vmatpush3.bf16.msra.mxu1 %v10964_v50 }
 0x3d0   :  { %9965 = vmatprep.subr.bf16.mxu0 %v11971_v58  ;;  %9971 = vmatprep.subr.bf16.mxu1 %v11971_v58 }
 0x485   :  { %v3119_v2 = vpop.f32.mrb[36].mxu0  ;;  %v3190_v56 = vpop.f32.mrb[36].mxu1 }
 0x486   :  { %v10297_v52 = vadd.f32 %v11182_v3, %v3119_v2  ;;  %v10298_v15 = vadd.f32 %v11187_v12, %v3190_v56  ;;  %v9019_v41 = vpop.f32.mrb[37].mxu0  ;;  %v9030_v47 = vpop.f32.mrb[37].mxu1 }
 0x488   :  { %v7990_v49 = vmul.f32 -1.442695, %v10297_v52  ;;  %v7991_v45 = vmul.f32 -1.442695, %v10298_v15 }
 0x48a   :  { %10473 = vpow2.f32 %v7990_v49 }
 0x48b   :  { %10475 = vpow2.f32 %v7991_v45 }
 0x48d   :  { %v3261_v46 = vpop.f32.mrb[38].mxu0  ;;  %v3332_v26 = vpop.f32.mrb[38].mxu1 }
 0x48e   :  { %v9041_v54 = vpop.f32.mrb[39].mxu0  ;;  %v9052_v29 = vpop.f32.mrb[39].mxu1  ;;  %v10299_v5 = vadd.f32 %v11194_v16, %v3261_v46 }
 0x490   :  { %10477 = vtanh.f32 %v10299_v5 }
 0x494   :  { %v10474_v6 = vpop.eup %10473 }
 0x495   :  { %v10476_v53 = vpop.eup %10475  ;;  %v3340_v60 = vadd.f32 1.0, %v10474_v6  ;;  %v3427_v17 = vpop.f32.mrb[40].mxu0 }
 0x496   :  { %v3498_v20 = vpop.f32.mrb[40].mxu1  ;;  %v3346_v21 = vadd.f32 1.0, %v10476_v53  ;;  %v3431_v55 = vadd.f32 %v3427_v17, %v10987_v61  ;;  %v9063_v30 = vpop.f32.mrb[41].mxu0 }
 0x497   :  { %v3502_v35 = vadd.f32 %v3498_v20, %v10990_v62  ;;  %v9074_v1 = vpop.f32.mrb[41].mxu1  ;;  %10479 = vrcp.f32 %v3340_v60 }
 0x498   :  { %10481 = vrcp.f32 %v3346_v21  ;;  %v7997_v4 = vmul.f32 -1.442695, %v3431_v55 }
 0x499   :  { %v7998_v2 = vmul.f32 -1.442695, %v3502_v35 }
 0x49a   :  { %10483 = vpow2.f32 %v7997_v4  ;;  %v10478_v45 = vpop.eup %10477 }
 0x49b   :  { %10485 = vpow2.f32 %v7998_v2 }
 0x49d   :  { %v3569_v56 = vpop.f32.mrb[42].mxu0  ;;  %v3640_v52 = vpop.f32.mrb[42].mxu1 }
 0x49e   :  { %v3573_v15 = vadd.f32 %v3569_v56, %v11032_v39  ;;  %v3644_v41 = vadd.f32 %v3640_v52, %v11034_v40  ;;  %v9085_v47 = vpop.f32.mrb[43].mxu0  ;;  %v9096_v49 = vpop.f32.mrb[43].mxu1  ;;  %v10300_v39 = vadd.f32 %v11206_v28, %v3332_v26 }
 0x4a0   :  { %v7999_v54 = vmul.f32 -1.442695, %v3644_v41  ;;  %v7992_v55 = vmul.f32 -1.442695, %v10300_v39 }
 0x4a1   :  { %v10480_v61 = vpop.eup %10479 }
 0x4a2   :  { %v10482_v46 = vpop.eup %10481  ;;  %v3357_v62 = vmul.f32 %v10480_v61, %v10478_v45  ;;  %10487 = vpow2.f32 %v7999_v54 }
 0x4a3   :  { %v3356_v29 = vmul.f32 %v10482_v46, %v11316_v14  ;;  %10489 = vtanh.f32 %v3573_v15 }
 0x4a4   :  { %v10484_v5 = vpop.eup %10483 }
 0x4a5   :  { %v10486_v6 = vpop.eup %10485  ;;  %v11426_v53 = vadd.f32 %v3357_v62, %v3356_v29  ;;  %v3648_v60 = vadd.f32 1.0, %v10484_v5 }
 0x4a6   :  { %v3654_v17 = vadd.f32 1.0, %v10486_v6 }
 0x4a7   :  { %10491 = vrcp.f32 %v3648_v60 }
 0x4a8   :  { %10493 = vrcp.f32 %v3654_v17 }
 0x4a9   :  { %10495 = vpow2.f32 %v7992_v55 }
 0x4ac   :  { %v10488_v40 = vpop.eup %10487 }
 0x4ad   :  { %v10490_v20 = vpop.eup %10489  ;;  %v3661_v1 = vadd.f32 1.0, %v10488_v40 }
 0x4af   :  { %10497 = vrcp.f32 %v3661_v1 }
 0x4b1   :  { %v10492_v21 = vpop.eup %10491 }
 0x4b2   :  { %v10494_v35 = vpop.eup %10493  ;;  %v3665_v30 = vmul.f32 %v10492_v21, %v10490_v20 }
 0x4b3   :  { %v3664_v14 = vmul.f32 %v10494_v35, %v11320_v27  ;;  %v10496_v2 = vpop.eup %10495 }
 0x4b4   :  { %v3353_v26 = vadd.f32 1.0, %v10496_v2 }
 0x4b5   :  { %v11430_v4 = vadd.f32 %v3665_v30, %v3664_v14 }
 0x4b7   :  { %10499 = vtanh.f32 %v11430_v4 }
 0x4b8   :  { %10501 = vtanh.f32 %v11426_v53 }
 0x4b9   :  { %v10498_v56 = vpop.eup %10497  ;;  %10503 = vrcp.f32 %v3353_v26 }
 0x4c1   :  { %v10500_v52 = vpop.eup %10499 }
 0x4c2   :  { %v11433_v15 = vmul.f32 %v10500_v52, %v10498_v56  ;;  %v10502_v27 = vpop.eup %10501 }
 0x4c3   :  { %v10504_v41 = vpop.eup %10503 }
 0x4c4   :  { %9106 = vmatmul.mubr.msk.f32.vlgmr.msra.gmra.mrb[44].mxu0 %vm630_vm2, %v11433_v15  ;;  %9117 = vmatmul.mubr.msk.f32.vlgmr.msra.gmra.mrb[44].mxu1 %vm630_vm2, %v11433_v15  ;;  %v3360_v47 = vmul.f32 %v10504_v41, %v10502_v27 }
 0x4c5   :  { %9967 = vmatpush3.bf16.msra.mxu0 %v11061_v7  ;;  %9973 = vmatpush3.bf16.msra.mxu1 %v11063_v59 }
 0x4c6   :  { %9968 = vmatprep.subr.bf16.mxu0 %v11971_v58  ;;  %9974 = vmatprep.subr.bf16.mxu1 %v11971_v58 }
 0x4c7   :  { %9127 = vmatprep.mubr.msk.f32.mxu0 %vm10729_vm1, %v11972_v36  ;;  %9138 = vmatprep.mubr.msk.f32.mxu1 %vm10729_vm1, %v11972_v36 }
 0x4c9   :  { %9970 = vmatpush3.bf16.msra.mxu0 %v11073_v51  ;;  %9976 = vmatpush3.bf16.msra.mxu1 %v11075_v57 }
 0x4ca   :  { %9977 = vmatprep.subr.bf16.mxu0 %v11971_v58  ;;  %9983 = vmatprep.subr.bf16.mxu1 %v11971_v58 }
 0x4cc   :  { %9128 = vmatmul.mubr.msk.f32.vlgmr.msra.gmra.mrb[46].mxu0 %vm630_vm2, %v11433_v15  ;;  %9139 = vmatmul.mubr.msk.f32.vlgmr.msra.gmra.mrb[46].mxu1 %vm630_vm2, %v11433_v15 }
 0x4cd   :  { %9979 = vmatpush3.bf16.msra.mxu0 %v11085_v22  ;;  %9985 = vmatpush3.bf16.msra.mxu1 %v11087_v23 }
 0x4ce   :  { %9980 = vmatprep.subr.bf16.mxu0 %v11971_v58  ;;  %9986 = vmatprep.subr.bf16.mxu1 %v11971_v58 }
 0x4cf   :  { %9149 = vmatprep.mubr.msk.f32.mxu0 %vm10729_vm1, %v11972_v36  ;;  %9160 = vmatprep.mubr.msk.f32.mxu1 %vm10729_vm1, %v11972_v36 }
 0x4d1   :  { %9982 = vmatpush3.bf16.msra.mxu0 %v11097_v8  ;;  %9988 = vmatpush3.bf16.msra.mxu1 %v11099_v43 }
 0x4d2   :  { %9989 = vmatprep.subr.bf16.mxu0 %v11971_v58  ;;  %9995 = vmatprep.subr.bf16.mxu1 %v11971_v58 }
 0x4d4   :  { %9150 = vmatmul.mubr.msk.f32.vlgmr.msra.gmra.mrb[44].mxu0 %vm630_vm2, %v3360_v47  ;;  %9161 = vmatmul.mubr.msk.f32.vlgmr.msra.gmra.mrb[44].mxu1 %vm630_vm2, %v3360_v47 }
 0x4d5   :  { %9991 = vmatpush3.bf16.msra.mxu0 %v11109_v11  ;;  %9997 = vmatpush3.bf16.msra.mxu1 %v11111_v13 }
 0x4d6   :  { %9992 = vmatprep.subr.bf16.mxu0 %v11971_v58  ;;  %9998 = vmatprep.subr.bf16.mxu1 %v11971_v58 }
 0x4d7   :  { %9171 = vmatprep.mubr.msk.f32.mxu0 %vm10729_vm1, %v11972_v36  ;;  %9182 = vmatprep.mubr.msk.f32.mxu1 %vm10729_vm1, %v11972_v36 }
 0x4d9   :  { %9994 = vmatpush3.bf16.msra.mxu0 %v11119_v33  ;;  %10000 = vmatpush3.bf16.msra.mxu1 %v11121_v34 }
 0x4da   :  { %10001 = vmatprep.subr.bf16.mxu0 %v11971_v58  ;;  %10007 = vmatprep.subr.bf16.mxu1 %v11971_v58 }
 0x4dc   :  { %9172 = vmatmul.mubr.msk.f32.vlgmr.msra.gmra.mrb[46].mxu0 %vm630_vm2, %v3360_v47  ;;  %9183 = vmatmul.mubr.msk.f32.vlgmr.msra.gmra.mrb[46].mxu1 %vm630_vm2, %v3360_v47 }
 0x4dd   :  { %10003 = vmatpush3.bf16.msra.mxu0 %v10892_v18  ;;  %10009 = vmatpush3.bf16.msra.mxu1 %v10894_v19 }
 0x4de   :  { %10004 = vmatprep.subr.bf16.mxu0 %v11971_v58  ;;  %10010 = vmatprep.subr.bf16.mxu1 %v11971_v58 }
 0x4df   :  { %9193 = vmatprep.mubr.msk.f32.mxu0 %vm10729_vm1, %v11972_v36  ;;  %9204 = vmatprep.mubr.msk.f32.mxu1 %vm10729_vm1, %v11972_v36 }
 0x4e1   :  { %10006 = vmatpush3.bf16.msra.mxu0 %v10902_v24  ;;  %10012 = vmatpush3.bf16.msra.mxu1 %v10904_v25 }
 0x4e2   :  { %10013 = vmatprep.subr.bf16.mxu0 %v11971_v58  ;;  %10019 = vmatprep.subr.bf16.mxu1 %v11971_v58 }
 0x4e4   :  { %9194 = vmatmul.mubr.msk.f32.vlgmr.msra.gmra.mrb[48].mxu0 %vm630_vm2, %v11433_v15  ;;  %9205 = vmatmul.mubr.msk.f32.vlgmr.msra.gmra.mrb[48].mxu1 %vm630_vm2, %v11433_v15 }
 0x4e5   :  { %10015 = vmatpush3.bf16.msra.mxu0 %v10926_v31  ;;  %10021 = vmatpush3.bf16.msra.mxu1 %v10928_v32 }
 0x4e6   :  { %10016 = vmatprep.subr.bf16.mxu0 %v11971_v58  ;;  %10022 = vmatprep.subr.bf16.mxu1 %v11971_v58 }
 0x4e7   :  { %9215 = vmatprep.mubr.msk.f32.mxu0 %vm10729_vm1, %v11972_v36  ;;  %9226 = vmatprep.mubr.msk.f32.mxu1 %vm10729_vm1, %v11972_v36 }
 0x4e9   :  { %10018 = vmatpush3.bf16.msra.mxu0 %v10934_v37  ;;  %10024 = vmatpush3.bf16.msra.mxu1 %v10936_v38 }
 0x4ea   :  { %10025 = vmatprep.subr.bf16.mxu0 %v11971_v58  ;;  %10031 = vmatprep.subr.bf16.mxu1 %v11971_v58 }
 0x4ec   :  { %9216 = vmatmul.mubr.msk.f32.vlgmr.msra.gmra.mrb[50].mxu0 %vm630_vm2, %v11433_v15  ;;  %9227 = vmatmul.mubr.msk.f32.vlgmr.msra.gmra.mrb[50].mxu1 %vm630_vm2, %v11433_v15 }
 0x4ed   :  { %10027 = vmatpush3.bf16.msra.mxu0 %v10954_v42  ;;  %10033 = vmatpush3.bf16.msra.mxu1 %v10956_v44 }
 0x4ee   :  { %10028 = vmatprep.subr.bf16.mxu0 %v11971_v58  ;;  %10034 = vmatprep.subr.bf16.mxu1 %v11971_v58 }
 0x4ef   :  { %9237 = vmatprep.mubr.msk.f32.mxu0 %vm10729_vm1, %v11972_v36  ;;  %9248 = vmatprep.mubr.msk.f32.mxu1 %vm10729_vm1, %v11972_v36 }
 0x4f1   :  { %10030 = vmatpush3.bf16.msra.mxu0 %v10962_v48  ;;  %10036 = vmatpush3.bf16.msra.mxu1 %v10964_v50 }
 0x4f2   :  { %10037 = vmatprep.subr.bf16.mxu0 %v11971_v58  ;;  %10043 = vmatprep.subr.bf16.mxu1 %v11971_v58 }
 0x5a7   :  { %v4021_v49 = vpop.f32.mrb[44].mxu0  ;;  %v4092_v45 = vpop.f32.mrb[44].mxu1 }
 0x5a8   :  { %v10301_v61 = vadd.f32 %v11182_v3, %v4021_v49  ;;  %v10302_v46 = vadd.f32 %v11187_v12, %v4092_v45  ;;  %v9151_v62 = vpop.f32.mrb[45].mxu0  ;;  %v9162_v54 = vpop.f32.mrb[45].mxu1 }
 0x5aa   :  { %v8008_v29 = vmul.f32 -1.442695, %v10301_v61  ;;  %v8009_v5 = vmul.f32 -1.442695, %v10302_v46 }
 0x5ac   :  { %10505 = vpow2.f32 %v8008_v29 }
 0x5ad   :  { %10507 = vpow2.f32 %v8009_v5 }
 0x5af   :  { %v4163_v6 = vpop.f32.mrb[46].mxu0  ;;  %v4234_v60 = vpop.f32.mrb[46].mxu1 }
 0x5b0   :  { %v9173_v17 = vpop.f32.mrb[47].mxu0  ;;  %v9184_v39 = vpop.f32.mrb[47].mxu1  ;;  %v10303_v40 = vadd.f32 %v11194_v16, %v4163_v6 }
 0x5b2   :  { %10509 = vtanh.f32 %v10303_v40 }
 0x5b6   :  { %v10506_v20 = vpop.eup %10505 }
 0x5b7   :  { %v10508_v21 = vpop.eup %10507  ;;  %v4242_v55 = vadd.f32 1.0, %v10506_v20  ;;  %v4329_v35 = vpop.f32.mrb[48].mxu0 }
 0x5b8   :  { %v4400_v30 = vpop.f32.mrb[48].mxu1  ;;  %v4248_v3 = vadd.f32 1.0, %v10508_v21  ;;  %v4333_v12 = vadd.f32 %v4329_v35, %v11005_v9  ;;  %v9195_v14 = vpop.f32.mrb[49].mxu0 }
 0x5b9   :  { %v4404_v1 = vadd.f32 %v4400_v30, %v11008_v10  ;;  %v9206_v2 = vpop.f32.mrb[49].mxu1  ;;  %10511 = vrcp.f32 %v4242_v55 }
 0x5ba   :  { %10513 = vrcp.f32 %v4248_v3  ;;  %v8015_v56 = vmul.f32 -1.442695, %v4333_v12 }
 0x5bb   :  { %v8016_v52 = vmul.f32 -1.442695, %v4404_v1 }
 0x5bc   :  { %10515 = vpow2.f32 %v8015_v56  ;;  %v10510_v49 = vpop.eup %10509 }
 0x5bd   :  { %10517 = vpow2.f32 %v8016_v52  ;;  %v11641_v52 = vld [vmem:[%s11951_s6] ss:$0 sm:$0xff] }
 0x5bf   :  { %v4471_v16 = vpop.f32.mrb[50].mxu0  ;;  %v4542_v15 = vpop.f32.mrb[50].mxu1 }
 0x5c0   :  { %v4475_v26 = vadd.f32 %v4471_v16, %v11044_v63  ;;  %v4546_v27 = vadd.f32 %v4542_v15, %v11046_v0  ;;  %v9217_v41 = vpop.f32.mrb[51].mxu0  ;;  %v9228_v47 = vpop.f32.mrb[51].mxu1  ;;  %v10304_v63 = vadd.f32 %v11206_v28, %v4234_v60  ;;  %v11647_v15 = vld [vmem:[%s11951_s6 + $0x1] ss:$0 sm:$0xff] }
 0x5c2   :  { %v8017_v61 = vmul.f32 -1.442695, %v4546_v27  ;;  %v8010_v40 = vmul.f32 -1.442695, %v10304_v63 }
 0x5c3   :  { %v10512_v9 = vpop.eup %10511 }
 0x5c4   :  { %v10514_v45 = vpop.eup %10513  ;;  %v4259_v10 = vmul.f32 %v10512_v9, %v10510_v49  ;;  %10519 = vpow2.f32 %v8017_v61 }
 0x5c5   :  { %v4258_v46 = vmul.f32 %v10514_v45, %v11426_v53  ;;  %10521 = vtanh.f32 %v4475_v26 }
 0x5c6   :  { %v10516_v62 = vpop.eup %10515 }
 0x5c7   :  { %v10518_v54 = vpop.eup %10517  ;;  %v11536_v29 = vadd.f32 %v4259_v10, %v4258_v46  ;;  %v4550_v5 = vadd.f32 1.0, %v10516_v62  ;;  %v11653_v46 = vld [vmem:[%s11951_s6 + $0x2] ss:$0 sm:$0xff] }
 0x5c8   :  { %v4556_v6 = vadd.f32 1.0, %v10518_v54 }
 0x5c9   :  { %10523 = vrcp.f32 %v4550_v5 }
 0x5ca   :  { %10525 = vrcp.f32 %v4556_v6 }
 0x5cb   :  { %10527 = vpow2.f32 %v8010_v40 }
 0x5ce   :  { %v10520_v0 = vpop.eup %10519 }
 0x5cf   :  { %v10522_v17 = vpop.eup %10521  ;;  %v4563_v55 = vadd.f32 1.0, %v10520_v0 }
 0x5d1   :  { %10529 = vrcp.f32 %v4563_v55 }
 0x5d3   :  { %v10524_v39 = vpop.eup %10523 }
 0x5d4   :  { %v10526_v20 = vpop.eup %10525  ;;  %v4567_v21 = vmul.f32 %v10524_v39, %v10522_v17  ;;  %v11973_v39 = vld [vmem:[#allocation10_spill] sm:$0xff] }
 0x5d5   :  { %v4566_v53 = vmul.f32 %v10526_v20, %v11430_v4  ;;  %v10528_v30 = vpop.eup %10527  ;;  %v11974_v20 = vld [vmem:[#allocation11_spill] sm:$0xff] }
 0x5d6   :  { %v4255_v28 = vadd.f32 1.0, %v10528_v30 }
 0x5d7   :  { %v11540_v35 = vadd.f32 %v4567_v21, %v4566_v53 }
 0x5d9   :  { %10531 = vtanh.f32 %v11540_v35 }
 0x5da   :  { %10533 = vtanh.f32 %v11536_v29 }
 0x5db   :  { %v10530_v3 = vpop.eup %10529  ;;  %10535 = vrcp.f32 %v4255_v28  ;;  %v11975_v28 = vld [vmem:[#allocation16_spill] sm:$0xff] }
 0x5e3   :  { %v10532_v12 = vpop.eup %10531 }
 0x5e4   :  { %v11543_v1 = vmul.f32 %v10532_v12, %v10530_v3  ;;  %v10534_v4 = vpop.eup %10533 }
 0x5e5   :  { %v10536_v60 = vpop.eup %10535 }
 0x5e6   :  { %9238 = vmatmul.mubr.msk.f32.vlgmr.msra.gmra.mrb[52].mxu0 %vm630_vm2, %v11543_v1  ;;  %9249 = vmatmul.mubr.msk.f32.vlgmr.msra.gmra.mrb[52].mxu1 %vm630_vm2, %v11543_v1  ;;  %v4262_v14 = vmul.f32 %v10536_v60, %v10534_v4  ;;  %v11976_v60 = vld [vmem:[#allocation17_spill] sm:$0xff] }
 0x5e7   :  { %10039 = vmatpush3.bf16.msra.mxu0 %v11061_v7  ;;  %10045 = vmatpush3.bf16.msra.mxu1 %v11063_v59 }
 0x5e8   :  { %10040 = vmatprep.subr.bf16.mxu0 %v11971_v58  ;;  %10046 = vmatprep.subr.bf16.mxu1 %v11971_v58 }
 0x5e9   :  { %9259 = vmatprep.mubr.msk.f32.mxu0 %vm10729_vm1, %v11972_v36  ;;  %9270 = vmatprep.mubr.msk.f32.mxu1 %vm10729_vm1, %v11972_v36 }
 0x5eb   :  { %10042 = vmatpush3.bf16.msra.mxu0 %v11073_v51  ;;  %10048 = vmatpush3.bf16.msra.mxu1 %v11075_v57 }
 0x5ec   :  { %10049 = vmatprep.subr.bf16.mxu0 %v11971_v58  ;;  %10055 = vmatprep.subr.bf16.mxu1 %v11971_v58 }
 0x5ee   :  { %9260 = vmatmul.mubr.msk.f32.vlgmr.msra.gmra.mrb[54].mxu0 %vm630_vm2, %v11543_v1  ;;  %9271 = vmatmul.mubr.msk.f32.vlgmr.msra.gmra.mrb[54].mxu1 %vm630_vm2, %v11543_v1 }
 0x5ef   :  { %10051 = vmatpush3.bf16.msra.mxu0 %v11085_v22  ;;  %10057 = vmatpush3.bf16.msra.mxu1 %v11087_v23 }
 0x5f0   :  { %10052 = vmatprep.subr.bf16.mxu0 %v11971_v58  ;;  %10058 = vmatprep.subr.bf16.mxu1 %v11971_v58 }
 0x5f1   :  { %9281 = vmatprep.mubr.msk.f32.mxu0 %vm10729_vm1, %v11972_v36  ;;  %9292 = vmatprep.mubr.msk.f32.mxu1 %vm10729_vm1, %v11972_v36 }
 0x5f3   :  { %10054 = vmatpush3.bf16.msra.mxu0 %v11097_v8  ;;  %10060 = vmatpush3.bf16.msra.mxu1 %v11099_v43 }
 0x5f4   :  { %10061 = vmatprep.subr.bf16.mxu0 %v11971_v58  ;;  %10067 = vmatprep.subr.bf16.mxu1 %v11971_v58 }
 0x5f6   :  { %9282 = vmatmul.mubr.msk.f32.vlgmr.msra.gmra.mrb[52].mxu0 %vm630_vm2, %v4262_v14  ;;  %9293 = vmatmul.mubr.msk.f32.vlgmr.msra.gmra.mrb[52].mxu1 %vm630_vm2, %v4262_v14 }
 0x5f7   :  { %10063 = vmatpush3.bf16.msra.mxu0 %v11109_v11  ;;  %10069 = vmatpush3.bf16.msra.mxu1 %v11111_v13 }
 0x5f8   :  { %10064 = vmatprep.subr.bf16.mxu0 %v11971_v58  ;;  %10070 = vmatprep.subr.bf16.mxu1 %v11971_v58 }
 0x5f9   :  { %9303 = vmatprep.mubr.msk.f32.mxu0 %vm10729_vm1, %v11972_v36  ;;  %9314 = vmatprep.mubr.msk.f32.mxu1 %vm10729_vm1, %v11972_v36 }
 0x5fb   :  { %10066 = vmatpush3.bf16.msra.mxu0 %v11119_v33  ;;  %10072 = vmatpush3.bf16.msra.mxu1 %v11121_v34 }
 0x5fc   :  { %10073 = vmatprep.subr.bf16.mxu0 %v11971_v58  ;;  %10079 = vmatprep.subr.bf16.mxu1 %v11971_v58 }
 0x5fe   :  { %9304 = vmatmul.mubr.msk.f32.vlgmr.msra.gmra.mrb[54].mxu0 %vm630_vm2, %v4262_v14  ;;  %9315 = vmatmul.mubr.msk.f32.vlgmr.msra.gmra.mrb[54].mxu1 %vm630_vm2, %v4262_v14 }
 0x5ff   :  { %10075 = vmatpush3.bf16.msra.mxu0 %v10892_v18  ;;  %10081 = vmatpush3.bf16.msra.mxu1 %v10894_v19 }
 0x600   :  { %10076 = vmatprep.subr.bf16.mxu0 %v11971_v58  ;;  %10082 = vmatprep.subr.bf16.mxu1 %v11971_v58 }
 0x601   :  { %9325 = vmatprep.mubr.msk.f32.mxu0 %vm10729_vm1, %v11972_v36  ;;  %9336 = vmatprep.mubr.msk.f32.mxu1 %vm10729_vm1, %v11972_v36 }
 0x603   :  { %10078 = vmatpush3.bf16.msra.mxu0 %v10902_v24  ;;  %10084 = vmatpush3.bf16.msra.mxu1 %v10904_v25 }
 0x604   :  { %10085 = vmatprep.subr.bf16.mxu0 %v11971_v58  ;;  %10091 = vmatprep.subr.bf16.mxu1 %v11971_v58 }
 0x606   :  { %9326 = vmatmul.mubr.msk.f32.vlgmr.msra.gmra.mrb[56].mxu0 %vm630_vm2, %v11543_v1  ;;  %9337 = vmatmul.mubr.msk.f32.vlgmr.msra.gmra.mrb[56].mxu1 %vm630_vm2, %v11543_v1 }
 0x607   :  { %10087 = vmatpush3.bf16.msra.mxu0 %v10926_v31  ;;  %10093 = vmatpush3.bf16.msra.mxu1 %v10928_v32 }
 0x608   :  { %10088 = vmatprep.subr.bf16.mxu0 %v11971_v58  ;;  %10094 = vmatprep.subr.bf16.mxu1 %v11971_v58 }
 0x609   :  { %9347 = vmatprep.mubr.msk.f32.mxu0 %vm10729_vm1, %v11972_v36  ;;  %9358 = vmatprep.mubr.msk.f32.mxu1 %vm10729_vm1, %v11972_v36 }
 0x60b   :  { %10090 = vmatpush3.bf16.msra.mxu0 %v10934_v37  ;;  %10096 = vmatpush3.bf16.msra.mxu1 %v10936_v38 }
 0x60c   :  { %10097 = vmatprep.subr.bf16.mxu0 %v11971_v58  ;;  %10103 = vmatprep.subr.bf16.mxu1 %v11971_v58 }
 0x60e   :  { %9348 = vmatmul.mubr.msk.f32.vlgmr.msra.gmra.mrb[58].mxu0 %vm630_vm2, %v11543_v1  ;;  %9359 = vmatmul.mubr.msk.f32.vlgmr.msra.gmra.mrb[58].mxu1 %vm630_vm2, %v11543_v1 }
 0x60f   :  { %10099 = vmatpush3.bf16.msra.mxu0 %v10954_v42  ;;  %10105 = vmatpush3.bf16.msra.mxu1 %v10956_v44 }
 0x610   :  { %10100 = vmatprep.subr.bf16.mxu0 %v11971_v58  ;;  %10106 = vmatprep.subr.bf16.mxu1 %v11971_v58 }
 0x611   :  { %9369 = vmatprep.mubr.msk.f32.mxu0 %vm10729_vm1, %v11972_v36  ;;  %9380 = vmatprep.mubr.msk.f32.mxu1 %vm10729_vm1, %v11972_v36 }
 0x613   :  { %10102 = vmatpush3.bf16.msra.mxu0 %v10962_v48  ;;  %10108 = vmatpush3.bf16.msra.mxu1 %v10964_v50 }
 0x614   :  { %10109 = vmatprep.subr.bf16.mxu0 %v11971_v58  ;;  %10115 = vmatprep.subr.bf16.mxu1 %v11971_v58 }
 0x6c9   :  { %v4923_v2 = vpop.f32.mrb[52].mxu0  ;;  %v4994_v56 = vpop.f32.mrb[52].mxu1 }
 0x6ca   :  { %v10305_v16 = vadd.f32 %v11641_v52, %v4923_v2  ;;  %v10306_v26 = vadd.f32 %v11647_v15, %v4994_v56  ;;  %v9283_v27 = vpop.f32.mrb[53].mxu0  ;;  %v9294_v41 = vpop.f32.mrb[53].mxu1 }
 0x6cc   :  { %v8026_v47 = vmul.f32 -1.442695, %v10305_v16  ;;  %v8027_v49 = vmul.f32 -1.442695, %v10306_v26 }
 0x6ce   :  { %10537 = vpow2.f32 %v8026_v47 }
 0x6cf   :  { %10539 = vpow2.f32 %v8027_v49 }
 0x6d1   :  { %v5065_v9 = vpop.f32.mrb[54].mxu0  ;;  %v5136_v45 = vpop.f32.mrb[54].mxu1 }
 0x6d2   :  { %v9305_v10 = vpop.f32.mrb[55].mxu0  ;;  %v9316_v61 = vpop.f32.mrb[55].mxu1  ;;  %v10307_v62 = vadd.f32 %v11653_v46, %v5065_v9 }
 0x6d4   :  { %10541 = vtanh.f32 %v10307_v62 }
 0x6d8   :  { %v10538_v54 = vpop.eup %10537 }
 0x6d9   :  { %v10540_v5 = vpop.eup %10539  ;;  %v5144_v6 = vadd.f32 1.0, %v10538_v54  ;;  %v5231_v63 = vpop.f32.mrb[56].mxu0 }
 0x6da   :  { %v5302_v0 = vpop.f32.mrb[56].mxu1  ;;  %v5150_v17 = vadd.f32 1.0, %v10540_v5  ;;  %v5235_v40 = vadd.f32 %v5231_v63, %v11973_v39  ;;  %v9327_v55 = vpop.f32.mrb[57].mxu0  ;;  %v11666_v5 = vld [vmem:[%s11951_s6 + $0x3] ss:$0 sm:$0xff] }
 0x6db   :  { %v5306_v21 = vadd.f32 %v5302_v0, %v11974_v20  ;;  %v9338_v53 = vpop.f32.mrb[57].mxu1  ;;  %10543 = vrcp.f32 %v5144_v6  ;;  %v10308_v6 = vadd.f32 %v11666_v5, %v5136_v45 }
 0x6dc   :  { %10545 = vrcp.f32 %v5150_v17  ;;  %v8033_v30 = vmul.f32 -1.442695, %v5235_v40 }
 0x6dd   :  { %v8034_v3 = vmul.f32 -1.442695, %v5306_v21  ;;  %v8028_v17 = vmul.f32 -1.442695, %v10308_v6 }
 0x6de   :  { %10547 = vpow2.f32 %v8033_v30  ;;  %v10542_v16 = vpop.eup %10541 }
 0x6df   :  { %10549 = vpow2.f32 %v8034_v3 }
 0x6e1   :  { %v5373_v12 = vpop.f32.mrb[58].mxu0  ;;  %v5444_v1 = vpop.f32.mrb[58].mxu1 }
 0x6e2   :  { %v5377_v4 = vadd.f32 %v5373_v12, %v11975_v28  ;;  %v5448_v14 = vadd.f32 %v5444_v1, %v11976_v60  ;;  %v9349_v2 = vpop.f32.mrb[59].mxu0  ;;  %v9360_v56 = vpop.f32.mrb[59].mxu1 }
 0x6e4   :  { %v8035_v47 = vmul.f32 -1.442695, %v5448_v14 }
 0x6e5   :  { %v10544_v26 = vpop.eup %10543 }
 0x6e6   :  { %v10546_v27 = vpop.eup %10545  ;;  %v5161_v41 = vmul.f32 %v10544_v26, %v10542_v16  ;;  %10551 = vpow2.f32 %v8035_v47 }
 0x6e7   :  { %v5160_v49 = vmul.f32 %v10546_v27, %v11536_v29  ;;  %10553 = vtanh.f32 %v5377_v4 }
 0x6e8   :  { %v10548_v9 = vpop.eup %10547 }
 0x6e9   :  { %v10550_v10 = vpop.eup %10549  ;;  %v11661_v61 = vadd.f32 %v5161_v41, %v5160_v49  ;;  %v5452_v62 = vadd.f32 1.0, %v10548_v9 }
 0x6ea   :  { %v5458_v54 = vadd.f32 1.0, %v10550_v10 }
 0x6eb   :  { %10555 = vrcp.f32 %v5452_v62 }
 0x6ec   :  { %10557 = vrcp.f32 %v5458_v54 }
 0x6ed   :  { %10559 = vpow2.f32 %v8028_v17  ;;  %v11977_v17 = vld [vmem:[#allocation14_spill] sm:$0xff] }
 0x6f0   :  { %v10552_v63 = vpop.eup %10551 }
 0x6f1   :  { %v10554_v0 = vpop.eup %10553  ;;  %v5465_v20 = vadd.f32 1.0, %v10552_v63 }
 0x6f3   :  { %10561 = vrcp.f32 %v5465_v20 }
 0x6f5   :  { %v10556_v29 = vpop.eup %10555 }
 0x6f6   :  { %v10558_v39 = vpop.eup %10557  ;;  %v5469_v40 = vmul.f32 %v10556_v29, %v10554_v0 }
 0x6f7   :  { %v5468_v21 = vmul.f32 %v10558_v39, %v11540_v35  ;;  %v10560_v53 = vpop.eup %10559 }
 0x6f8   :  { %v5157_v45 = vadd.f32 1.0, %v10560_v53 }
 0x6f9   :  { %v11670_v55 = vadd.f32 %v5469_v40, %v5468_v21  ;;  %v11978_v40 = vld [vmem:[#allocation15_spill] sm:$0xff] }
 0x6fb   :  { %10563 = vtanh.f32 %v11670_v55 }
 0x6fc   :  { %10565 = vtanh.f32 %v11661_v61 }
 0x6fd   :  { %v10562_v30 = vpop.eup %10561  ;;  %10567 = vrcp.f32 %v5157_v45 }
 0x705   :  { %v10564_v3 = vpop.eup %10563 }
 0x706   :  { %v11673_v12 = vmul.f32 %v10564_v3, %v10562_v30  ;;  %v10566_v35 = vpop.eup %10565 }
 0x707   :  { %v10568_v1 = vpop.eup %10567 }
 0x708   :  { %9370 = vmatmul.mubr.msk.f32.vlgmr.msra.gmra.mrb[60].mxu0 %vm630_vm2, %v11673_v12  ;;  %9381 = vmatmul.mubr.msk.f32.vlgmr.msra.gmra.mrb[60].mxu1 %vm630_vm2, %v11673_v12  ;;  %v5164_v28 = vmul.f32 %v10568_v1, %v10566_v35  ;;  %v11979_v35 = vld [vmem:[#allocation20_spill] sm:$0xff] }
 0x709   :  { %10111 = vmatpush3.bf16.msra.mxu0 %v11061_v7  ;;  %10117 = vmatpush3.bf16.msra.mxu1 %v11063_v59 }
 0x70a   :  { %10112 = vmatprep.subr.bf16.mxu0 %v11971_v58  ;;  %10118 = vmatprep.subr.bf16.mxu1 %v11971_v58 }
 0x70b   :  { %9391 = vmatprep.mubr.msk.f32.mxu0 %vm10729_vm1, %v11972_v36  ;;  %9402 = vmatprep.mubr.msk.f32.mxu1 %vm10729_vm1, %v11972_v36 }
 0x70d   :  { %10114 = vmatpush3.bf16.msra.mxu0 %v11073_v51  ;;  %10120 = vmatpush3.bf16.msra.mxu1 %v11075_v57 }
 0x70e   :  { %10121 = vmatprep.subr.bf16.mxu0 %v11971_v58  ;;  %10127 = vmatprep.subr.bf16.mxu1 %v11971_v58 }
 0x710   :  { %9392 = vmatmul.mubr.msk.f32.vlgmr.msra.gmra.mrb[62].mxu0 %vm630_vm2, %v11673_v12  ;;  %9403 = vmatmul.mubr.msk.f32.vlgmr.msra.gmra.mrb[62].mxu1 %vm630_vm2, %v11673_v12 }
 0x711   :  { %10123 = vmatpush3.bf16.msra.mxu0 %v11085_v22  ;;  %10129 = vmatpush3.bf16.msra.mxu1 %v11087_v23 }
 0x712   :  { %10124 = vmatprep.subr.bf16.mxu0 %v11971_v58  ;;  %10130 = vmatprep.subr.bf16.mxu1 %v11971_v58 }
 0x713   :  { %9413 = vmatprep.mubr.msk.f32.mxu0 %vm10729_vm1, %v11972_v36  ;;  %9424 = vmatprep.mubr.msk.f32.mxu1 %vm10729_vm1, %v11972_v36 }
 0x715   :  { %10126 = vmatpush3.bf16.msra.mxu0 %v11097_v8  ;;  %10132 = vmatpush3.bf16.msra.mxu1 %v11099_v43 }
 0x716   :  { %10133 = vmatprep.subr.bf16.mxu0 %v11971_v58  ;;  %10139 = vmatprep.subr.bf16.mxu1 %v11971_v58 }
 0x718   :  { %9414 = vmatmul.mubr.msk.f32.vlgmr.msra.gmra.mrb[60].mxu0 %vm630_vm2, %v5164_v28  ;;  %9425 = vmatmul.mubr.msk.f32.vlgmr.msra.gmra.mrb[60].mxu1 %vm630_vm2, %v5164_v28 }
 0x719   :  { %10135 = vmatpush3.bf16.msra.mxu0 %v11109_v11  ;;  %10141 = vmatpush3.bf16.msra.mxu1 %v11111_v13 }
 0x71a   :  { %10136 = vmatprep.subr.bf16.mxu0 %v11971_v58  ;;  %10142 = vmatprep.subr.bf16.mxu1 %v11971_v58 }
 0x71b   :  { %9435 = vmatprep.mubr.msk.f32.mxu0 %vm10729_vm1, %v11972_v36  ;;  %9446 = vmatprep.mubr.msk.f32.mxu1 %vm10729_vm1, %v11972_v36 }
 0x71d   :  { %10138 = vmatpush3.bf16.msra.mxu0 %v11119_v33  ;;  %10144 = vmatpush3.bf16.msra.mxu1 %v11121_v34 }
 0x71e   :  { %10145 = vmatprep.subr.bf16.mxu0 %v11971_v58  ;;  %10151 = vmatprep.subr.bf16.mxu1 %v11971_v58 }
 0x720   :  { %9436 = vmatmul.mubr.msk.f32.vlgmr.msra.gmra.mrb[62].mxu0 %vm630_vm2, %v5164_v28  ;;  %9447 = vmatmul.mubr.msk.f32.vlgmr.msra.gmra.mrb[62].mxu1 %vm630_vm2, %v5164_v28  ;;  %v11980_v28 = vld [vmem:[#allocation21_spill] sm:$0xff] }
 0x721   :  { %10147 = vmatpush3.bf16.msra.mxu0 %v10892_v18  ;;  %10153 = vmatpush3.bf16.msra.mxu1 %v10894_v19 }
 0x722   :  { %10148 = vmatprep.subr.bf16.mxu0 %v11971_v58  ;;  %10154 = vmatprep.subr.bf16.mxu1 %v11971_v58 }
 0x723   :  { %9457 = vmatprep.mubr.msk.f32.mxu0 %vm10729_vm1, %v11972_v36  ;;  %9468 = vmatprep.mubr.msk.f32.mxu1 %vm10729_vm1, %v11972_v36 }
 0x725   :  { %10150 = vmatpush3.bf16.msra.mxu0 %v10902_v24  ;;  %10156 = vmatpush3.bf16.msra.mxu1 %v10904_v25 }
 0x726   :  { %10157 = vmatprep.subr.bf16.mxu0 %v11971_v58  ;;  %10163 = vmatprep.subr.bf16.mxu1 %v11971_v58 }
 0x728   :  { %9458 = vmatmul.mubr.msk.f32.vlgmr.msra.gmra.mrb[64].mxu0 %vm630_vm2, %v11673_v12  ;;  %9469 = vmatmul.mubr.msk.f32.vlgmr.msra.gmra.mrb[64].mxu1 %vm630_vm2, %v11673_v12 }
 0x729   :  { %10159 = vmatpush3.bf16.msra.mxu0 %v10926_v31  ;;  %10165 = vmatpush3.bf16.msra.mxu1 %v10928_v32 }
 0x72a   :  { %10160 = vmatprep.subr.bf16.mxu0 %v11971_v58  ;;  %10166 = vmatprep.subr.bf16.mxu1 %v11971_v58 }
 0x72b   :  { %9479 = vmatprep.mubr.msk.f32.mxu0 %vm10729_vm1, %v11972_v36  ;;  %9490 = vmatprep.mubr.msk.f32.mxu1 %vm10729_vm1, %v11972_v36 }
 0x72d   :  { %10162 = vmatpush3.bf16.msra.mxu0 %v10934_v37  ;;  %10168 = vmatpush3.bf16.msra.mxu1 %v10936_v38 }
 0x72e   :  { %10169 = vmatprep.subr.bf16.mxu0 %v11971_v58  ;;  %10175 = vmatprep.subr.bf16.mxu1 %v11971_v58 }
 0x730   :  { %9480 = vmatmul.mubr.msk.f32.vlgmr.msra.gmra.mrb[66].mxu0 %vm630_vm2, %v11673_v12  ;;  %9491 = vmatmul.mubr.msk.f32.vlgmr.msra.gmra.mrb[66].mxu1 %vm630_vm2, %v11673_v12 }
 0x731   :  { %10171 = vmatpush3.bf16.msra.mxu0 %v10954_v42  ;;  %10177 = vmatpush3.bf16.msra.mxu1 %v10956_v44 }
 0x732   :  { %10172 = vmatprep.subr.bf16.mxu0 %v11971_v58  ;;  %10178 = vmatprep.subr.bf16.mxu1 %v11971_v58 }
 0x733   :  { %9501 = vmatprep.mubr.msk.f32.mxu0 %vm10729_vm1, %v11972_v36  ;;  %9512 = vmatprep.mubr.msk.f32.mxu1 %vm10729_vm1, %v11972_v36 }
 0x735   :  { %10174 = vmatpush3.bf16.msra.mxu0 %v10962_v48  ;;  %10180 = vmatpush3.bf16.msra.mxu1 %v10964_v50 }
 0x736   :  { %10181 = vmatprep.subr.bf16.mxu0 %v11971_v58  ;;  %10187 = vmatprep.subr.bf16.mxu1 %v11971_v58 }
 0x7eb   :  { %v5825_v4 = vpop.f32.mrb[60].mxu0  ;;  %v5896_v60 = vpop.f32.mrb[60].mxu1 }
 0x7ec   :  { %v10309_v14 = vadd.f32 %v11641_v52, %v5825_v4  ;;  %v10310_v2 = vadd.f32 %v11647_v15, %v5896_v60  ;;  %v9415_v56 = vpop.f32.mrb[61].mxu0  ;;  %v9426_v16 = vpop.f32.mrb[61].mxu1 }
 0x7ee   :  { %v8044_v26 = vmul.f32 -1.442695, %v10309_v14  ;;  %v8045_v27 = vmul.f32 -1.442695, %v10310_v2 }
 0x7f0   :  { %10569 = vpow2.f32 %v8044_v26 }
 0x7f1   :  { %10571 = vpow2.f32 %v8045_v27 }
 0x7f3   :  { %v5967_v41 = vpop.f32.mrb[62].mxu0  ;;  %v6038_v47 = vpop.f32.mrb[62].mxu1 }
 0x7f4   :  { %v9437_v49 = vpop.f32.mrb[63].mxu0  ;;  %v9448_v9 = vpop.f32.mrb[63].mxu1  ;;  %v10311_v10 = vadd.f32 %v11653_v46, %v5967_v41 }
 0x7f6   :  { %10573 = vtanh.f32 %v10311_v10 }
 0x7fa   :  { %v10570_v62 = vpop.eup %10569 }
 0x7fb   :  { %v10572_v54 = vpop.eup %10571  ;;  %v6046_v6 = vadd.f32 1.0, %v10570_v62  ;;  %v6133_v63 = vpop.f32.mrb[64].mxu0 }
 0x7fc   :  { %v6204_v0 = vpop.f32.mrb[64].mxu1  ;;  %v6052_v29 = vadd.f32 1.0, %v10572_v54  ;;  %v6137_v39 = vadd.f32 %v6133_v63, %v11977_v17  ;;  %v9459_v21 = vpop.f32.mrb[65].mxu0 }
 0x7fd   :  { %v6208_v20 = vadd.f32 %v6204_v0, %v11978_v40  ;;  %v9470_v53 = vpop.f32.mrb[65].mxu1  ;;  %10575 = vrcp.f32 %v6046_v6  ;;  %v10312_v6 = vadd.f32 %v11666_v5, %v6038_v47 }
 0x7fe   :  { %10577 = vrcp.f32 %v6052_v29  ;;  %v8051_v30 = vmul.f32 -1.442695, %v6137_v39 }
 0x7ff   :  { %v8052_v3 = vmul.f32 -1.442695, %v6208_v20  ;;  %v8046_v17 = vmul.f32 -1.442695, %v10312_v6 }
 0x800   :  { %10579 = vpow2.f32 %v8051_v30  ;;  %v10574_v2 = vpop.eup %10573 }
 0x801   :  { %10581 = vpow2.f32 %v8052_v3 }
 0x803   :  { %v6275_v12 = vpop.f32.mrb[66].mxu0  ;;  %v6346_v45 = vpop.f32.mrb[66].mxu1 }
 0x804   :  { %v6279_v1 = vadd.f32 %v6275_v12, %v11979_v35  ;;  %v6350_v4 = vadd.f32 %v6346_v45, %v11980_v28  ;;  %v9481_v60 = vpop.f32.mrb[67].mxu0  ;;  %v9492_v14 = vpop.f32.mrb[67].mxu1 }
 0x806   :  { %v8053_v27 = vmul.f32 -1.442695, %v6350_v4 }
 0x807   :  { %v10576_v56 = vpop.eup %10575 }
 0x808   :  { %v10578_v16 = vpop.eup %10577  ;;  %v6063_v26 = vmul.f32 %v10576_v56, %v10574_v2  ;;  %10583 = vpow2.f32 %v8053_v27  ;;  %v11982_v27 = vld [vmem:[#allocation13_spill] sm:$0xff] }
 0x809   :  { %v6062_v41 = vmul.f32 %v10578_v16, %v11661_v61  ;;  %10585 = vtanh.f32 %v6279_v1  ;;  %v11981_v16 = vld [vmem:[#allocation12_spill] sm:$0xff] }
 0x80a   :  { %v10580_v49 = vpop.eup %10579 }
 0x80b   :  { %v10582_v9 = vpop.eup %10581  ;;  %v11776_v10 = vadd.f32 %v6063_v26, %v6062_v41  ;;  %v6354_v62 = vadd.f32 1.0, %v10580_v49 }
 0x80c   :  { %v6360_v54 = vadd.f32 1.0, %v10582_v9 }
 0x80d   :  { %10587 = vrcp.f32 %v6354_v62 }
 0x80e   :  { %10589 = vrcp.f32 %v6360_v54 }
 0x80f   :  { %10591 = vpow2.f32 %v8046_v17  ;;  %v11984_v17 = vld [vmem:[#allocation19_spill] sm:$0xff] }
 0x812   :  { %v10584_v63 = vpop.eup %10583 }
 0x813   :  { %v10586_v0 = vpop.eup %10585  ;;  %v6367_v20 = vadd.f32 1.0, %v10584_v63 }
 0x815   :  { %10593 = vrcp.f32 %v6367_v20 }
 0x817   :  { %v10588_v29 = vpop.eup %10587 }
 0x818   :  { %v10590_v39 = vpop.eup %10589  ;;  %v6371_v40 = vmul.f32 %v10588_v29, %v10586_v0  ;;  %v11983_v0 = vld [vmem:[#allocation18_spill] sm:$0xff] }
 0x819   :  { %v6370_v61 = vmul.f32 %v10590_v39, %v11670_v55  ;;  %v10592_v53 = vpop.eup %10591 }
 0x81a   :  { %v6059_v47 = vadd.f32 1.0, %v10592_v53 }
 0x81b   :  { %v11780_v21 = vadd.f32 %v6371_v40, %v6370_v61 }
 0x81d   :  { %10595 = vtanh.f32 %v11780_v21 }
 0x81e   :  { %10597 = vtanh.f32 %v11776_v10 }
 0x81f   :  { %v10594_v30 = vpop.eup %10593  ;;  %10599 = vrcp.f32 %v6059_v47 }
 0x827   :  { %v10596_v3 = vpop.eup %10595 }
 0x828   :  { %v11783_v12 = vmul.f32 %v10596_v3, %v10594_v30  ;;  %v10598_v55 = vpop.eup %10597 }
 0x829   :  { %v10600_v45 = vpop.eup %10599 }
 0x82a   :  { %9502 = vmatmul.mubr.msk.f32.vlgmr.msra.gmra.mrb[68].mxu0 %vm630_vm2, %v11783_v12  ;;  %9513 = vmatmul.mubr.msk.f32.vlgmr.msra.gmra.mrb[68].mxu1 %vm630_vm2, %v11783_v12  ;;  %v6066_v35 = vmul.f32 %v10600_v45, %v10598_v55 }
 0x82b   :  { %10183 = vmatpush3.bf16.msra.mxu0 %v11061_v7  ;;  %10189 = vmatpush3.bf16.msra.mxu1 %v11063_v59 }
 0x82c   :  { %10184 = vmatprep.subr.bf16.mxu0 %v11971_v58  ;;  %10190 = vmatprep.subr.bf16.mxu1 %v11971_v58 }
 0x82d   :  { %9523 = vmatprep.mubr.msk.f32.mxu0 %vm10729_vm1, %v11972_v36  ;;  %9534 = vmatprep.mubr.msk.f32.mxu1 %vm10729_vm1, %v11972_v36 }
 0x82f   :  { %10186 = vmatpush3.bf16.msra.mxu0 %v11073_v51  ;;  %10192 = vmatpush3.bf16.msra.mxu1 %v11075_v57 }
 0x830   :  { %10193 = vmatprep.subr.bf16.mxu0 %v11971_v58  ;;  %10199 = vmatprep.subr.bf16.mxu1 %v11971_v58 }
 0x832   :  { %9524 = vmatmul.mubr.msk.f32.vlgmr.msra.gmra.mrb[70].mxu0 %vm630_vm2, %v11783_v12  ;;  %9535 = vmatmul.mubr.msk.f32.vlgmr.msra.gmra.mrb[70].mxu1 %vm630_vm2, %v11783_v12 }
 0x833   :  { %10195 = vmatpush3.bf16.msra.mxu0 %v11085_v22  ;;  %10201 = vmatpush3.bf16.msra.mxu1 %v11087_v23 }
 0x834   :  { %10196 = vmatprep.subr.bf16.mxu0 %v11971_v58  ;;  %10202 = vmatprep.subr.bf16.mxu1 %v11971_v58 }
 0x835   :  { %9545 = vmatprep.mubr.msk.f32.mxu0 %vm10729_vm1, %v11972_v36  ;;  %9556 = vmatprep.mubr.msk.f32.mxu1 %vm10729_vm1, %v11972_v36 }
 0x837   :  { %10198 = vmatpush3.bf16.msra.mxu0 %v11097_v8  ;;  %10204 = vmatpush3.bf16.msra.mxu1 %v11099_v43 }
 0x838   :  { %10205 = vmatprep.subr.bf16.mxu0 %v11971_v58  ;;  %10211 = vmatprep.subr.bf16.mxu1 %v11971_v58 }
 0x83a   :  { %9546 = vmatmul.mubr.msk.f32.vlgmr.msra.gmra.mrb[68].mxu0 %vm630_vm2, %v6066_v35  ;;  %9557 = vmatmul.mubr.msk.f32.vlgmr.msra.gmra.mrb[68].mxu1 %vm630_vm2, %v6066_v35 }
 0x83b   :  { %10207 = vmatpush3.bf16.msra.mxu0 %v11109_v11  ;;  %10213 = vmatpush3.bf16.msra.mxu1 %v11111_v13 }
 0x83c   :  { %10208 = vmatprep.subr.bf16.mxu0 %v11971_v58  ;;  %10214 = vmatprep.subr.bf16.mxu1 %v11971_v58 }
 0x83d   :  { %9567 = vmatprep.mubr.msk.f32.mxu0 %vm10729_vm1, %v11972_v36  ;;  %9578 = vmatprep.mubr.msk.f32.mxu1 %vm10729_vm1, %v11972_v36 }
 0x83f   :  { %10210 = vmatpush3.bf16.msra.mxu0 %v11119_v33  ;;  %10216 = vmatpush3.bf16.msra.mxu1 %v11121_v34 }
 0x840   :  { %10217 = vmatprep.subr.bf16.mxu0 %v11971_v58  ;;  %10223 = vmatprep.subr.bf16.mxu1 %v11971_v58 }
 0x842   :  { %9568 = vmatmul.mubr.msk.f32.vlgmr.msra.gmra.mrb[70].mxu0 %vm630_vm2, %v6066_v35  ;;  %9579 = vmatmul.mubr.msk.f32.vlgmr.msra.gmra.mrb[70].mxu1 %vm630_vm2, %v6066_v35 }
 0x843   :  { %10219 = vmatpush3.bf16.msra.mxu0 %v10892_v18  ;;  %10225 = vmatpush3.bf16.msra.mxu1 %v10894_v19 }
 0x844   :  { %10220 = vmatprep.subr.bf16.mxu0 %v11971_v58  ;;  %10226 = vmatprep.subr.bf16.mxu1 %v11971_v58 }
 0x845   :  { %9589 = vmatprep.mubr.msk.f32.mxu0 %vm10729_vm1, %v11972_v36  ;;  %9600 = vmatprep.mubr.msk.f32.mxu1 %vm10729_vm1, %v11972_v36 }
 0x847   :  { %10222 = vmatpush3.bf16.msra.mxu0 %v10902_v24  ;;  %10228 = vmatpush3.bf16.msra.mxu1 %v10904_v25 }
 0x848   :  { %10229 = vmatprep.subr.bf16.mxu0 %v11971_v58  ;;  %10235 = vmatprep.subr.bf16.mxu1 %v11971_v58 }
 0x84a   :  { %9590 = vmatmul.mubr.msk.f32.vlgmr.msra.gmra.mrb[72].mxu0 %vm630_vm2, %v11783_v12  ;;  %9601 = vmatmul.mubr.msk.f32.vlgmr.msra.gmra.mrb[72].mxu1 %vm630_vm2, %v11783_v12 }
 0x84b   :  { %10231 = vmatpush3.bf16.msra.mxu0 %v10926_v31  ;;  %10237 = vmatpush3.bf16.msra.mxu1 %v10928_v32 }
 0x84c   :  { %10232 = vmatprep.subr.bf16.mxu0 %v11971_v58  ;;  %10238 = vmatprep.subr.bf16.mxu1 %v11971_v58 }
 0x84d   :  { %9611 = vmatprep.mubr.msk.f32.mxu0 %vm10729_vm1, %v11972_v36  ;;  %9622 = vmatprep.mubr.msk.f32.mxu1 %vm10729_vm1, %v11972_v36 }
 0x84f   :  { %10234 = vmatpush3.bf16.msra.mxu0 %v10934_v37  ;;  %10240 = vmatpush3.bf16.msra.mxu1 %v10936_v38 }
 0x850   :  { %10241 = vmatprep.subr.bf16.mxu0 %v11971_v58  ;;  %10247 = vmatprep.subr.bf16.mxu1 %v11971_v58 }
 0x852   :  { %9612 = vmatmul.mubr.msk.f32.vlgmr.msra.gmra.mrb[74].mxu0 %vm630_vm2, %v11783_v12  ;;  %9623 = vmatmul.mubr.msk.f32.vlgmr.msra.gmra.mrb[74].mxu1 %vm630_vm2, %v11783_v12 }
 0x853   :  { %10243 = vmatpush3.bf16.msra.mxu0 %v10954_v42  ;;  %10249 = vmatpush3.bf16.msra.mxu1 %v10956_v44 }
 0x854   :  { %10244 = vmatprep.subr.bf16.mxu0 %v11971_v58  ;;  %10250 = vmatprep.subr.bf16.mxu1 %v11971_v58 }
 0x855   :  { %9633 = vmatprep.mubr.msk.f32.mxu0 %vm10729_vm1, %v11972_v36  ;;  %9644 = vmatprep.mubr.msk.f32.mxu1 %vm10729_vm1, %v11972_v36 }
 0x857   :  { %10246 = vmatpush3.bf16.msra.mxu0 %v10962_v48  ;;  %10252 = vmatpush3.bf16.msra.mxu1 %v10964_v50 }
 0x858   :  { %10253 = vmatprep.subr.bf16.mxu0 %v11971_v58  ;;  %10259 = vmatprep.subr.bf16.mxu1 %v11971_v58 }
 0x90d   :  { %v6727_v18 = vpop.f32.mrb[68].mxu0  ;;  %v6798_v19 = vpop.f32.mrb[68].mxu1 }
 0x90e   :  { %v10313_v24 = vadd.f32 %v11641_v52, %v6727_v18  ;;  %v10314_v25 = vadd.f32 %v11647_v15, %v6798_v19  ;;  %v9547_v31 = vpop.f32.mrb[69].mxu0  ;;  %v9558_v32 = vpop.f32.mrb[69].mxu1 }
 0x910   :  { %v8062_v37 = vmul.f32 -1.442695, %v10313_v24  ;;  %v8063_v38 = vmul.f32 -1.442695, %v10314_v25 }
 0x912   :  { %10601 = vpow2.f32 %v8062_v37 }
 0x913   :  { %10603 = vpow2.f32 %v8063_v38 }
 0x915   :  { %v6869_v42 = vpop.f32.mrb[70].mxu0  ;;  %v6940_v44 = vpop.f32.mrb[70].mxu1 }
 0x916   :  { %v9569_v48 = vpop.f32.mrb[71].mxu0  ;;  %v9580_v50 = vpop.f32.mrb[71].mxu1  ;;  %v10315_v1 = vadd.f32 %v11653_v46, %v6869_v42  ;;  %v10316_v24 = vadd.f32 %v11666_v5, %v6940_v44 }
 0x918   :  { %10605 = vtanh.f32 %v10315_v1  ;;  %v8064_v37 = vmul.f32 -1.442695, %v10316_v24 }
 0x91c   :  { %v10602_v28 = vpop.eup %10601 }
 0x91d   :  { %v10604_v4 = vpop.eup %10603  ;;  %v6948_v60 = vadd.f32 1.0, %v10602_v28  ;;  %v7035_v14 = vpop.f32.mrb[72].mxu0 }
 0x91e   :  { %v7106_v2 = vpop.f32.mrb[72].mxu1  ;;  %v6954_v56 = vadd.f32 1.0, %v10604_v4  ;;  %v7039_v26 = vadd.f32 %v7035_v14, %v11981_v16  ;;  %v9591_v49 = vpop.f32.mrb[73].mxu0 }
 0x91f   :  { %v7110_v41 = vadd.f32 %v7106_v2, %v11982_v27  ;;  %v9602_v9 = vpop.f32.mrb[73].mxu1  ;;  %10607 = vrcp.f32 %v6948_v60 }
 0x920   :  { %10609 = vrcp.f32 %v6954_v56  ;;  %v8069_v62 = vmul.f32 -1.442695, %v7039_v26 }
 0x921   :  { %v8070_v54 = vmul.f32 -1.442695, %v7110_v41 }
 0x922   :  { %10611 = vpow2.f32 %v8069_v62  ;;  %v10606_v61 = vpop.eup %10605 }
 0x923   :  { %10613 = vpow2.f32 %v8070_v54 }
 0x925   :  { %v7177_v6 = vpop.f32.mrb[74].mxu0  ;;  %v7248_v63 = vpop.f32.mrb[74].mxu1 }
 0x926   :  { %v7181_v29 = vadd.f32 %v7177_v6, %v11983_v0  ;;  %v7252_v39 = vadd.f32 %v7248_v63, %v11984_v17  ;;  %v9613_v40 = vpop.f32.mrb[75].mxu0  ;;  %v9624_v20 = vpop.f32.mrb[75].mxu1  ;;  %v8083_v0 = vld [vmem:[%s11952_s7] ss:$0 sm:$0xff] }
 0x927   :  { %v8084_v40 = vld [vmem:[#allocation2] ss:$0 sm:$0xff] }
 0x928   :  { %v8071_v12 = vmul.f32 -1.442695, %v7252_v39 }
 0x929   :  { %v10608_v53 = vpop.eup %10607 }
 0x92a   :  { %v10610_v30 = vpop.eup %10609  ;;  %v6965_v3 = vmul.f32 %v10608_v53, %v10606_v61  ;;  %10615 = vpow2.f32 %v8071_v12 }
 0x92b   :  { %v6964_v47 = vmul.f32 %v10610_v30, %v11776_v10  ;;  %10617 = vtanh.f32 %v7181_v29 }
 0x92c   :  { %v10612_v55 = vpop.eup %10611 }
 0x92d   :  { %v10614_v45 = vpop.eup %10613  ;;  %v11886_v35 = vadd.f32 %v6965_v3, %v6964_v47  ;;  %v7256_v18 = vadd.f32 1.0, %v10612_v55 }
 0x92e   :  { %v7262_v19 = vadd.f32 1.0, %v10614_v45 }
 0x92f   :  { %10619 = vrcp.f32 %v7256_v18 }
 0x930   :  { %10621 = vrcp.f32 %v7262_v19 }
 0x931   :  { %10623 = vpow2.f32 %v8064_v37 }
 0x934   :  { %v10616_v25 = vpop.eup %10615 }
 0x935   :  { %v10618_v31 = vpop.eup %10617  ;;  %v7269_v48 = vadd.f32 1.0, %v10616_v25 }
 0x937   :  { %10625 = vrcp.f32 %v7269_v48 }
 0x939   :  { %v10620_v32 = vpop.eup %10619 }
 0x93a   :  { %v10622_v38 = vpop.eup %10621  ;;  %v7273_v42 = vmul.f32 %v10620_v32, %v10618_v31 }
 0x93b   :  { %v7272_v10 = vmul.f32 %v10622_v38, %v11780_v21  ;;  %v10624_v1 = vpop.eup %10623 }
 0x93c   :  { %v6961_v14 = vadd.f32 1.0, %v10624_v1 }
 0x93d   :  { %v7274_v50 = vadd.f32 %v7273_v42, %v7272_v10 }
 0x93f   :  { %10627 = vtanh.f32 %v7274_v50 }
 0x940   :  { %10629 = vtanh.f32 %v11886_v35 }
 0x941   :  { %v10626_v28 = vpop.eup %10625  ;;  %10631 = vrcp.f32 %v6961_v14 }
 0x949   :  { %v10628_v4 = vpop.eup %10627 }
 0x94a   :  { %v7276_v60 = vmul.f32 %v10628_v4, %v10626_v28 }
 0x94c   :  { %9634 = vmatmul.mubr.msk.f32.vlgmr.msra.gmra.mrb[76].mxu0 %vm630_vm2, %v7276_v60  ;;  %9645 = vmatmul.mubr.msk.f32.vlgmr.msra.gmra.mrb[76].mxu1 %vm630_vm2, %v7276_v60 }
 0x94d   :  { %10255 = vmatpush3.bf16.msra.mxu0 %v11061_v7  ;;  %10261 = vmatpush3.bf16.msra.mxu1 %v11063_v59  ;;  %v10630_v7 = vpop.eup %10629 }
 0x94e   :  { %10256 = vmatprep.subr.bf16.mxu0 %v11971_v58  ;;  %10262 = vmatprep.subr.bf16.mxu1 %v11971_v58  ;;  %v10632_v59 = vpop.eup %10631 }
 0x94f   :  { %9655 = vmatprep.mubr.msk.f32.mxu0 %vm10729_vm1, %v11972_v36  ;;  %9666 = vmatprep.mubr.msk.f32.mxu1 %vm10729_vm1, %v11972_v36 }
 0x951   :  { %10258 = vmatpush3.bf16.msra.mxu0 %v11073_v51  ;;  %10264 = vmatpush3.bf16.msra.mxu1 %v11075_v57  ;;  %v6968_v51 = vmul.f32 %v10632_v59, %v10630_v7 }
 0x952   :  { %10265 = vmatprep.subr.bf16.mxu0 %v11971_v58  ;;  %10271 = vmatprep.subr.bf16.mxu1 %v11971_v58 }
 0x954   :  { %9656 = vmatmul.mubr.msk.f32.vlgmr.msra.gmra.mrb[78].mxu0 %vm630_vm2, %v7276_v60  ;;  %9667 = vmatmul.mubr.msk.f32.vlgmr.msra.gmra.mrb[78].mxu1 %vm630_vm2, %v7276_v60 }
 0x955   :  { %10267 = vmatpush3.bf16.msra.mxu0 %v11085_v22  ;;  %10273 = vmatpush3.bf16.msra.mxu1 %v11087_v23 }
 0x956   :  { %10268 = vmatprep.subr.bf16.mxu0 %v11971_v58  ;;  %10274 = vmatprep.subr.bf16.mxu1 %v11971_v58 }
 0x957   :  { %9677 = vmatprep.mubr.msk.f32.mxu0 %vm10729_vm1, %v11972_v36  ;;  %9688 = vmatprep.mubr.msk.f32.mxu1 %vm10729_vm1, %v11972_v36 }
 0x959   :  { %10270 = vmatpush3.bf16.msra.mxu0 %v11097_v8  ;;  %10276 = vmatpush3.bf16.msra.mxu1 %v11099_v43 }
 0x95a   :  { %10277 = vmatprep.subr.bf16.mxu0 %v11971_v58  ;;  %10283 = vmatprep.subr.bf16.mxu1 %v11971_v58 }
 0x95c   :  { %9678 = vmatmul.mubr.msk.f32.vlgmr.msra.gmra.mrb[76].mxu0 %vm630_vm2, %v6968_v51  ;;  %9689 = vmatmul.mubr.msk.f32.vlgmr.msra.gmra.mrb[76].mxu1 %vm630_vm2, %v6968_v51 }
 0x95d   :  { %10279 = vmatpush3.bf16.msra.mxu0 %v11109_v11  ;;  %10285 = vmatpush3.bf16.msra.mxu1 %v11111_v13 }
 0x95e   :  { %10280 = vmatprep.subr.bf16.mxu0 %v11971_v58  ;;  %10286 = vmatprep.subr.bf16.mxu1 %v11971_v58 }
 0x95f   :  { %9699 = vmatprep.mubr.msk.f32.mxu0 %vm10729_vm1, %v11972_v36  ;;  %9710 = vmatprep.mubr.msk.f32.mxu1 %vm10729_vm1, %v11972_v36 }
 0x961   :  { %10282 = vmatpush3.bf16.msra.mxu0 %v11119_v33  ;;  %10288 = vmatpush3.bf16.msra.mxu1 %v11121_v34 }
 0x964   :  { %9700 = vmatmul.mubr.msk.f32.vlgmr.msra.gmra.mrb[78].mxu0 %vm630_vm2, %v6968_v51  ;;  %9711 = vmatmul.mubr.msk.f32.vlgmr.msra.gmra.mrb[78].mxu1 %vm630_vm2, %v6968_v51 }
 0xa2f   :  { %v7629_v57 = vpop.f32.mrb[76].mxu0  ;;  %v7700_v22 = vpop.f32.mrb[76].mxu1 }
 0xa30   :  { %v10317_v23 = vadd.f32 %v11641_v52, %v7629_v57  ;;  %v10318_v58 = vadd.f32 %v11647_v15, %v7700_v22  ;;  %v9679_v8 = vpop.f32.mrb[77].mxu0  ;;  %v9690_v43 = vpop.f32.mrb[77].mxu1 }
 0xa32   :  { %v8080_v11 = vmul.f32 -1.442695, %v10317_v23  ;;  %v8081_v13 = vmul.f32 -1.442695, %v10318_v58 }
 0xa34   :  { %10633 = vpow2.f32 %v8080_v11 }
 0xa35   :  { %10635 = vpow2.f32 %v8081_v13 }
 0xa37   :  { %v7771_v36 = vpop.f32.mrb[78].mxu0  ;;  %v7842_v33 = vpop.f32.mrb[78].mxu1 }
 0xa38   :  { %v10320_v34 = vadd.f32 %v11666_v5, %v7842_v33  ;;  %v9701_v21 = vpop.f32.mrb[79].mxu0  ;;  %v9712_v44 = vpop.f32.mrb[79].mxu1  ;;  %v10319_v56 = vadd.f32 %v11653_v46, %v7771_v36 }
 0xa3a   :  { %v8082_v2 = vmul.f32 -1.442695, %v10320_v34 }
 0xa3c   :  { %10637 = vpow2.f32 %v8082_v2 }
 0xa3d   :  { %10639 = vtanh.f32 %v10319_v56 }
 0xa3e   :  { %v10634_v16 = vpop.eup %10633 }
 0xa3f   :  { %v10636_v26 = vpop.eup %10635  ;;  %v7850_v52 = vadd.f32 1.0, %v10634_v16 }
 0xa40   :  { %v7856_v15 = vadd.f32 1.0, %v10636_v26 }
 0xa41   :  { %10641 = vrcp.f32 %v7850_v52 }
 0xa42   :  { %10643 = vrcp.f32 %v7856_v15 }
 0xa46   :  { %v10638_v27 = vpop.eup %10637 }
 0xa47   :  { %v10640_v41 = vpop.eup %10639  ;;  %v7863_v54 = vadd.f32 1.0, %v10638_v27 }
 0xa49   :  { %10645 = vrcp.f32 %v7863_v54 }
 0xa4b   :  { %v10642_v49 = vpop.eup %10641 }
 0xa4c   :  { %v10644_v9 = vpop.eup %10643  ;;  %v7867_v62 = vmul.f32 %v10642_v49, %v10640_v41 }
 0xa4d   :  { %v7866_v5 = vmul.f32 %v10644_v9, %v11886_v35 }
 0xa4f   :  { %v7868_v6 = vadd.f32 %v7867_v62, %v7866_v5 }
 0xa51   :  { %10647 = vtanh.f32 %v7868_v6 }
 0xa53   :  { %v10646_v46 = vpop.eup %10645 }
 0xa5b   :  { %v10648_v63 = vpop.eup %10647 }
 0xa5c   :  { %v7870_v29 = vmul.f32 %v10648_v63, %v10646_v46 }
 0xa5e   :  { %v7878_v17 = vmul.f32 %v8083_v0, %v7870_v29 }
 0xa60   :  { %v7879_v39 = vsel %vm630_vm2, %v7878_v17, 0.0 }
 0xa61   :  { %7880 = vadd.xlane.f32.xlu0 %v7879_v39 }
 0xaee   :  { %v7881_v20 = vpop.xlane.xlu0 %7880 }
 0xaef   :  { %v7889_v61 = vadd.f32 %v8084_v40, %v7881_v20 }
 0xaf1   :  { %7891 = vst.msk [vmem:[%s11954_s9] sm:$0xff] %vm7890_vm3, %v7889_v61 }
 0xaf2   :  { %7896 = vsyncpa [#allocation4], 1 }
 0xaf3   :  { %7897 = vsyncpa [#allocation6], 1 }

</bundles_post_ra>
